<compile_context>
chip_gen: v7x
topology: tpu7x:2x2x1
jax: 0.10.0
libtpu: 0.0.40
codegen_flags: <defaults>
</compile_context>

<pallas_src>
import functools
import math

import jax
import jax.numpy as jnp
import numpy as np
from jax.experimental import pallas as pl
from jax.experimental.pallas import tpu as pltpu

DIM = 64                 # self.dim in VNetD
HALF = DIM // 2
_INV_SQRT2 = 0.7071067811865476


def _round_up(x, m):
    return ((x + m - 1) // m) * m


def _erf_approx(x):
    # Abramowitz & Stegun 7.1.26 (|abs err| < 1.5e-7), exp/mul/add/select only.
    a1, a2, a3, a4, a5 = (0.254829592, -0.284496736, 1.421413741,
                          -1.453152027, 1.061405429)
    p = 0.3275911
    ax = jnp.abs(x)
    t = pl.reciprocal(1.0 + p * ax, approx=True)      # EUP slot, not VALU divide
    poly = ((((a5 * t + a4) * t + a3) * t + a2) * t + a1) * t
    y = 1.0 - poly * jnp.exp(-ax * ax)
    return jnp.where(x < 0.0, -y, y)


def _gelu(x):
    # matches torch.nn.GELU() default (approximate='none')
    return 0.5 * x * (1.0 + _erf_approx(x * _INV_SQRT2))


def vnetd_kernel(t_ref, x_ref,
                 wt1_ref, bt1_ref, wt2_ref, bt2_ref,
                 wd1_ref, bd1_ref, wd2_ref, bd2_ref,
                 w1_ref, b1_ref, w2_ref, b2_ref, w3_ref, b3_ref,
                 out_ref, *, depth, data_dim, block_b):
    f32 = jnp.float32

    # sinusoidal frequencies as a compile-time constant (no HBM input / DMA)
    idx = jax.lax.broadcasted_iota(jnp.int32, (1, HALF), 1).astype(f32)
    freq = jnp.exp(idx * f32(-math.log(10000.0) / (HALF - 1)))        # (1, HALF)

    def dot(a, b):
        # default precision: single/multi-pass bf16 MXU path; tolerance is 1e-2
        return jnp.dot(a, b, preferred_element_type=f32)

    def branch(cols, w1, b1, w2, b2, n):
        # cols: (n*block_b, 1) scalar inputs, chunk-major along sublanes.
        arg = cols * freq                                             # (n*B, HALF)
        # [sin, cos] @ W1  ==  sin @ W1[:HALF] + cos @ W1[HALF:]  (fused, no concat)
        lin = dot(jnp.sin(arg), w1[:HALF, :]) + dot(jnp.cos(arg), w1[HALF:, :]) + b1
        h = _gelu(lin)                                                # (n*B, DIM)
        # Flatten @ W2 expressed as accumulation over 64-row slices of W2.
        acc = b2 + dot(h[0:block_b, :], w2[0:DIM, :])
        for c in range(1, n):
            acc = acc + dot(h[c * block_b:(c + 1) * block_b, :],
                            w2[c * DIM:(c + 1) * DIM, :])
        return acc                                                    # (B, depth*DIM)

    # hoisted, loop-invariant weight/bias loads (one vld each)
    wt1, bt1, wt2, bt2 = wt1_ref[...], bt1_ref[...], wt2_ref[...], bt2_ref[...]
    wd1, bd1, wd2, bd2 = wd1_ref[...], bd1_ref[...], wd2_ref[...], bd2_ref[...]

    t_out = branch(t_ref[...], wt1, bt1, wt2, bt2, depth)             # time branch
    x_out = branch(x_ref[...], wd1, bd1, wd2, bd2, depth * data_dim)  # data branch

    # trunk: cat([data, time]) @ W1  ==  data @ W1[:dw] + time @ W1[dw:]
    dw = depth * DIM
    w1 = w1_ref[...]
    h = _gelu(dot(x_out, w1[:dw, :]) + dot(t_out, w1[dw:, :]) + b1_ref[...])
    h = _gelu(dot(h, w2_ref[...]) + b2_ref[...])
    out_ref[...] = (dot(h, w3_ref[...]) + b3_ref[...]).astype(out_ref.dtype)


def _stack_cols(a2d, B, B_pad, block_b, n):
    # (B, n) -> (num_blocks * n * block_b, 1): batch-block major, then chunk,
    # then batch-within-block, so each grid step sees a contiguous 2D slab.
    nb = B_pad // block_b
    a = a2d.astype(jnp.float32)
    if B_pad != B:
        a = jnp.pad(a, ((0, B_pad - B), (0, 0)))
    a = a.reshape(nb, block_b, n)
    a = jnp.transpose(a, (0, 2, 1))                   # (nb, n, block_b)
    return a.reshape(nb * n * block_b, 1)


def vnetd_forward(xt, t, params, *, depth, data_dim, block_b=None):
    B = xt.shape[0]
    n_x = depth * data_dim
    if block_b is None:
        block_b = min(256, _round_up(B, 8))           # 256-row blocks feed 256x256 MXUs
    B_pad = _round_up(max(B, block_b), block_b)
    nb = B_pad // block_b

    t_stacked = _stack_cols(t, B, B_pad, block_b, depth)
    x_stacked = _stack_cols(xt.reshape(B, n_x), B, B_pad, block_b, n_x)

    # pad the final projection to a full 128-lane output (dense stores)
    out_cols = params["w3"].shape[-1]
    out_pad = _round_up(out_cols, 128)
    w3p = jnp.pad(params["w3"], ((0, 0), (0, out_pad - out_cols)))
    b3p = jnp.pad(params["b3"], ((0, 0), (0, out_pad - out_cols)))

    weights = (params["wt1"], params["bt1"], params["wt2"], params["bt2"],
               params["wd1"], params["bd1"], params["wd2"], params["bd2"],
               params["w1"], params["b1"], params["w2"], params["b2"],
               w3p, b3p)

    batch_map = lambda i: (i, 0)
    const_map = lambda i: (0, 0)
    in_specs = ([pl.BlockSpec((depth * block_b, 1), batch_map),
                 pl.BlockSpec((n_x * block_b, 1), batch_map)] +
                [pl.BlockSpec(w.shape, const_map) for w in weights])

    kernel = functools.partial(vnetd_kernel, depth=depth, data_dim=data_dim,
                               block_b=block_b)

    out = pl.pallas_call(
        kernel,
        out_shape=jax.ShapeDtypeStruct((B_pad, out_pad), jnp.float32),
        grid=(nb,),
        in_specs=in_specs,
        out_specs=pl.BlockSpec((block_b, out_pad), lambda i: (i, 0)),
        compiler_params=pltpu.CompilerParams(
            dimension_semantics=("parallel",)),
    )(t_stacked, x_stacked, *weights)

    return out[:B, :out_cols]


def init_params(key, data_dim=2, depth=2, hidden_num=128, dim=DIM):
    # Mimics torch.nn.Linear default init: U(-1/sqrt(in), 1/sqrt(in)).
    # Weights stored pre-transposed as (in, out) so the kernel computes x @ W + b.
    def linear(k, fan_in, fan_out):
        k1, k2 = jax.random.split(k)
        bound = 1.0 / math.sqrt(fan_in)
        w = jax.random.uniform(k1, (fan_in, fan_out), jnp.float32, -bound, bound)
        b = jax.random.uniform(k2, (1, fan_out), jnp.float32, -bound, bound)
        return w, b

    keys = jax.random.split(key, 7)
    p = {}
    p["wt1"], p["bt1"] = linear(keys[0], dim, dim)
    p["wt2"], p["bt2"] = linear(keys[1], depth * dim, depth * dim)
    p["wd1"], p["bd1"] = linear(keys[2], dim, dim)
    p["wd2"], p["bd2"] = linear(keys[3], data_dim * depth * dim, depth * dim)
    p["w1"], p["b1"] = linear(keys[4], 2 * depth * dim, 2 * depth * hidden_num)
    p["w2"], p["b2"] = linear(keys[5], 2 * depth * hidden_num, depth * hidden_num)
    p["w3"], p["b3"] = linear(keys[6], depth * hidden_num, data_dim)
    return p


def reference_forward(xt, t, params, *, depth, data_dim, dim=DIM):
    # Pure-JAX reference mirroring the PyTorch forward exactly (HIGHEST precision).
    B = xt.shape[0]
    hp = jax.lax.Precision.HIGHEST
    freq = jnp.exp(jnp.arange(dim // 2, dtype=jnp.float32) *
                   (-math.log(10000.0) / (dim // 2 - 1)))

    def sinemb(x):
        arg = x[..., None] * freq
        return jnp.concatenate([jnp.sin(arg), jnp.cos(arg)], axis=-1)

    def gelu(x):
        return 0.5 * x * (1.0 + jax.lax.erf(x * _INV_SQRT2))

    # time_mlp
    et = sinemb(t)
    ht = jnp.einsum("bdi,io->bdo", et, params["wt1"], precision=hp) + params["bt1"][0]
    ht = ht.reshape(B, -1)
    ht = jnp.dot(gelu(ht), params["wt2"], precision=hp) + params["bt2"][0]
    # data_mlp
    ex = sinemb(xt)
    hx = jnp.einsum("bdki,io->bdko", ex, params["wd1"], precision=hp) + params["bd1"][0]
    hx = hx.reshape(B, -1)
    hx = jnp.dot(gelu(hx), params["wd2"], precision=hp) + params["bd2"][0]
    # trunk
    x = jnp.concatenate([hx, ht], axis=1)
    x = gelu(jnp.dot(x, params["w1"], precision=hp) + params["b1"][0])
    x = gelu(jnp.dot(x, params["w2"], precision=hp) + params["b2"][0])
    return jnp.dot(x, params["w3"], precision=hp) + params["b3"][0]


if __name__ == "__main__":
    B, depth, data_dim, hidden_num = 8, 2, 2, 128
    key = jax.random.PRNGKey(0)
    kp, kx, kt = jax.random.split(key, 3)

    params = init_params(kp, data_dim=data_dim, depth=depth, hidden_num=hidden_num)
    xt = jax.random.normal(kx, (B, depth, data_dim), jnp.float32)   # (batch, depth, data_dim)
    t = jax.random.uniform(kt, (B, depth), jnp.float32)             # (batch, depth)

    out = vnetd_forward(xt, t, params, depth=depth, data_dim=data_dim)
    out = jax.block_until_ready(out)

    ref = reference_forward(xt, t, params, depth=depth, data_dim=data_dim)
    np.testing.assert_allclose(np.asarray(out), np.asarray(ref), rtol=1e-2, atol=1e-2)

    print("KERNEL_OK")
</pallas_src>

<mosaic_0001>
module attributes {stable_mosaic.version = 11 : i64} {
  func.func @vnetd_kernel(%arg0: i32, %arg1: memref<16x1xf32, #tpu.memory_space<vmem>>, %arg2: memref<32x1xf32, #tpu.memory_space<vmem>>, %arg3: memref<64x64xf32, #tpu.memory_space<vmem>>, %arg4: memref<1x64xf32, #tpu.memory_space<vmem>>, %arg5: memref<128x128xf32, #tpu.memory_space<vmem>>, %arg6: memref<1x128xf32, #tpu.memory_space<vmem>>, %arg7: memref<64x64xf32, #tpu.memory_space<vmem>>, %arg8: memref<1x64xf32, #tpu.memory_space<vmem>>, %arg9: memref<256x128xf32, #tpu.memory_space<vmem>>, %arg10: memref<1x128xf32, #tpu.memory_space<vmem>>, %arg11: memref<256x512xf32, #tpu.memory_space<vmem>>, %arg12: memref<1x512xf32, #tpu.memory_space<vmem>>, %arg13: memref<512x256xf32, #tpu.memory_space<vmem>>, %arg14: memref<1x256xf32, #tpu.memory_space<vmem>>, %arg15: memref<256x128xf32, #tpu.memory_space<vmem>>, %arg16: memref<1x128xf32, #tpu.memory_space<vmem>>, %arg17: memref<8x128xf32, #tpu.memory_space<vmem>>) attributes {dimension_semantics = [#tpu.dimension_semantics<parallel>], iteration_bounds = array<i64: 1>, scalar_prefetch = 0 : i64, scratch_operands = 0 : i64, tpu.core_type = #tpu.core_type<tc>, window_params = [{transform_indices = @transform_0, window_bounds = array<i64: 16, 1>}, {transform_indices = @transform_1, window_bounds = array<i64: 32, 1>}, {pipeline_mode = #tpu.pipeline_mode<synchronous>, transform_indices = @transform_2, window_bounds = array<i64: 64, 64>}, {pipeline_mode = #tpu.pipeline_mode<synchronous>, transform_indices = @transform_3, window_bounds = array<i64: 1, 64>}, {pipeline_mode = #tpu.pipeline_mode<synchronous>, transform_indices = @transform_4, window_bounds = array<i64: 128, 128>}, {pipeline_mode = #tpu.pipeline_mode<synchronous>, transform_indices = @transform_5, window_bounds = array<i64: 1, 128>}, {pipeline_mode = #tpu.pipeline_mode<synchronous>, transform_indices = @transform_6, window_bounds = array<i64: 64, 64>}, {pipeline_mode = #tpu.pipeline_mode<synchronous>, transform_indices = @transform_7, window_bounds = array<i64: 1, 64>}, {pipeline_mode = #tpu.pipeline_mode<synchronous>, transform_indices = @transform_8, window_bounds = array<i64: 256, 128>}, {pipeline_mode = #tpu.pipeline_mode<synchronous>, transform_indices = @transform_9, window_bounds = array<i64: 1, 128>}, {pipeline_mode = #tpu.pipeline_mode<synchronous>, transform_indices = @transform_10, window_bounds = array<i64: 256, 512>}, {pipeline_mode = #tpu.pipeline_mode<synchronous>, transform_indices = @transform_11, window_bounds = array<i64: 1, 512>}, {pipeline_mode = #tpu.pipeline_mode<synchronous>, transform_indices = @transform_12, window_bounds = array<i64: 512, 256>}, {pipeline_mode = #tpu.pipeline_mode<synchronous>, transform_indices = @transform_13, window_bounds = array<i64: 1, 256>}, {pipeline_mode = #tpu.pipeline_mode<synchronous>, transform_indices = @transform_14, window_bounds = array<i64: 256, 128>}, {pipeline_mode = #tpu.pipeline_mode<synchronous>, transform_indices = @transform_15, window_bounds = array<i64: 1, 128>}, {transform_indices = @transform_16, window_bounds = array<i64: 8, 128>}]} {
    %0 = tpu.iota {dimensions = array<i32: 1>} : vector<1x32xi32>
    %1 = arith.sitofp %0 : vector<1x32xi32> to vector<1x32xf32>
    %cst = arith.constant -0.297107756 : f32
    %2 = vector.broadcast %cst : f32 to vector<1x32xf32>
    %3 = arith.mulf %1, %2 : vector<1x32xf32>
    %4 = math.exp %3 : vector<1x32xf32>
    %c0 = arith.constant 0 : index
    %c0_0 = arith.constant 0 : index
    %5 = vector.load %arg3[%c0, %c0_0] : memref<64x64xf32, #tpu.memory_space<vmem>>, vector<64x64xf32>
    %c0_1 = arith.constant 0 : index
    %c0_2 = arith.constant 0 : index
    %6 = vector.load %arg4[%c0_1, %c0_2] : memref<1x64xf32, #tpu.memory_space<vmem>>, vector<1x64xf32>
    %c0_3 = arith.constant 0 : index
    %c0_4 = arith.constant 0 : index
    %7 = vector.load %arg5[%c0_3, %c0_4] : memref<128x128xf32, #tpu.memory_space<vmem>>, vector<128x128xf32>
    %c0_5 = arith.constant 0 : index
    %c0_6 = arith.constant 0 : index
    %8 = vector.load %arg6[%c0_5, %c0_6] : memref<1x128xf32, #tpu.memory_space<vmem>>, vector<1x128xf32>
    %c0_7 = arith.constant 0 : index
    %c0_8 = arith.constant 0 : index
    %9 = vector.load %arg7[%c0_7, %c0_8] : memref<64x64xf32, #tpu.memory_space<vmem>>, vector<64x64xf32>
    %c0_9 = arith.constant 0 : index
    %c0_10 = arith.constant 0 : index
    %10 = vector.load %arg8[%c0_9, %c0_10] : memref<1x64xf32, #tpu.memory_space<vmem>>, vector<1x64xf32>
    %c0_11 = arith.constant 0 : index
    %c0_12 = arith.constant 0 : index
    %11 = vector.load %arg9[%c0_11, %c0_12] : memref<256x128xf32, #tpu.memory_space<vmem>>, vector<256x128xf32>
    %c0_13 = arith.constant 0 : index
    %c0_14 = arith.constant 0 : index
    %12 = vector.load %arg10[%c0_13, %c0_14] : memref<1x128xf32, #tpu.memory_space<vmem>>, vector<1x128xf32>
    %c0_15 = arith.constant 0 : index
    %c0_16 = arith.constant 0 : index
    %13 = vector.load %arg1[%c0_15, %c0_16] : memref<16x1xf32, #tpu.memory_space<vmem>>, vector<16x1xf32>
    %14 = vector.broadcast %13 : vector<16x1xf32> to vector<16x32xf32>
    %15 = vector.broadcast %4 : vector<1x32xf32> to vector<16x32xf32>
    %16 = arith.mulf %14, %15 : vector<16x32xf32>
    %17 = math.sin %16 : vector<16x32xf32>
    %18 = vector.extract_strided_slice %5 {offsets = [0, 0], sizes = [32, 64], strides = [1, 1]} : vector<64x64xf32> to vector<32x64xf32>
    %cst_17 = arith.constant dense<0.000000e+00> : vector<16x64xf32>
    %19 = tpu.matmul %17, %18, %cst_17 {dimension_numbers = #tpu.dot_dimension_numbers<[1], [0], [0], [1], [0, 0, 1, 1], [], []>} : vector<16x32xf32>, vector<32x64xf32>, vector<16x64xf32> -> vector<16x64xf32>
    %20 = math.cos %16 : vector<16x32xf32>
    %21 = vector.extract_strided_slice %5 {offsets = [32, 0], sizes = [32, 64], strides = [1, 1]} : vector<64x64xf32> to vector<32x64xf32>
    %cst_18 = arith.constant dense<0.000000e+00> : vector<16x64xf32>
    %22 = tpu.matmul %20, %21, %cst_18 {dimension_numbers = #tpu.dot_dimension_numbers<[1], [0], [0], [1], [0, 0, 1, 1], [], []>} : vector<16x32xf32>, vector<32x64xf32>, vector<16x64xf32> -> vector<16x64xf32>
    %23 = arith.addf %19, %22 : vector<16x64xf32>
    %24 = vector.broadcast %6 : vector<1x64xf32> to vector<16x64xf32>
    %25 = arith.addf %23, %24 : vector<16x64xf32>
    %cst_19 = arith.constant 5.000000e-01 : f32
    %26 = vector.broadcast %cst_19 : f32 to vector<16x64xf32>
    %27 = arith.mulf %26, %25 : vector<16x64xf32>
    %cst_20 = arith.constant 0.707106769 : f32
    %28 = vector.broadcast %cst_20 : f32 to vector<16x64xf32>
    %29 = arith.mulf %25, %28 : vector<16x64xf32>
    %30 = math.absf %29 : vector<16x64xf32>
    %cst_21 = arith.constant 0.327591091 : f32
    %31 = vector.broadcast %cst_21 : f32 to vector<16x64xf32>
    %32 = arith.mulf %31, %30 : vector<16x64xf32>
    %cst_22 = arith.constant 1.000000e+00 : f32
    %33 = vector.broadcast %cst_22 : f32 to vector<16x64xf32>
    %34 = arith.addf %33, %32 : vector<16x64xf32>
    %35 = tpu.reciprocal %34 {approx = true} : vector<16x64xf32> -> vector<16x64xf32>
    %cst_23 = arith.constant 1.06140542 : f32
    %36 = vector.broadcast %cst_23 : f32 to vector<16x64xf32>
    %37 = arith.mulf %36, %35 : vector<16x64xf32>
    %cst_24 = arith.constant -1.45315206 : f32
    %38 = vector.broadcast %cst_24 : f32 to vector<16x64xf32>
    %39 = arith.addf %37, %38 : vector<16x64xf32>
    %40 = arith.mulf %39, %35 : vector<16x64xf32>
    %cst_25 = arith.constant 1.42141378 : f32
    %41 = vector.broadcast %cst_25 : f32 to vector<16x64xf32>
    %42 = arith.addf %40, %41 : vector<16x64xf32>
    %43 = arith.mulf %42, %35 : vector<16x64xf32>
    %cst_26 = arith.constant -0.284496725 : f32
    %44 = vector.broadcast %cst_26 : f32 to vector<16x64xf32>
    %45 = arith.addf %43, %44 : vector<16x64xf32>
    %46 = arith.mulf %45, %35 : vector<16x64xf32>
    %cst_27 = arith.constant 0.254829586 : f32
    %47 = vector.broadcast %cst_27 : f32 to vector<16x64xf32>
    %48 = arith.addf %46, %47 : vector<16x64xf32>
    %49 = arith.mulf %48, %35 : vector<16x64xf32>
    %cst_28 = arith.constant 0.000000e+00 : f32
    %50 = vector.broadcast %cst_28 : f32 to vector<16x64xf32>
    %51 = arith.subf %50, %30 : vector<16x64xf32>
    %52 = arith.mulf %51, %30 : vector<16x64xf32>
    %53 = math.exp %52 : vector<16x64xf32>
    %54 = arith.mulf %49, %53 : vector<16x64xf32>
    %cst_29 = arith.constant 1.000000e+00 : f32
    %55 = vector.broadcast %cst_29 : f32 to vector<16x64xf32>
    %56 = arith.subf %55, %54 : vector<16x64xf32>
    %cst_30 = arith.constant 0.000000e+00 : f32
    %57 = vector.broadcast %cst_30 : f32 to vector<16x64xf32>
    %58 = arith.cmpf olt, %29, %57 : vector<16x64xf32>
    %cst_31 = arith.constant 0.000000e+00 : f32
    %59 = vector.broadcast %cst_31 : f32 to vector<16x64xf32>
    %60 = arith.subf %59, %56 : vector<16x64xf32>
    %61 = arith.select %58, %60, %56 : vector<16x64xi1>, vector<16x64xf32>
    %cst_32 = arith.constant 1.000000e+00 : f32
    %62 = vector.broadcast %cst_32 : f32 to vector<16x64xf32>
    %63 = arith.addf %62, %61 : vector<16x64xf32>
    %64 = arith.mulf %27, %63 : vector<16x64xf32>
    %65 = vector.extract_strided_slice %64 {offsets = [0, 0], sizes = [8, 64], strides = [1, 1]} : vector<16x64xf32> to vector<8x64xf32>
    %66 = vector.extract_strided_slice %7 {offsets = [0, 0], sizes = [64, 128], strides = [1, 1]} : vector<128x128xf32> to vector<64x128xf32>
    %cst_33 = arith.constant dense<0.000000e+00> : vector<8x128xf32>
    %67 = tpu.matmul %65, %66, %cst_33 {dimension_numbers = #tpu.dot_dimension_numbers<[1], [0], [0], [1], [0, 0, 1, 1], [], []>} : vector<8x64xf32>, vector<64x128xf32>, vector<8x128xf32> -> vector<8x128xf32>
    %68 = vector.broadcast %8 : vector<1x128xf32> to vector<8x128xf32>
    %69 = arith.addf %68, %67 : vector<8x128xf32>
    %70 = vector.extract_strided_slice %64 {offsets = [8, 0], sizes = [8, 64], strides = [1, 1]} : vector<16x64xf32> to vector<8x64xf32>
    %71 = vector.extract_strided_slice %7 {offsets = [64, 0], sizes = [64, 128], strides = [1, 1]} : vector<128x128xf32> to vector<64x128xf32>
    %cst_34 = arith.constant dense<0.000000e+00> : vector<8x128xf32>
    %72 = tpu.matmul %70, %71, %cst_34 {dimension_numbers = #tpu.dot_dimension_numbers<[1], [0], [0], [1], [0, 0, 1, 1], [], []>} : vector<8x64xf32>, vector<64x128xf32>, vector<8x128xf32> -> vector<8x128xf32>
    %73 = arith.addf %69, %72 : vector<8x128xf32>
    %c0_35 = arith.constant 0 : index
    %c0_36 = arith.constant 0 : index
    %74 = vector.load %arg2[%c0_35, %c0_36] : memref<32x1xf32, #tpu.memory_space<vmem>>, vector<32x1xf32>
    %75 = vector.broadcast %74 : vector<32x1xf32> to vector<32x32xf32>
    %76 = vector.broadcast %4 : vector<1x32xf32> to vector<32x32xf32>
    %77 = arith.mulf %75, %76 : vector<32x32xf32>
    %78 = math.sin %77 : vector<32x32xf32>
    %79 = vector.extract_strided_slice %9 {offsets = [0, 0], sizes = [32, 64], strides = [1, 1]} : vector<64x64xf32> to vector<32x64xf32>
    %cst_37 = arith.constant dense<0.000000e+00> : vector<32x64xf32>
    %80 = tpu.matmul %78, %79, %cst_37 {dimension_numbers = #tpu.dot_dimension_numbers<[1], [0], [0], [1], [0, 0, 1, 1], [], []>} : vector<32x32xf32>, vector<32x64xf32>, vector<32x64xf32> -> vector<32x64xf32>
    %81 = math.cos %77 : vector<32x32xf32>
    %82 = vector.extract_strided_slice %9 {offsets = [32, 0], sizes = [32, 64], strides = [1, 1]} : vector<64x64xf32> to vector<32x64xf32>
    %cst_38 = arith.constant dense<0.000000e+00> : vector<32x64xf32>
    %83 = tpu.matmul %81, %82, %cst_38 {dimension_numbers = #tpu.dot_dimension_numbers<[1], [0], [0], [1], [0, 0, 1, 1], [], []>} : vector<32x32xf32>, vector<32x64xf32>, vector<32x64xf32> -> vector<32x64xf32>
    %84 = arith.addf %80, %83 : vector<32x64xf32>
    %85 = vector.broadcast %10 : vector<1x64xf32> to vector<32x64xf32>
    %86 = arith.addf %84, %85 : vector<32x64xf32>
    %cst_39 = arith.constant 5.000000e-01 : f32
    %87 = vector.broadcast %cst_39 : f32 to vector<32x64xf32>
    %88 = arith.mulf %87, %86 : vector<32x64xf32>
    %cst_40 = arith.constant 0.707106769 : f32
    %89 = vector.broadcast %cst_40 : f32 to vector<32x64xf32>
    %90 = arith.mulf %86, %89 : vector<32x64xf32>
    %91 = math.absf %90 : vector<32x64xf32>
    %cst_41 = arith.constant 0.327591091 : f32
    %92 = vector.broadcast %cst_41 : f32 to vector<32x64xf32>
    %93 = arith.mulf %92, %91 : vector<32x64xf32>
    %cst_42 = arith.constant 1.000000e+00 : f32
    %94 = vector.broadcast %cst_42 : f32 to vector<32x64xf32>
    %95 = arith.addf %94, %93 : vector<32x64xf32>
    %96 = tpu.reciprocal %95 {approx = true} : vector<32x64xf32> -> vector<32x64xf32>
    %cst_43 = arith.constant 1.06140542 : f32
    %97 = vector.broadcast %cst_43 : f32 to vector<32x64xf32>
    %98 = arith.mulf %97, %96 : vector<32x64xf32>
    %cst_44 = arith.constant -1.45315206 : f32
    %99 = vector.broadcast %cst_44 : f32 to vector<32x64xf32>
    %100 = arith.addf %98, %99 : vector<32x64xf32>
    %101 = arith.mulf %100, %96 : vector<32x64xf32>
    %cst_45 = arith.constant 1.42141378 : f32
    %102 = vector.broadcast %cst_45 : f32 to vector<32x64xf32>
    %103 = arith.addf %101, %102 : vector<32x64xf32>
    %104 = arith.mulf %103, %96 : vector<32x64xf32>
    %cst_46 = arith.constant -0.284496725 : f32
    %105 = vector.broadcast %cst_46 : f32 to vector<32x64xf32>
    %106 = arith.addf %104, %105 : vector<32x64xf32>
    %107 = arith.mulf %106, %96 : vector<32x64xf32>
    %cst_47 = arith.constant 0.254829586 : f32
    %108 = vector.broadcast %cst_47 : f32 to vector<32x64xf32>
    %109 = arith.addf %107, %108 : vector<32x64xf32>
    %110 = arith.mulf %109, %96 : vector<32x64xf32>
    %cst_48 = arith.constant 0.000000e+00 : f32
    %111 = vector.broadcast %cst_48 : f32 to vector<32x64xf32>
    %112 = arith.subf %111, %91 : vector<32x64xf32>
    %113 = arith.mulf %112, %91 : vector<32x64xf32>
    %114 = math.exp %113 : vector<32x64xf32>
    %115 = arith.mulf %110, %114 : vector<32x64xf32>
    %cst_49 = arith.constant 1.000000e+00 : f32
    %116 = vector.broadcast %cst_49 : f32 to vector<32x64xf32>
    %117 = arith.subf %116, %115 : vector<32x64xf32>
    %cst_50 = arith.constant 0.000000e+00 : f32
    %118 = vector.broadcast %cst_50 : f32 to vector<32x64xf32>
    %119 = arith.cmpf olt, %90, %118 : vector<32x64xf32>
    %cst_51 = arith.constant 0.000000e+00 : f32
    %120 = vector.broadcast %cst_51 : f32 to vector<32x64xf32>
    %121 = arith.subf %120, %117 : vector<32x64xf32>
    %122 = arith.select %119, %121, %117 : vector<32x64xi1>, vector<32x64xf32>
    %cst_52 = arith.constant 1.000000e+00 : f32
    %123 = vector.broadcast %cst_52 : f32 to vector<32x64xf32>
    %124 = arith.addf %123, %122 : vector<32x64xf32>
    %125 = arith.mulf %88, %124 : vector<32x64xf32>
    %126 = vector.extract_strided_slice %125 {offsets = [0, 0], sizes = [8, 64], strides = [1, 1]} : vector<32x64xf32> to vector<8x64xf32>
    %127 = vector.extract_strided_slice %11 {offsets = [0, 0], sizes = [64, 128], strides = [1, 1]} : vector<256x128xf32> to vector<64x128xf32>
    %cst_53 = arith.constant dense<0.000000e+00> : vector<8x128xf32>
    %128 = tpu.matmul %126, %127, %cst_53 {dimension_numbers = #tpu.dot_dimension_numbers<[1], [0], [0], [1], [0, 0, 1, 1], [], []>} : vector<8x64xf32>, vector<64x128xf32>, vector<8x128xf32> -> vector<8x128xf32>
    %129 = vector.broadcast %12 : vector<1x128xf32> to vector<8x128xf32>
    %130 = arith.addf %129, %128 : vector<8x128xf32>
    %131 = vector.extract_strided_slice %125 {offsets = [8, 0], sizes = [8, 64], strides = [1, 1]} : vector<32x64xf32> to vector<8x64xf32>
    %132 = vector.extract_strided_slice %11 {offsets = [64, 0], sizes = [64, 128], strides = [1, 1]} : vector<256x128xf32> to vector<64x128xf32>
    %cst_54 = arith.constant dense<0.000000e+00> : vector<8x128xf32>
    %133 = tpu.matmul %131, %132, %cst_54 {dimension_numbers = #tpu.dot_dimension_numbers<[1], [0], [0], [1], [0, 0, 1, 1], [], []>} : vector<8x64xf32>, vector<64x128xf32>, vector<8x128xf32> -> vector<8x128xf32>
    %134 = arith.addf %130, %133 : vector<8x128xf32>
    %135 = vector.extract_strided_slice %125 {offsets = [16, 0], sizes = [8, 64], strides = [1, 1]} : vector<32x64xf32> to vector<8x64xf32>
    %136 = vector.extract_strided_slice %11 {offsets = [128, 0], sizes = [64, 128], strides = [1, 1]} : vector<256x128xf32> to vector<64x128xf32>
    %cst_55 = arith.constant dense<0.000000e+00> : vector<8x128xf32>
    %137 = tpu.matmul %135, %136, %cst_55 {dimension_numbers = #tpu.dot_dimension_numbers<[1], [0], [0], [1], [0, 0, 1, 1], [], []>} : vector<8x64xf32>, vector<64x128xf32>, vector<8x128xf32> -> vector<8x128xf32>
    %138 = arith.addf %134, %137 : vector<8x128xf32>
    %139 = vector.extract_strided_slice %125 {offsets = [24, 0], sizes = [8, 64], strides = [1, 1]} : vector<32x64xf32> to vector<8x64xf32>
    %140 = vector.extract_strided_slice %11 {offsets = [192, 0], sizes = [64, 128], strides = [1, 1]} : vector<256x128xf32> to vector<64x128xf32>
    %cst_56 = arith.constant dense<0.000000e+00> : vector<8x128xf32>
    %141 = tpu.matmul %139, %140, %cst_56 {dimension_numbers = #tpu.dot_dimension_numbers<[1], [0], [0], [1], [0, 0, 1, 1], [], []>} : vector<8x64xf32>, vector<64x128xf32>, vector<8x128xf32> -> vector<8x128xf32>
    %142 = arith.addf %138, %141 : vector<8x128xf32>
    %c0_57 = arith.constant 0 : index
    %c0_58 = arith.constant 0 : index
    %143 = vector.load %arg11[%c0_57, %c0_58] : memref<256x512xf32, #tpu.memory_space<vmem>>, vector<256x512xf32>
    %144 = vector.extract_strided_slice %143 {offsets = [0, 0], sizes = [128, 512], strides = [1, 1]} : vector<256x512xf32> to vector<128x512xf32>
    %cst_59 = arith.constant dense<0.000000e+00> : vector<8x512xf32>
    %145 = tpu.matmul %142, %144, %cst_59 {dimension_numbers = #tpu.dot_dimension_numbers<[1], [0], [0], [1], [0, 0, 1, 1], [], []>} : vector<8x128xf32>, vector<128x512xf32>, vector<8x512xf32> -> vector<8x512xf32>
    %146 = vector.extract_strided_slice %143 {offsets = [128, 0], sizes = [128, 512], strides = [1, 1]} : vector<256x512xf32> to vector<128x512xf32>
    %cst_60 = arith.constant dense<0.000000e+00> : vector<8x512xf32>
    %147 = tpu.matmul %73, %146, %cst_60 {dimension_numbers = #tpu.dot_dimension_numbers<[1], [0], [0], [1], [0, 0, 1, 1], [], []>} : vector<8x128xf32>, vector<128x512xf32>, vector<8x512xf32> -> vector<8x512xf32>
    %148 = arith.addf %145, %147 : vector<8x512xf32>
    %c0_61 = arith.constant 0 : index
    %c0_62 = arith.constant 0 : index
    %149 = vector.load %arg12[%c0_61, %c0_62] : memref<1x512xf32, #tpu.memory_space<vmem>>, vector<1x512xf32>
    %150 = vector.broadcast %149 : vector<1x512xf32> to vector<8x512xf32>
    %151 = arith.addf %148, %150 : vector<8x512xf32>
    %cst_63 = arith.constant 5.000000e-01 : f32
    %152 = vector.broadcast %cst_63 : f32 to vector<8x512xf32>
    %153 = arith.mulf %152, %151 : vector<8x512xf32>
    %cst_64 = arith.constant 0.707106769 : f32
    %154 = vector.broadcast %cst_64 : f32 to vector<8x512xf32>
    %155 = arith.mulf %151, %154 : vector<8x512xf32>
    %156 = math.absf %155 : vector<8x512xf32>
    %cst_65 = arith.constant 0.327591091 : f32
    %157 = vector.broadcast %cst_65 : f32 to vector<8x512xf32>
    %158 = arith.mulf %157, %156 : vector<8x512xf32>
    %cst_66 = arith.constant 1.000000e+00 : f32
    %159 = vector.broadcast %cst_66 : f32 to vector<8x512xf32>
    %160 = arith.addf %159, %158 : vector<8x512xf32>
    %161 = tpu.reciprocal %160 {approx = true} : vector<8x512xf32> -> vector<8x512xf32>
    %cst_67 = arith.constant 1.06140542 : f32
    %162 = vector.broadcast %cst_67 : f32 to vector<8x512xf32>
    %163 = arith.mulf %162, %161 : vector<8x512xf32>
    %cst_68 = arith.constant -1.45315206 : f32
    %164 = vector.broadcast %cst_68 : f32 to vector<8x512xf32>
    %165 = arith.addf %163, %164 : vector<8x512xf32>
    %166 = arith.mulf %165, %161 : vector<8x512xf32>
    %cst_69 = arith.constant 1.42141378 : f32
    %167 = vector.broadcast %cst_69 : f32 to vector<8x512xf32>
    %168 = arith.addf %166, %167 : vector<8x512xf32>
    %169 = arith.mulf %168, %161 : vector<8x512xf32>
    %cst_70 = arith.constant -0.284496725 : f32
    %170 = vector.broadcast %cst_70 : f32 to vector<8x512xf32>
    %171 = arith.addf %169, %170 : vector<8x512xf32>
    %172 = arith.mulf %171, %161 : vector<8x512xf32>
    %cst_71 = arith.constant 0.254829586 : f32
    %173 = vector.broadcast %cst_71 : f32 to vector<8x512xf32>
    %174 = arith.addf %172, %173 : vector<8x512xf32>
    %175 = arith.mulf %174, %161 : vector<8x512xf32>
    %cst_72 = arith.constant 0.000000e+00 : f32
    %176 = vector.broadcast %cst_72 : f32 to vector<8x512xf32>
    %177 = arith.subf %176, %156 : vector<8x512xf32>
    %178 = arith.mulf %177, %156 : vector<8x512xf32>
    %179 = math.exp %178 : vector<8x512xf32>
    %180 = arith.mulf %175, %179 : vector<8x512xf32>
    %cst_73 = arith.constant 1.000000e+00 : f32
    %181 = vector.broadcast %cst_73 : f32 to vector<8x512xf32>
    %182 = arith.subf %181, %180 : vector<8x512xf32>
    %cst_74 = arith.constant 0.000000e+00 : f32
    %183 = vector.broadcast %cst_74 : f32 to vector<8x512xf32>
    %184 = arith.cmpf olt, %155, %183 : vector<8x512xf32>
    %cst_75 = arith.constant 0.000000e+00 : f32
    %185 = vector.broadcast %cst_75 : f32 to vector<8x512xf32>
    %186 = arith.subf %185, %182 : vector<8x512xf32>
    %187 = arith.select %184, %186, %182 : vector<8x512xi1>, vector<8x512xf32>
    %cst_76 = arith.constant 1.000000e+00 : f32
    %188 = vector.broadcast %cst_76 : f32 to vector<8x512xf32>
    %189 = arith.addf %188, %187 : vector<8x512xf32>
    %190 = arith.mulf %153, %189 : vector<8x512xf32>
    %c0_77 = arith.constant 0 : index
    %c0_78 = arith.constant 0 : index
    %191 = vector.load %arg13[%c0_77, %c0_78] : memref<512x256xf32, #tpu.memory_space<vmem>>, vector<512x256xf32>
    %cst_79 = arith.constant dense<0.000000e+00> : vector<8x256xf32>
    %192 = tpu.matmul %190, %191, %cst_79 {dimension_numbers = #tpu.dot_dimension_numbers<[1], [0], [0], [1], [0, 0, 1, 1], [], []>} : vector<8x512xf32>, vector<512x256xf32>, vector<8x256xf32> -> vector<8x256xf32>
    %c0_80 = arith.constant 0 : index
    %c0_81 = arith.constant 0 : index
    %193 = vector.load %arg14[%c0_80, %c0_81] : memref<1x256xf32, #tpu.memory_space<vmem>>, vector<1x256xf32>
    %194 = vector.broadcast %193 : vector<1x256xf32> to vector<8x256xf32>
    %195 = arith.addf %192, %194 : vector<8x256xf32>
    %cst_82 = arith.constant 5.000000e-01 : f32
    %196 = vector.broadcast %cst_82 : f32 to vector<8x256xf32>
    %197 = arith.mulf %196, %195 : vector<8x256xf32>
    %cst_83 = arith.constant 0.707106769 : f32
    %198 = vector.broadcast %cst_83 : f32 to vector<8x256xf32>
    %199 = arith.mulf %195, %198 : vector<8x256xf32>
    %200 = math.absf %199 : vector<8x256xf32>
    %cst_84 = arith.constant 0.327591091 : f32
    %201 = vector.broadcast %cst_84 : f32 to vector<8x256xf32>
    %202 = arith.mulf %201, %200 : vector<8x256xf32>
    %cst_85 = arith.constant 1.000000e+00 : f32
    %203 = vector.broadcast %cst_85 : f32 to vector<8x256xf32>
    %204 = arith.addf %203, %202 : vector<8x256xf32>
    %205 = tpu.reciprocal %204 {approx = true} : vector<8x256xf32> -> vector<8x256xf32>
    %cst_86 = arith.constant 1.06140542 : f32
    %206 = vector.broadcast %cst_86 : f32 to vector<8x256xf32>
    %207 = arith.mulf %206, %205 : vector<8x256xf32>
    %cst_87 = arith.constant -1.45315206 : f32
    %208 = vector.broadcast %cst_87 : f32 to vector<8x256xf32>
    %209 = arith.addf %207, %208 : vector<8x256xf32>
    %210 = arith.mulf %209, %205 : vector<8x256xf32>
    %cst_88 = arith.constant 1.42141378 : f32
    %211 = vector.broadcast %cst_88 : f32 to vector<8x256xf32>
    %212 = arith.addf %210, %211 : vector<8x256xf32>
    %213 = arith.mulf %212, %205 : vector<8x256xf32>
    %cst_89 = arith.constant -0.284496725 : f32
    %214 = vector.broadcast %cst_89 : f32 to vector<8x256xf32>
    %215 = arith.addf %213, %214 : vector<8x256xf32>
    %216 = arith.mulf %215, %205 : vector<8x256xf32>
    %cst_90 = arith.constant 0.254829586 : f32
    %217 = vector.broadcast %cst_90 : f32 to vector<8x256xf32>
    %218 = arith.addf %216, %217 : vector<8x256xf32>
    %219 = arith.mulf %218, %205 : vector<8x256xf32>
    %cst_91 = arith.constant 0.000000e+00 : f32
    %220 = vector.broadcast %cst_91 : f32 to vector<8x256xf32>
    %221 = arith.subf %220, %200 : vector<8x256xf32>
    %222 = arith.mulf %221, %200 : vector<8x256xf32>
    %223 = math.exp %222 : vector<8x256xf32>
    %224 = arith.mulf %219, %223 : vector<8x256xf32>
    %cst_92 = arith.constant 1.000000e+00 : f32
    %225 = vector.broadcast %cst_92 : f32 to vector<8x256xf32>
    %226 = arith.subf %225, %224 : vector<8x256xf32>
    %cst_93 = arith.constant 0.000000e+00 : f32
    %227 = vector.broadcast %cst_93 : f32 to vector<8x256xf32>
    %228 = arith.cmpf olt, %199, %227 : vector<8x256xf32>
    %cst_94 = arith.constant 0.000000e+00 : f32
    %229 = vector.broadcast %cst_94 : f32 to vector<8x256xf32>
    %230 = arith.subf %229, %226 : vector<8x256xf32>
    %231 = arith.select %228, %230, %226 : vector<8x256xi1>, vector<8x256xf32>
    %cst_95 = arith.constant 1.000000e+00 : f32
    %232 = vector.broadcast %cst_95 : f32 to vector<8x256xf32>
    %233 = arith.addf %232, %231 : vector<8x256xf32>
    %234 = arith.mulf %197, %233 : vector<8x256xf32>
    %c0_96 = arith.constant 0 : index
    %c0_97 = arith.constant 0 : index
    %235 = vector.load %arg15[%c0_96, %c0_97] : memref<256x128xf32, #tpu.memory_space<vmem>>, vector<256x128xf32>
    %cst_98 = arith.constant dense<0.000000e+00> : vector<8x128xf32>
    %236 = tpu.matmul %234, %235, %cst_98 {dimension_numbers = #tpu.dot_dimension_numbers<[1], [0], [0], [1], [0, 0, 1, 1], [], []>} : vector<8x256xf32>, vector<256x128xf32>, vector<8x128xf32> -> vector<8x128xf32>
    %c0_99 = arith.constant 0 : index
    %c0_100 = arith.constant 0 : index
    %237 = vector.load %arg16[%c0_99, %c0_100] : memref<1x128xf32, #tpu.memory_space<vmem>>, vector<1x128xf32>
    %238 = vector.broadcast %237 : vector<1x128xf32> to vector<8x128xf32>
    %239 = arith.addf %236, %238 : vector<8x128xf32>
    %c0_101 = arith.constant 0 : index
    %c0_102 = arith.constant 0 : index
    %240 = vector.load %arg17[%c0_101, %c0_102] : memref<8x128xf32, #tpu.memory_space<vmem>>, vector<8x128xf32>
    tpu.vector_store %arg17[%c0_101, %c0_102], %239 {strides = array<i32>} : memref<8x128xf32, #tpu.memory_space<vmem>>, vector<8x128xf32>,
    return
  }
  func.func @transform_0(%arg0: i32) -> (i32, i32) {
    %c0_i32 = arith.constant 0 : i32
    %c0_i32_0 = arith.constant 0 : i32
    return %arg0, %c0_i32 : i32, i32
  }
  func.func @transform_1(%arg0: i32) -> (i32, i32) {
    %c0_i32 = arith.constant 0 : i32
    %c0_i32_0 = arith.constant 0 : i32
    return %arg0, %c0_i32 : i32, i32
  }
  func.func @transform_2(%arg0: i32) -> (i32, i32) {
    %c0_i32 = arith.constant 0 : i32
    %c0_i32_0 = arith.constant 0 : i32
    %c0_i32_1 = arith.constant 0 : i32
    return %c0_i32, %c0_i32_0 : i32, i32
  }
  func.func @transform_3(%arg0: i32) -> (i32, i32) {
    %c0_i32 = arith.constant 0 : i32
    %c0_i32_0 = arith.constant 0 : i32
    %c0_i32_1 = arith.constant 0 : i32
    return %c0_i32, %c0_i32_0 : i32, i32
  }
  func.func @transform_4(%arg0: i32) -> (i32, i32) {
    %c0_i32 = arith.constant 0 : i32
    %c0_i32_0 = arith.constant 0 : i32
    %c0_i32_1 = arith.constant 0 : i32
    return %c0_i32, %c0_i32_0 : i32, i32
  }
  func.func @transform_5(%arg0: i32) -> (i32, i32) {
    %c0_i32 = arith.constant 0 : i32
    %c0_i32_0 = arith.constant 0 : i32
    %c0_i32_1 = arith.constant 0 : i32
    return %c0_i32, %c0_i32_0 : i32, i32
  }
  func.func @transform_6(%arg0: i32) -> (i32, i32) {
    %c0_i32 = arith.constant 0 : i32
    %c0_i32_0 = arith.constant 0 : i32
    %c0_i32_1 = arith.constant 0 : i32
    return %c0_i32, %c0_i32_0 : i32, i32
  }
  func.func @transform_7(%arg0: i32) -> (i32, i32) {
    %c0_i32 = arith.constant 0 : i32
    %c0_i32_0 = arith.constant 0 : i32
    %c0_i32_1 = arith.constant 0 : i32
    return %c0_i32, %c0_i32_0 : i32, i32
  }
  func.func @transform_8(%arg0: i32) -> (i32, i32) {
    %c0_i32 = arith.constant 0 : i32
    %c0_i32_0 = arith.constant 0 : i32
    %c0_i32_1 = arith.constant 0 : i32
    return %c0_i32, %c0_i32_0 : i32, i32
  }
  func.func @transform_9(%arg0: i32) -> (i32, i32) {
    %c0_i32 = arith.constant 0 : i32
    %c0_i32_0 = arith.constant 0 : i32
    %c0_i32_1 = arith.constant 0 : i32
    return %c0_i32, %c0_i32_0 : i32, i32
  }
  func.func @transform_10(%arg0: i32) -> (i32, i32) {
    %c0_i32 = arith.constant 0 : i32
    %c0_i32_0 = arith.constant 0 : i32
    %c0_i32_1 = arith.constant 0 : i32
    return %c0_i32, %c0_i32_0 : i32, i32
  }
  func.func @transform_11(%arg0: i32) -> (i32, i32) {
    %c0_i32 = arith.constant 0 : i32
    %c0_i32_0 = arith.constant 0 : i32
    %c0_i32_1 = arith.constant 0 : i32
    return %c0_i32, %c0_i32_0 : i32, i32
  }
  func.func @transform_12(%arg0: i32) -> (i32, i32) {
    %c0_i32 = arith.constant 0 : i32
    %c0_i32_0 = arith.constant 0 : i32
    %c0_i32_1 = arith.constant 0 : i32
    return %c0_i32, %c0_i32_0 : i32, i32
  }
  func.func @transform_13(%arg0: i32) -> (i32, i32) {
    %c0_i32 = arith.constant 0 : i32
    %c0_i32_0 = arith.constant 0 : i32
    %c0_i32_1 = arith.constant 0 : i32
    return %c0_i32, %c0_i32_0 : i32, i32
  }
  func.func @transform_14(%arg0: i32) -> (i32, i32) {
    %c0_i32 = arith.constant 0 : i32
    %c0_i32_0 = arith.constant 0 : i32
    %c0_i32_1 = arith.constant 0 : i32
    return %c0_i32, %c0_i32_0 : i32, i32
  }
  func.func @transform_15(%arg0: i32) -> (i32, i32) {
    %c0_i32 = arith.constant 0 : i32
    %c0_i32_0 = arith.constant 0 : i32
    %c0_i32_1 = arith.constant 0 : i32
    return %c0_i32, %c0_i32_0 : i32, i32
  }
  func.func @transform_16(%arg0: i32) -> (i32, i32) {
    %c0_i32 = arith.constant 0 : i32
    %c0_i32_0 = arith.constant 0 : i32
    return %arg0, %c0_i32 : i32, i32
  }
}

</mosaic_0001>

<bundles_post_ra>
// kernel: tpu_custom_call.1
= control target key start
LH: loop header
LB: loop body
LE: loop exit
PB: predicated region body
PF: predicated region fallthrough
CT: control target
= control target key end

     0   :  { %s5661_s0 = inlined_call_operand.vmem [shape: f32[16,1], index: 0, kind: input, shape index: {}]   ;;  %s5662_s1 = inlined_call_operand.vmem [shape: f32[32,1], index: 1, kind: input, shape index: {}]   ;;  %s5663_s2 = inlined_call_operand.hbm [shape: f32[64,64], index: 2, kind: input, shape index: {}]   ;;  %s5664_s3 = inlined_call_operand.vmem [shape: f32[1,64], index: 3, kind: input, shape index: {}]   ;;  %s5665_s4 = inlined_call_operand.hbm [shape: f32[128,128], index: 4, kind: input, shape index: {}]   ;;  %s5666_s5 = inlined_call_operand.vmem [shape: f32[1,128], index: 5, kind: input, shape index: {}]   ;;  %s5667_s6 = inlined_call_operand.vmem [shape: f32[64,64], index: 6, kind: input, shape index: {}]   ;;  %s5668_s7 = inlined_call_operand.vmem [shape: f32[1,64], index: 7, kind: input, shape index: {}]   ;;  %s5669_s8 = inlined_call_operand.hbm [shape: f32[256,128], index: 8, kind: input, shape index: {}]   ;;  %s5670_s9 = inlined_call_operand.vmem [shape: f32[1,128], index: 9, kind: input, shape index: {}]   ;;  %s5671_s10 = inlined_call_operand.hbm [shape: f32[256,512], index: 10, kind: input, shape index: {}]   ;;  %s5672_s11 = inlined_call_operand.vmem [shape: f32[1,512], index: 11, kind: input, shape index: {}]   ;;  %s5673_s12 = inlined_call_operand.hbm [shape: f32[512,256], index: 12, kind: input, shape index: {}]   ;;  %s5674_s13 = inlined_call_operand.vmem [shape: f32[1,256], index: 13, kind: input, shape index: {}]   ;;  %s5675_s14 = inlined_call_operand.hbm [shape: f32[256,128], index: 14, kind: input, shape index: {}]   ;;  %s5676_s15 = inlined_call_operand.vmem [shape: f32[1,128], index: 15, kind: input, shape index: {}]   ;;  %s5677_s16 = inlined_call_operand.hbm [shape: f32[8,128], index: 16, kind: output, shape index: {}]  }
   0x1   :  { %5687 = sst [smem:[#allocation19_spill]] %s5661_s0 }
   0x2   :  { %21 = vsyncpa [#allocation3], 0 }
   0x3   :  { %22 = vsyncpa [#allocation6], 0 }
   0x4   :  { %23 = vsyncpa [#allocation9], 0 }
   0x5   :  { %24 = vsyncpa [#allocation12], 0 }
   0x6   :  { %25 = vsyncpa [#allocation4], 0  ;;  %s4540_s21 = smov [#allocation5]   ;;  %s4541_s23 = smov [#allocation8]  }
   0x7   :  { %s49_s22 = sshll.u32 %s4540_s21, 4  ;;  %s81_s24 = sshll.u32 %s4541_s23, 4  ;;  %s50_s22 = int_to_ptr.vmem [resolvable:$true] %s49_s22  ;;  %s4648_s24 = int_to_ptr.vmem [resolvable:$true] %s81_s24 }
   0x8   :  { %s4376_s27 = scalar_lea.hbm %s5665_s4, 2048 }
   0x9   :  { %p4377_p0 = scmp.ne.s32.totalorder %s5665_s4, %s4376_s27  ;;  %p4380_p1 = scmp.lt.u32.totalorder %s4376_s27, %s5665_s4 }
   0xb   :  { %p4382_p2 = pnand %p4380_p1, %p4377_p0 }
   0xd   :  { %4385 = shalt.err (!%p4382_p2)
}
   0xe   :  { %s4386_s17 = scalar_lea.vmem %s50_s22, 2048  ;;  %p4391_p4 = scmp.lt.s32.totalorder %s50_s22, %s50_s22 }
   0xf   :  { %p4387_p3 = scmp.ne.s32.totalorder %s50_s22, %s4386_s17  ;;  %p4392_p5 = scmp.lt.s32.totalorder %s4386_s17, %s4386_s17 }
  0x11   :  { %p4393_p6 = por %p4392_p5, %p4391_p4 }
  0x13   :  { %p4394_p7 = pnand %p4393_p6, %p4387_p3 }
  0x15   :  { %4397 = shalt.err (!%p4394_p7)
}
  0x16   :  { %s5679_s18 = smov 128   ;;  %s5681_s19 = smov 8  }
  0x17   :  { %55 = dma.hbm_to_vmem [thread:$0]  %s5665_s4, 2048, %s50_s22, [#allocation6], %s5679_s18, %s5679_s18, %s5681_s19  }
  0x18   :  { %s4398_s26 = scalar_lea.hbm %s5671_s10, 16384 }
  0x19   :  { %p4399_p8 = scmp.ne.s32.totalorder %s5671_s10, %s4398_s26  ;;  %p4402_p9 = scmp.lt.u32.totalorder %s4398_s26, %s5671_s10 }
  0x1b   :  { %p4404_p10 = pnand %p4402_p9, %p4399_p8 }
  0x1d   :  { %4407 = shalt.err (!%p4404_p10)
}
  0x1e   :  { %s4408_s0 = scalar_lea.vmem %s4648_s24, 16384  ;;  %p4413_p12 = scmp.lt.s32.totalorder %s4648_s24, %s4648_s24 }
  0x1f   :  { %p4409_p11 = scmp.ne.s32.totalorder %s4648_s24, %s4408_s0  ;;  %p4414_p13 = scmp.lt.s32.totalorder %s4408_s0, %s4408_s0 }
  0x21   :  { %p4415_p0 = por %p4414_p13, %p4413_p12 }
  0x23   :  { %p4416_p1 = pnand %p4415_p0, %p4409_p11 }
  0x25   :  { %4419 = shalt.err (!%p4416_p1)
}
  0x26   :  { %s4544_s4 = smov 512   ;;  %s4545_s22 = smov 32  }
  0x27   :  { %87 = dma.hbm_to_vmem [thread:$0]  %s5671_s10, 16384, %s4648_s24, [#allocation9], %s4544_s4, %s4544_s4, %s4545_s22  }
  0x28   :  { %s4546_s21 = smov [#allocation2]   ;;  %s4547_s25 = smov [#allocation7]  }
  0x29   :  { %s35_s23 = sshll.u32 %s4546_s21, 4  ;;  %s67_s26 = sshll.u32 %s4547_s25, 4  ;;  %s36_s23 = int_to_ptr.vmem [resolvable:$true] %s35_s23  ;;  %s4682_s26 = int_to_ptr.vmem [resolvable:$true] %s67_s26 }
  0x2a   :  { %s4420_s29 = scalar_lea.hbm %s5663_s2, 1024 }
  0x2b   :  { %p4421_p2 = scmp.ne.s32.totalorder %s5663_s2, %s4420_s29  ;;  %p4424_p3 = scmp.lt.u32.totalorder %s4420_s29, %s5663_s2 }
  0x2d   :  { %p4426_p4 = pnand %p4424_p3, %p4421_p2 }
  0x2f   :  { %4429 = shalt.err (!%p4426_p4)
}
  0x30   :  { %s4430_s10 = scalar_lea.vmem %s36_s23, 1024  ;;  %p4435_p6 = scmp.lt.s32.totalorder %s36_s23, %s36_s23 }
  0x31   :  { %p4431_p5 = scmp.ne.s32.totalorder %s36_s23, %s4430_s10  ;;  %p4436_p7 = scmp.lt.s32.totalorder %s4430_s10, %s4430_s10 }
  0x33   :  { %p4437_p8 = por %p4436_p7, %p4435_p6 }
  0x35   :  { %p4438_p9 = pnand %p4437_p8, %p4431_p5 }
  0x37   :  { %4441 = shalt.err (!%p4438_p9)
}
  0x38   :  { %s5688_s24 = smov 8   ;;  %s5689_s4 = smov 128  }
  0x39   :  { %41 = dma.hbm_to_vmem [thread:$0]  %s5663_s2, 1024, %s36_s23, [#allocation3], %s5689_s4, %s5689_s4, %s5688_s24  }
  0x3a   :  { %s4442_s18 = scalar_lea.hbm %s5669_s8, 4096 }
  0x3b   :  { %p4443_p10 = scmp.ne.s32.totalorder %s5669_s8, %s4442_s18  ;;  %p4446_p11 = scmp.lt.u32.totalorder %s4442_s18, %s5669_s8 }
  0x3d   :  { %p4448_p12 = pnand %p4446_p11, %p4443_p10 }
  0x3f   :  { %4451 = shalt.err (!%p4448_p12)
}
  0x40   :  { %s4452_s29 = scalar_lea.vmem %s4682_s26, 4096  ;;  %p4457_p0 = scmp.lt.s32.totalorder %s4682_s26, %s4682_s26 }
  0x41   :  { %p4453_p13 = scmp.ne.s32.totalorder %s4682_s26, %s4452_s29  ;;  %p4458_p1 = scmp.lt.s32.totalorder %s4452_s29, %s4452_s29 }
  0x43   :  { %p4459_p2 = por %p4458_p1, %p4457_p0 }
  0x45   :  { %p4460_p3 = pnand %p4459_p2, %p4453_p13 }
  0x47   :  { %4463 = shalt.err (!%p4460_p3)
}
  0x48   :  { %73 = dma.hbm_to_vmem [thread:$0]  %s5669_s8, 4096, %s4682_s26, [#allocation6], %s5689_s4, %s5689_s4, %s5688_s24  }
  0x49   :  { %s4548_s30 = smov [#allocation10]   ;;  %s4464_s17 = scalar_lea.hbm %s5673_s12, 16384 }
  0x4a   :  { %s95_s0 = sshll.u32 %s4548_s30, 4  ;;  %p4465_p4 = scmp.ne.s32.totalorder %s5673_s12, %s4464_s17  ;;  %s96_s0 = int_to_ptr.vmem [resolvable:$true] %s95_s0 }
  0x4b   :  { %p4468_p5 = scmp.lt.u32.totalorder %s4464_s17, %s5673_s12 }
  0x4d   :  { %p4470_p6 = pnand %p4468_p5, %p4465_p4 }
  0x4f   :  { %4473 = shalt.err (!%p4470_p6)
}
  0x50   :  { %s4474_s25 = scalar_lea.vmem %s96_s0, 16384  ;;  %p4479_p8 = scmp.lt.s32.totalorder %s96_s0, %s96_s0 }
  0x51   :  { %p4475_p7 = scmp.ne.s32.totalorder %s96_s0, %s4474_s25  ;;  %p4480_p9 = scmp.lt.s32.totalorder %s4474_s25, %s4474_s25 }
  0x53   :  { %p4481_p10 = por %p4480_p9, %p4479_p8 }
  0x55   :  { %p4482_p11 = pnand %p4481_p10, %p4475_p7 }
  0x57   :  { %4485 = shalt.err (!%p4482_p11)
}
  0x58   :  { %s4549_s8 = smov 256   ;;  %s4550_s26 = smov 16  }
  0x59   :  { %101 = dma.hbm_to_vmem [thread:$0]  %s5673_s12, 16384, %s96_s0, [#allocation9], %s4549_s8, %s4549_s8, %s4550_s26  }
  0x5a   :  { %s4551_s29 = smov [#allocation11]   ;;  %s4486_s10 = scalar_lea.hbm %s5675_s14, 4096 }
  0x5b   :  { %s109_s2 = sshll.u32 %s4551_s29, 4  ;;  %p4487_p12 = scmp.ne.s32.totalorder %s5675_s14, %s4486_s10  ;;  %s110_s2 = int_to_ptr.vmem [resolvable:$true] %s109_s2 }
  0x5c   :  { %p4490_p13 = scmp.lt.u32.totalorder %s4486_s10, %s5675_s14 }
  0x5e   :  { %p4492_p0 = pnand %p4490_p13, %p4487_p12 }
  0x60   :  { %4495 = shalt.err (!%p4492_p0)
}
  0x61   :  { %s4496_s18 = scalar_lea.vmem %s110_s2, 4096  ;;  %p4501_p2 = scmp.lt.s32.totalorder %s110_s2, %s110_s2 }
  0x62   :  { %p4497_p1 = scmp.ne.s32.totalorder %s110_s2, %s4496_s18  ;;  %p4502_p3 = scmp.lt.s32.totalorder %s4496_s18, %s4496_s18 }
  0x64   :  { %p4503_p4 = por %p4502_p3, %p4501_p2 }
  0x66   :  { %p4504_p5 = pnand %p4503_p4, %p4497_p1 }
  0x68   :  { %4507 = shalt.err (!%p4504_p5)
}
  0x69   :  { %115 = dma.hbm_to_vmem [thread:$0]  %s5675_s14, 4096, %s110_s2, [#allocation12], %s5689_s4, %s5689_s4, %s5688_s24  }
  0x6a   :  { %4530 = dma.done.wait [#allocation3], 1024  }
  0x6b   :  { %4531 = vsyncadd [#allocation3], 4294966272 }
  0x6c   :  { %4532 = dma.done.wait [#allocation6], 6144  }
  0x6d   :  { %4533 = vsyncadd [#allocation6], 4294961152 }
  0x6e   :  { %4534 = dma.done.wait [#allocation9], 32768  }
  0x6f   :  { %4535 = vsyncadd [#allocation9], 4294934528 }
  0x70   :  { %4536 = dma.done.wait [#allocation12], 4096  }
  0x71   :  { %4537 = vsyncadd [#allocation12], 4294963200  ;;  %v4552_v0 = vmov 0   ;;  %v1016_v1 = vld [vmem:[%s5662_s1] sm:$0xff]  ;;  %s5690_s27 = sld [smem:[#allocation19_spill]]  ;;  %v1017_v3 = vld [vmem:[%s5662_s1 + $0x8] sm:$0xff]  ;;  %v5683_v7 = vlaneseq }
  0x72   :  { %4301 = vset.pattern.permute.xlu1 %v4552_v0  ;;  %4300 = vset.pattern.permute.xlu0 %v4552_v0  ;;  %v1019_v5 = vld [vmem:[%s5662_s1 + $0x18] sm:$0xff]  ;;  %v1018_v6 = vld [vmem:[%s5662_s1 + $0x10] sm:$0xff]  ;;  %v4553_v31 = vmov 2475754826   ;;  %v4554_v33 = vmov 2131351028  }
  0x73   :  { %1022 = vperm.xlu1 %4301, %v1016_v1   ;;  %v137_v8 = vand.u32 127, %v5683_v7  ;;  %v4555_v35 = vmov 2102212464   ;;  %v4556_v37 = vmov 920167782   ;;  %s4562_s10 = smov [#allocation13]  }
  0x74   :  { %v4557_v39 = vmov 683565275   ;;  %v4558_v46 = vmov 1326507024   ;;  %s3474_s22 = sshll.u32 %s4562_s10, 4  ;;  %s3475_s22 = int_to_ptr.vmem [resolvable:$true] %s3474_s22 }
  0x75   :  { %v138_v9 = vcvt.s32.f32 %v137_v8  ;;  %s4508_s17 = scalar_lea.vmem %s3475_s22, 128  ;;  %p4513_p7 = scmp.lt.s32.totalorder %s3475_s22, %s3475_s22 }
  0x76   :  { %p4509_p6 = scmp.ne.s32.totalorder %s3475_s22, %s4508_s17  ;;  %p4514_p8 = scmp.lt.s32.totalorder %s4508_s17, %s4508_s17 }
  0x77   :  { %v210_v2 = vld [vmem:[%s5690_s27] sm:$0xff]  ;;  %v211_v4 = vld [vmem:[%s5690_s27 + $0x8] sm:$0xff]  ;;  %1027 = vperm.xlu1 %4301, %v1017_v3   ;;  %v139_v10 = vmul.f32 -0.29710776, %v138_v9 }
  0x78   :  { %214 = vperm.xlu0 %4300, %v210_v2   ;;  %p4515_p9 = por %p4514_p8, %p4513_p7 }
  0x79   :  { %v140_v11 = vmul.f32 1.442695, %v139_v10 }
  0x7a   :  { %p4516_p10 = pnand %p4515_p9, %p4509_p6 }
  0x7b   :  { %1037 = vperm.xlu1 %4301, %v1019_v5   ;;  %4302 = vpow2.f32 %v140_v11 }
  0x7c   :  { %219 = vperm.xlu0 %4300, %v211_v4  }
  0x80   :  { %1032 = vperm.xlu0 %4300, %v1018_v6  }
  0x85   :  { %v4765_v12 = vpop.eup %4302 }
  0xf2   :  { %v1023_v13 = vpop.permute.xlu1 %1022 }
  0xf3   :  { %v4768_v14 = vmul.f32 %v4765_v12, %v1023_v13 }
  0xf5   :  { %v1047_v15 = vand.u32 2139095040, %v4768_v14  ;;  %v1044_v26 = vand.u32 2147483647, %v4768_v14 }
  0xf6   :  { %v1028_v16 = vpop.permute.xlu1 %1027 }
  0xf7   :  { %v1048_v17 = vshrl.u32 %v1047_v15, 23  ;;  %v215_v18 = vpop.permute.xlu0 %214  ;;  %v4772_v19 = vmul.f32 %v4765_v12, %v1028_v16  ;;  %v1051_v44 = vand.u32 8388607, %v1044_v26 }
  0xf8   :  { %v4817_v4 = vmul.f32 %v4765_v12, %v215_v18 }
  0xf9   :  { %v3510_v20 = vadd.s32 4294967169, %v1048_v17  ;;  %v1151_v22 = vand.u32 2139095040, %v4772_v19  ;;  %v1052_v55 = vor.u32 8388608, %v1051_v44  ;;  %v5686_v5 = vand.u32 2147483647, %v4772_v19 }
  0xfb   :  { %v1054_v21 = vadd.s32 1, %v3510_v20  ;;  %v220_v24 = vpop.permute.xlu0 %219  ;;  %v1152_v27 = vshrl.u32 %v1151_v22, 23  ;;  %v4810_v0 = vshll.u32 %v1052_v55, 8  ;;  %v227_v20 = vand.u32 2139095040, %v4817_v4 }
  0xfc   :  { %v4779_v30 = vmul.f32 %v4765_v12, %v220_v24 }
  0xfd   :  { %vm1055_vm0 = vcmp.gt.s32.totalorder %v1054_v21, 0  ;;  %v3514_v48 = vadd.s32 4294967169, %v1152_v27  ;;  %v228_v27 = vshrl.u32 %v227_v20, 23 }
  0xfe   :  { %v1056_v23 = vsel %vm1055_vm0, %v1054_v21, 0  ;;  %v331_v49 = vand.u32 2139095040, %v4779_v30  ;;  %v328_v10 = vand.u32 2147483647, %v4779_v30  ;;  %v1155_v21 = vand.u32 8388607, %v5686_v5 }
  0xff   :  { %v1058_v25 = vand.u32 31, %v1056_v23  ;;  %v4776_v28 = vshrl.u32 %v1056_v23, 5  ;;  %v1158_v58 = vadd.s32 1, %v3514_v48  ;;  %v4859_v48 = vadd.s32 4294967169, %v228_v27 }
 0x100   :  { %v332_v61 = vshrl.u32 %v331_v49, 23  ;;  %v335_v22 = vand.u32 8388607, %v328_v10 }
 0x101   :  { %v1059_v29 = vsub.s32 32, %v1058_v25  ;;  %v1064_v32 = vshll.u32 %v4553_v31, %v1058_v25  ;;  %v1067_v34 = vshll.u32 %v4554_v33, %v1058_v25  ;;  %v1070_v36 = vshll.u32 %v4555_v35, %v1058_v25 }
 0x102   :  { %v1073_v38 = vshll.u32 %v4556_v37, %v1058_v25  ;;  %v1061_v40 = vshll.u32 %v4557_v39, %v1058_v25  ;;  %vm1079_vm1 = vcmp.lt.s32.totalorder %v4776_v28, 4  ;;  %vm1076_vm2 = vcmp.lt.s32.totalorder %v4776_v28, 1 }
 0x103   :  { %v1062_v41 = vshrl.u32 %v4553_v31, %v1059_v29  ;;  %v1065_v42 = vshrl.u32 %v4554_v33, %v1059_v29  ;;  %v1068_v43 = vshrl.u32 %v4555_v35, %v1059_v29  ;;  %v1071_v45 = vshrl.u32 %v4556_v37, %v1059_v29 }
 0x104   :  { %v1074_v47 = vshrl.u32 %v4558_v46, %v1059_v29  ;;  %vm1078_vm3 = vcmp.lt.s32.totalorder %v4776_v28, 3  ;;  %vm1077_vm4 = vcmp.lt.s32.totalorder %v4776_v28, 2  ;;  %vm1159_vm5 = vcmp.gt.s32.totalorder %v1158_v58, 0 }
 0x105   :  { %v1066_v50 = vor.u32 %v1065_v42, %v1064_v32  ;;  %v1069_v51 = vor.u32 %v1068_v43, %v1067_v34  ;;  %v1072_v52 = vor.u32 %v1071_v45, %v1070_v36  ;;  %v1063_v54 = vor.u32 %v1062_v41, %v1061_v40  ;;  %v1038_v42 = vpop.permute.xlu1 %1037 }
 0x106   :  { %v1075_v53 = vor.u32 %v1074_v47, %v1073_v38  ;;  %v3490_v3 = vadd.s32 4294967169, %v332_v61  ;;  %v1160_v6 = vsel %vm1159_vm5, %v1158_v58, 0  ;;  %v1060_v11 = vshrl.u32 %v4557_v39, %v1059_v29 }
 0x107   :  { %v1085_v56 = vsel %vm1079_vm1, %v1072_v52, 920167782  ;;  %v1088_v59 = vsel %vm1076_vm2, %v1066_v50, %v1069_v51  ;;  %v1084_v62 = vsel %vm1076_vm2, %v1063_v54, %v1066_v50  ;;  %v1081_v16 = vsel %vm1079_vm1, %v1069_v51, 2102212464 }
 0x108   :  { %v1089_v57 = vsel %vm1079_vm1, %v1075_v53, 1326507024  ;;  %v1086_v63 = vsel %vm1078_vm3, %v1069_v51, %v1085_v56  ;;  %v1162_v17 = vand.u32 31, %v1160_v6  ;;  %v338_v18 = vadd.s32 1, %v3490_v3 }
 0x109   :  { %v1090_v60 = vsel %vm1078_vm3, %v1072_v52, %v1089_v57  ;;  %v1087_v2 = vsel %vm1077_vm4, %v1084_v62, %v1086_v63  ;;  %v1080_v23 = vsel %vm1076_vm2, %v1060_v11, %v1063_v54  ;;  %v1082_v24 = vsel %vm1078_vm3, %v1066_v50, %v1081_v16 }
 0x10a   :  { %v1091_v1 = vsel %vm1077_vm4, %v1088_v59, %v1090_v60  ;;  %v4827_v13 = vmul.u32.u64.low %v4810_v0, %v1087_v2  ;;  %v4828_v15 = vmul.u32.u64.high %v4810_v0, %v1087_v2, %v4827_v13  ;;  %v4842_v25 = vsub.s32 32, %v1162_v17 }
 0x10b   :  { %v4821_v8 = vmul.u32.u64.low %v4810_v0, %v1091_v1  ;;  %v4822_v9 = vmul.u32.u64.high %v4810_v0, %v1091_v1, %v4821_v8  ;;  %vm339_vm6 = vcmp.gt.s32.totalorder %v338_v18, 0  ;;  %v1156_v29 = vor.u32 8388608, %v1155_v21 }
 0x10c   :  { %v1083_v32 = vsel %vm1077_vm4, %v1080_v23, %v1082_v24  ;;  %v336_v34 = vor.u32 8388608, %v335_v22  ;;  %v1102_v36 = vadd.s32 1, %v4828_v15  ;;  %v1165_v38 = vshll.u32 %v4557_v39, %v1162_v17 }
 0x10d   :  { %vm1101_vm7 = vc.u32 %v4822_v9, %v4827_v13  ;;  %v1168_v40 = vshll.u32 %v4553_v31, %v1162_v17  ;;  %v340_v41 = vsel %vm339_vm6, %v338_v18, 0  ;;  %v1166_v43 = vshrl.u32 %v4553_v31, %v4842_v25 }
 0x10e   :  { %v1169_v44 = vshrl.u32 %v4554_v33, %v4842_v25  ;;  %v1174_v28 = vshll.u32 %v4555_v35, %v1162_v17  ;;  %v1175_v45 = vshrl.u32 %v4556_v37, %v4842_v25  ;;  %v1099_v47 = vmul.u32 %v4810_v0, %v1083_v32 }
 0x10f   :  { %v4861_v49 = vshll.u32 %v1156_v29, 8  ;;  %v342_v50 = vand.u32 31, %v340_v41  ;;  %v4863_v51 = vshrl.u32 %v1160_v6, 5  ;;  %v1171_v52 = vshll.u32 %v4554_v33, %v1162_v17 }
 0x110   :  { %v4866_v53 = vshll.u32 %v336_v34, 8  ;;  %v4869_v54 = vmul.f32 %v4765_v12, %v1038_v42  ;;  %v1103_v55 = vsel %vm1101_vm7, %v1102_v36, %v4828_v15  ;;  %v1172_v56 = vshrl.u32 %v4555_v35, %v4842_v25 }
 0x111   :  { %v1177_v57 = vshll.u32 %v4556_v37, %v1162_v17  ;;  %v343_v58 = vsub.s32 32, %v342_v50  ;;  %v4878_v59 = vor.u32 %v1166_v43, %v1165_v38  ;;  %v4880_v60 = vor.u32 %v1169_v44, %v1168_v40 }
 0x112   :  { %v1176_v61 = vor.u32 %v1175_v45, %v1174_v28  ;;  %v1178_v62 = vshrl.u32 %v4558_v46, %v4842_v25  ;;  %v341_v63 = vshrl.u32 %v340_v41, 5  ;;  %v345_v0 = vshll.u32 %v4557_v39, %v342_v50 }
 0x113   :  { %v346_v1 = vshrl.u32 %v4553_v31, %v343_v58  ;;  %v349_v2 = vshrl.u32 %v4554_v33, %v343_v58  ;;  %v348_v3 = vshll.u32 %v4553_v31, %v342_v50  ;;  %v352_v6 = vshrl.u32 %v4555_v35, %v343_v58 }
 0x114   :  { %v354_v8 = vshll.u32 %v4555_v35, %v342_v50  ;;  %v355_v11 = vshrl.u32 %v4556_v37, %v343_v58  ;;  %vm1183_vm8 = vcmp.lt.s32.totalorder %v4863_v51, 4  ;;  %v351_v15 = vshll.u32 %v4554_v33, %v342_v50 }
 0x115   :  { %v357_v16 = vshll.u32 %v4556_v37, %v342_v50  ;;  %v358_v17 = vshrl.u32 %v4558_v46, %v343_v58  ;;  %v1179_v18 = vor.u32 %v1178_v62, %v1177_v57  ;;  %v347_v20 = vor.u32 %v346_v1, %v345_v0 }
 0x116   :  { %v350_v21 = vor.u32 %v349_v2, %v348_v3  ;;  %v356_v22 = vor.u32 %v355_v11, %v354_v8  ;;  %v1173_v23 = vor.u32 %v1172_v56, %v1171_v52  ;;  %vm1180_vm9 = vcmp.lt.s32.totalorder %v4863_v51, 1 }
 0x117   :  { %v353_v24 = vor.u32 %v352_v6, %v351_v15  ;;  %v359_v27 = vor.u32 %v358_v17, %v357_v16  ;;  %v4896_v29 = vadd.s32 %v1103_v55, %v1099_v47  ;;  %vm1182_vm10 = vcmp.lt.s32.totalorder %v4863_v51, 3  ;;  %v147_v6 = vld [vmem:[#allocation2 + $0x28] sm:$0xff] }
 0x118   :  { %v1189_v32 = vsel %vm1183_vm8, %v1176_v61, 920167782  ;;  %vm363_vm11 = vcmp.lt.s32.totalorder %v341_v63, 4  ;;  %vm1181_vm12 = vcmp.lt.s32.totalorder %v4863_v51, 2  ;;  %vm360_vm13 = vcmp.lt.s32.totalorder %v341_v63, 1 }
 0x119   :  { %v369_v34 = vsel %vm363_vm11, %v356_v22, 920167782  ;;  %v1359_v36 = vand.u32 2139095040, %v4869_v54  ;;  %v1188_v38 = vsel %vm1180_vm9, %v4878_v59, %v4880_v60  ;;  %v1193_v40 = vsel %vm1183_vm8, %v1179_v18, 1326507024 }
 0x11a   :  { %vm362_vm14 = vcmp.lt.s32.totalorder %v341_v63, 3  ;;  %v368_v41 = vsel %vm360_vm13, %v347_v20, %v350_v21  ;;  %v1190_v42 = vsel %vm1182_vm10, %v1173_v23, %v1189_v32  ;;  %v1192_v43 = vsel %vm1180_vm9, %v4880_v60, %v1173_v23 }
 0x11b   :  { %v370_v44 = vsel %vm362_vm14, %v353_v24, %v369_v34  ;;  %v373_v28 = vsel %vm363_vm11, %v359_v27, 1326507024  ;;  %v344_v45 = vshrl.u32 %v4557_v39, %v343_v58  ;;  %vm361_vm15 = vcmp.lt.s32.totalorder %v341_v63, 2 }
 0x11c   :  { %v365_v47 = vsel %vm363_vm11, %v353_v24, 2102212464  ;;  %v372_v50 = vsel %vm360_vm13, %v350_v21, %v353_v24  ;;  %v1194_v52 = vsel %vm1182_vm10, %v1176_v61, %v1193_v40  ;;  %v371_v55 = vsel %vm361_vm15, %v368_v41, %v370_v44  ;;  %v146_v61 = vld [vmem:[#allocation2 + $0x20] sm:$0xff] }
 0x11d   :  { %v374_v56 = vsel %vm362_vm14, %v356_v22, %v373_v28  ;;  %v1360_v57 = vshrl.u32 %v1359_v36, 23  ;;  %v1191_v62 = vsel %vm1181_vm12, %v1188_v38, %v1190_v42  ;;  %v364_v0 = vsel %vm360_vm13, %v344_v45, %v347_v20 }
 0x11e   :  { %v366_v1 = vsel %vm362_vm14, %v350_v21, %v365_v47  ;;  %v375_v58 = vsel %vm361_vm15, %v372_v50, %v374_v56  ;;  %v4928_v2 = vmul.u32.u64.low %v4866_v53, %v371_v55  ;;  %v4929_v3 = vmul.u32.u64.high %v4866_v53, %v371_v55, %v4928_v2 }
 0x11f   :  { %v1105_v8 = vadd.s32 536870912, %v4896_v29  ;;  %v234_v11 = vadd.s32 1, %v4859_v48  ;;  %v1195_v15 = vsel %vm1181_vm12, %v1192_v43, %v1194_v52  ;;  %v3522_v16 = vadd.s32 4294967169, %v1360_v57 }
 0x120   :  { %v4937_v17 = vmul.u32.u64.low %v4861_v49, %v1191_v62  ;;  %v4938_v18 = vmul.u32.u64.high %v4861_v49, %v1191_v62, %v4937_v17  ;;  %v4942_v20 = vmul.u32.u64.low %v4866_v53, %v375_v58  ;;  %v4943_v21 = vmul.u32.u64.high %v4866_v53, %v375_v58, %v4942_v20 }
 0x121   :  { %v1164_v22 = vshrl.u32 %v4557_v39, %v4842_v25  ;;  %v367_v24 = vsel %vm361_vm15, %v364_v0, %v366_v1  ;;  %v1366_v27 = vadd.s32 1, %v3522_v16  ;;  %v3838_v48 = vpack.c.bf16 %v147_v6, %v146_v61 }
 0x122   :  { %v1185_v32 = vsel %vm1183_vm8, %v1173_v23, 2102212464  ;;  %v4951_v34 = vmul.u32.u64.low %v4861_v49, %v1195_v15  ;;  %v4952_v36 = vmul.u32.u64.high %v4861_v49, %v1195_v15, %v4951_v34  ;;  %v386_v38 = vadd.s32 1, %v4929_v3 }
 0x123   :  { %v4955_v40 = vshrl.u32 %v1105_v8, 30  ;;  %vm1367_vm0 = vcmp.gt.s32.totalorder %v1366_v27, 0  ;;  %3839 = vmatprep.subr.bf16.mxu0 %v3838_v48  ;;  %vm235_vm1 = vcmp.gt.s32.totalorder %v234_v11, 0  ;;  %v383_v25 = vmul.u32 %v4866_v53, %v367_v24  ;;  %v1033_v53 = vpop.permute.xlu0 %1032 }
 0x124   :  { %vm385_vm2 = vc.u32 %v4943_v21, %v4928_v2  ;;  %v1368_v63 = vsel %vm1367_vm0, %v1366_v27, 0  ;;  %3841 = vmatpush3.bf16.msra.mxu0 %v3838_v48  ;;  %v1184_v23 = vsel %vm1180_vm9, %v1164_v22, %v4878_v59  ;;  %v1186_v41 = vsel %vm1182_vm10, %v4880_v60, %v1185_v32 }
 0x125   :  { %v387_v42 = vsel %vm385_vm2, %v386_v38, %v4929_v3  ;;  %v5685_v43 = vand.u32 2147483647, %v4869_v54  ;;  %v1370_v28 = vand.u32 31, %v1368_v63  ;;  %v1107_v45 = vshll.u32 %v4955_v40, 30 }
 0x126   :  { %v388_v44 = vadd.s32 %v387_v42, %v383_v25  ;;  %v4969_v47 = vsel %vm235_vm1, %v234_v11, 0  ;;  %v1187_v50 = vsel %vm1181_vm12, %v1184_v23, %v1186_v41  ;;  %v1206_v55 = vadd.s32 1, %v4938_v18 }
 0x127   :  { %v1371_v59 = vsub.s32 32, %v1370_v28  ;;  %v1363_v60 = vand.u32 8388607, %v5685_v43  ;;  %v4977_v56 = vmul.f32 %v4765_v12, %v1033_v53  ;;  %v4980_v57 = vand.u32 31, %v4969_v47 }
 0x128   :  { %v389_v52 = vadd.s32 536870912, %v388_v44  ;;  %vm1205_vm3 = vc.u32 %v4952_v36, %v4937_v17  ;;  %v1369_v62 = vshrl.u32 %v1368_v63, 5  ;;  %v1373_v51 = vshll.u32 %v4557_v39, %v1370_v28 }
 0x129   :  { %v4986_v0 = vsub.s32 %v4896_v29, %v1107_v45  ;;  %v1203_v1 = vmul.u32 %v4861_v49, %v1187_v50  ;;  %v1374_v58 = vshrl.u32 %v4553_v31, %v1371_v59  ;;  %v1376_v3 = vshll.u32 %v4553_v31, %v1370_v28 }
 0x12a   :  { %v4991_v12 = vshrl.u32 %v389_v52, 30  ;;  %v1377_v61 = vshrl.u32 %v4554_v33, %v1371_v59  ;;  %v1379_v6 = vshll.u32 %v4554_v33, %v1370_v28  ;;  %v1380_v8 = vshrl.u32 %v4555_v35, %v1371_v59 }
 0x12b   :  { %v1207_v11 = vsel %vm1205_vm3, %v1206_v55, %v4938_v18  ;;  %v1364_v15 = vor.u32 8388608, %v1363_v60  ;;  %v1382_v29 = vshll.u32 %v4555_v35, %v1370_v28  ;;  %v1255_v16 = vand.u32 2139095040, %v4977_v56 }
 0x12c   :  { %v1375_v49 = vor.u32 %v1374_v58, %v1373_v51  ;;  %v1378_v20 = vor.u32 %v1377_v61, %v1376_v3  ;;  %v1383_v22 = vshrl.u32 %v4556_v37, %v1371_v59  ;;  %vm1388_vm4 = vcmp.lt.s32.totalorder %v1369_v62, 1  ;;  %v148_v51 = vld [vmem:[#allocation2 + $0x30] sm:$0xff] }
 0x12d   :  { %v1372_v24 = vshrl.u32 %v4557_v39, %v1371_v59  ;;  %v1381_v27 = vor.u32 %v1380_v8, %v1379_v6  ;;  %v1385_v48 = vshll.u32 %v4556_v37, %v1370_v28  ;;  %v1386_v32 = vshrl.u32 %v4558_v46, %v1371_v59 }
 0x12e   :  { %v391_v34 = vshll.u32 %v4991_v12, 30  ;;  %v1384_v18 = vor.u32 %v1383_v22, %v1382_v29  ;;  %vm1390_vm5 = vcmp.lt.s32.totalorder %v1369_v62, 3  ;;  %vm1391_vm6 = vcmp.lt.s32.totalorder %v1369_v62, 4 }
 0x12f   :  { %v1387_v38 = vor.u32 %v1386_v32, %v1385_v48  ;;  %vm1389_vm7 = vcmp.lt.s32.totalorder %v1369_v62, 2  ;;  %v1393_v25 = vsel %vm1391_vm6, %v1381_v27, 2102212464  ;;  %v1404_v63 = vshll.u32 %v1364_v15, 8 }
 0x130   :  { %v5004_v23 = vadd.s32 %v1207_v11, %v1203_v1  ;;  %v1396_v41 = vsel %vm1388_vm4, %v1375_v49, %v1378_v20  ;;  %v1397_v42 = vsel %vm1391_vm6, %v1384_v18, 920167782  ;;  %v1256_v53 = vshrl.u32 %v1255_v16, 23  ;;  %v149_v1 = vld [vmem:[#allocation2 + $0x38] sm:$0xff] }
 0x131   :  { %v1392_v45 = vsel %vm1388_vm4, %v1372_v24, %v1375_v49  ;;  %v1394_v28 = vsel %vm1390_vm5, %v1378_v20, %v1393_v25  ;;  %v1398_v50 = vsel %vm1390_vm5, %v1381_v27, %v1397_v42  ;;  %v1400_v52 = vsel %vm1388_vm4, %v1378_v20, %v1381_v27 }
 0x132   :  { %v5011_v59 = vsub.s32 %v388_v44, %v391_v34  ;;  %v1399_v55 = vsel %vm1389_vm7, %v1396_v41, %v1398_v50  ;;  %v1401_v60 = vsel %vm1391_vm6, %v1387_v38, 1326507024  ;;  %v5015_v58 = vsub.s32 32, %v4980_v57 }
 0x133   :  { %v1402_v3 = vsel %vm1390_vm5, %v1384_v18, %v1401_v60  ;;  %v5018_v61 = vmul.u32.u64.low %v1404_v63, %v1399_v55  ;;  %v5019_v6 = vmul.u32.u64.high %v1404_v63, %v1399_v55, %v5018_v61  ;;  %v1110_v8 = vsub.s32 0, %v4986_v0 }
 0x134   :  { %v1395_v11 = vsel %vm1389_vm7, %v1392_v45, %v1394_v28  ;;  %v1403_v44 = vsel %vm1389_vm7, %v1400_v52, %v1402_v3  ;;  %v3518_v15 = vadd.s32 4294967169, %v1256_v53  ;;  %v1209_v29 = vadd.s32 536870912, %v5004_v23 }
 0x135   :  { %v5026_v16 = vmul.u32.u64.low %v1404_v63, %v1403_v44  ;;  %v5027_v49 = vmul.u32.u64.high %v1404_v63, %v1403_v44, %v5026_v16  ;;  %v3842_v20 = vpack.c.bf16 %v149_v1, %v148_v51  ;;  %v394_v22 = vsub.s32 0, %v5011_v59 }
 0x136   :  { %v5684_v24 = vand.u32 2147483647, %v4977_v56  ;;  %v1262_v27 = vadd.s32 1, %v3518_v15  ;;  %v1411_v48 = vmul.u32 %v1404_v63, %v1395_v11  ;;  %v1414_v32 = vadd.s32 1, %v5019_v6 }
 0x137   :  { %3843 = vmatprep.subr.bf16.mxu0 %v3842_v20  ;;  %v224_v34 = vand.u32 2147483647, %v4817_v4  ;;  %v250_v62 = vshll.u32 %v4555_v35, %v4980_v57  ;;  %v251_v18 = vshrl.u32 %v4556_v37, %v5015_v58  ;;  %v3511_v38 = vmin.u32 %v1110_v8, %v4986_v0 }
 0x138   :  { %3845 = vmatpush3.bf16.msra.mxu0 %v3842_v20  ;;  %v5038_v25 = vshrl.u32 %v1209_v29, 30  ;;  %vm1413_vm8 = vc.u32 %v5027_v49, %v5018_v61  ;;  %vm1263_vm9 = vcmp.gt.s32.totalorder %v1262_v27, 0  ;;  %v3491_v63 = vmin.u32 %v394_v22, %v5011_v59 }
 0x139   :  { %v1415_v41 = vsel %vm1413_vm8, %v1414_v32, %v5019_v6  ;;  %v1259_v42 = vand.u32 8388607, %v5684_v24  ;;  %v1264_v53 = vsel %vm1263_vm9, %v1262_v27, 0  ;;  %v5048_v50 = vand.u32 8388607, %v224_v34 }
 0x13a   :  { %v1416_v45 = vadd.s32 %v1415_v41, %v1411_v48  ;;  %v1266_v28 = vand.u32 31, %v1264_v53  ;;  %v5051_v52 = vshrl.u32 %v4969_v47, 5  ;;  %v5053_v55 = vor.u32 %v251_v18, %v250_v62 }
 0x13b   :  { %v5057_v60 = vshll.u32 %v4556_v37, %v4980_v57  ;;  %v5061_v51 = vshrl.u32 %v4558_v46, %v5015_v58  ;;  %v1112_v1 = vclz %v3511_v38  ;;  %v1211_v3 = vshll.u32 %v5038_v25, 30 }
 0x13c   :  { %v1417_v6 = vadd.s32 536870912, %v1416_v45  ;;  %v1267_v8 = vsub.s32 32, %v1266_v28  ;;  %v396_v11 = vclz %v3491_v63  ;;  %v1260_v44 = vor.u32 8388608, %v1259_v42 }
 0x13d   :  { %v1265_v15 = vshrl.u32 %v1264_v53, 5  ;;  %v1269_v47 = vshll.u32 %v4557_v39, %v1266_v28  ;;  %v1272_v16 = vshll.u32 %v4553_v31, %v1266_v28  ;;  %v1275_v22 = vshll.u32 %v4554_v33, %v1266_v28 }
 0x13e   :  { %v1270_v29 = vshrl.u32 %v4553_v31, %v1267_v8  ;;  %v1273_v20 = vshrl.u32 %v4554_v33, %v1267_v8  ;;  %v5069_v27 = vshrl.u32 %v1417_v6, 30  ;;  %v1276_v48 = vshrl.u32 %v4555_v35, %v1267_v8 }
 0x13f   :  { %v1278_v32 = vshll.u32 %v4555_v35, %v1266_v28  ;;  %v1279_v62 = vshrl.u32 %v4556_v37, %v1267_v8  ;;  %v1281_v63 = vshll.u32 %v4556_v37, %v1266_v28  ;;  %v1282_v41 = vshrl.u32 %v4558_v46, %v1267_v8 }
 0x140   :  { %v1271_v18 = vor.u32 %v1270_v29, %v1269_v47  ;;  %v1274_v38 = vor.u32 %v1273_v20, %v1272_v16  ;;  %v3512_v42 = vadd.s32 4294967294, %v1112_v1  ;;  %v255_v53 = vor.u32 %v5061_v51, %v5057_v60 }
 0x141   :  { %v1277_v7 = vor.u32 %v1276_v48, %v1275_v22  ;;  %v1280_v24 = vor.u32 %v1279_v62, %v1278_v32  ;;  %vm259_vm10 = vcmp.lt.s32.totalorder %v5051_v52, 4  ;;  %v5080_v6 = vsub.s32 %v5004_v23, %v1211_v3 }
 0x142   :  { %v3492_v43 = vadd.s32 4294967294, %v396_v11  ;;  %v1283_v5 = vor.u32 %v1282_v41, %v1281_v63  ;;  %vm1284_vm11 = vcmp.lt.s32.totalorder %v1265_v15, 1  ;;  %v1268_v47 = vshrl.u32 %v4557_v39, %v1267_v8 }
 0x143   :  { %vm1287_vm12 = vcmp.lt.s32.totalorder %v1265_v15, 4  ;;  %v1292_v37 = vsel %vm1284_vm11, %v1271_v18, %v1274_v38  ;;  %v1300_v28 = vshll.u32 %v1260_v44, 8  ;;  %v1419_v46 = vshll.u32 %v5069_v27, 30 }
 0x144   :  { %vm1286_vm13 = vcmp.lt.s32.totalorder %v1265_v15, 3  ;;  %v1289_v1 = vsel %vm1287_vm12, %v1277_v7, 2102212464  ;;  %v1293_v60 = vsel %vm1287_vm12, %v1280_v24, 920167782  ;;  %vm1285_vm14 = vcmp.lt.s32.totalorder %v1265_v15, 2 }
 0x145   :  { %v1294_v51 = vsel %vm1286_vm13, %v1277_v7, %v1293_v60  ;;  %v1296_v29 = vsel %vm1284_vm11, %v1274_v38, %v1277_v7  ;;  %v1297_v16 = vsel %vm1287_vm12, %v1283_v5, 1326507024  ;;  %vm3513_vm15 = vcmp.lt.s32.totalorder %v3512_v42, 0 }
 0x146   :  { %v1288_v23 = vsel %vm1284_vm11, %v1268_v47, %v1271_v18  ;;  %v1290_v3 = vsel %vm1286_vm13, %v1274_v38, %v1289_v1  ;;  %v1295_v11 = vsel %vm1285_vm14, %v1292_v37, %v1294_v51  ;;  %v1298_v20 = vsel %vm1286_vm13, %v1280_v24, %v1297_v16 }
 0x147   :  { %v5085_v22 = vmul.u32.u64.low %v1300_v28, %v1295_v11  ;;  %v5086_v8 = vmul.u32.u64.high %v1300_v28, %v1295_v11, %v5085_v22  ;;  %v242_v44 = vshrl.u32 %v4553_v31, %v5015_v58  ;;  %v1214_v48 = vsub.s32 0, %v5080_v6 }
 0x148   :  { %vm3493_vm0 = vcmp.lt.s32.totalorder %v3492_v43, 0  ;;  %v1299_v32 = vsel %vm1285_vm14, %v1296_v29, %v1298_v20  ;;  %v241_v7 = vshll.u32 %v4557_v39, %v4980_v57  ;;  %v5095_v5 = vsub.s32 %v1416_v45, %v1419_v46 }
 0x149   :  { %v1291_v62 = vsel %vm1285_vm14, %v1288_v23, %v1290_v3  ;;  %v5098_v24 = vmul.u32.u64.low %v1300_v28, %v1299_v32  ;;  %v5099_v18 = vmul.u32.u64.high %v1300_v28, %v1299_v32, %v5098_v24  ;;  %v244_v38 = vshll.u32 %v4553_v31, %v4980_v57  ;;  %v142_v32 = vld [vmem:[#allocation2] sm:$0xff] }
 0x14a   :  { %v245_v63 = vshrl.u32 %v4554_v33, %v5015_v58  ;;  %v247_v41 = vshll.u32 %v4554_v33, %v4980_v57  ;;  %v248_v47 = vshrl.u32 %v4555_v35, %v5015_v58  ;;  %v265_v45 = vsel %vm259_vm10, %v5053_v55, 920167782 }
 0x14b   :  { %v269_v15 = vsel %vm259_vm10, %v255_v53, 1326507024  ;;  %v1310_v37 = vadd.s32 1, %v5086_v8  ;;  %v243_v46 = vor.u32 %v242_v44, %v241_v7  ;;  %v5116_v31 = vsel %vm3513_vm15, 0, %v3512_v42  ;;  %v143_v7 = vld [vmem:[#allocation2 + $0x8] sm:$0xff] }
 0x14c   :  { %v3515_v1 = vmin.u32 %v1214_v48, %v5080_v6  ;;  %v246_v60 = vor.u32 %v245_v63, %v244_v38  ;;  %v249_v33 = vor.u32 %v248_v47, %v247_v41  ;;  %v5120_v57 = vsel %vm3493_vm0, 0, %v3492_v43 }
 0x14d   :  { %v1307_v35 = vmul.u32 %v1300_v28, %v1291_v62  ;;  %vm1309_vm1 = vc.u32 %v5099_v18, %v5085_v22  ;;  %v232_v51 = vor.u32 8388608, %v5048_v50  ;;  %v1422_v53 = vsub.s32 0, %v5095_v5 }
 0x14e   :  { %v1311_v29 = vsel %vm1309_vm1, %v1310_v37, %v5086_v8  ;;  %vm256_vm2 = vcmp.lt.s32.totalorder %v5051_v52, 1  ;;  %vm258_vm3 = vcmp.lt.s32.totalorder %v5051_v52, 3  ;;  %v1216_v50 = vclz %v3515_v1 }
 0x14f   :  { %v1312_v42 = vadd.s32 %v1311_v29, %v1307_v35  ;;  %v264_v16 = vsel %vm256_vm2, %v243_v46, %v246_v60  ;;  %v266_v43 = vsel %vm258_vm3, %v249_v33, %v265_v45  ;;  %v270_v28 = vsel %vm258_vm3, %v5053_v55, %v269_v15 }
 0x150   :  { %v240_v23 = vshrl.u32 %v4557_v39, %v5015_v58  ;;  %vm257_vm4 = vcmp.lt.s32.totalorder %v5051_v52, 2  ;;  %v261_v3 = vsel %vm259_vm10, %v249_v33, 2102212464  ;;  %v268_v8 = vsel %vm256_vm2, %v246_v60, %v249_v33 }
 0x151   :  { %v1313_v11 = vadd.s32 536870912, %v1312_v42  ;;  %v267_v20 = vsel %vm257_vm4, %v264_v16, %v266_v43  ;;  %v272_v44 = vshll.u32 %v232_v51, 8  ;;  %v404_v48 = vsub.s32 4294967266, %v5120_v57 }
 0x152   :  { %v3523_v55 = vmin.u32 %v1422_v53, %v5095_v5  ;;  %v260_v39 = vsel %vm256_vm2, %v240_v23, %v243_v46  ;;  %v271_v58 = vsel %vm257_vm4, %v268_v8, %v270_v28  ;;  %v262_v24 = vsel %vm258_vm3, %v246_v60, %v261_v3 }
 0x153   :  { %v5151_v62 = vshrl.u32 %v1313_v11, 30  ;;  %v5155_v38 = vmul.u32.u64.low %v272_v44, %v271_v58  ;;  %v5156_v63 = vmul.u32.u64.high %v272_v44, %v271_v58, %v5155_v38  ;;  %v1120_v45 = vsub.s32 4294967266, %v5116_v31 }
 0x154   :  { %v5158_v41 = vmul.u32.u64.low %v272_v44, %v267_v20  ;;  %v5159_v47 = vmul.u32.u64.high %v272_v44, %v267_v20, %v5158_v41  ;;  %v5164_v37 = vpack.c.bf16 %v143_v7, %v142_v32  ;;  %v3516_v46 = vadd.s32 4294967294, %v1216_v50 }
 0x155   :  { %v1315_v15 = vshll.u32 %v5151_v62, 30  ;;  %v405_v1 = vadd.s32 127, %v404_v48  ;;  %v1424_v33 = vclz %v3523_v55  ;;  %v263_v35 = vsel %vm257_vm4, %v260_v39, %v262_v24 }
 0x156   :  { %vm281_vm5 = vc.u32 %v5156_v63, %v5158_v41  ;;  %3847 = vmatprep.subr.bf16.mxu0 %v5164_v37  ;;  %v1100_v51 = vadd.s32 %v4827_v13, %v4822_v9  ;;  %v1116_v53 = vsub.s32 32, %v5116_v31  ;;  %v400_v29 = vsub.s32 32, %v5120_v57 }
 0x157   :  { %v5168_v60 = vsub.s32 %v1312_v42, %v1315_v15  ;;  %v282_v16 = vadd.s32 1, %v5159_v47  ;;  %v1121_v43 = vadd.s32 127, %v1120_v45  ;;  %v384_v52 = vadd.s32 %v4928_v2, %v4943_v21 }
 0x158   :  { %v279_v28 = vmul.u32 %v272_v44, %v263_v35  ;;  %vm3517_vm6 = vcmp.lt.s32.totalorder %v3516_v46, 0  ;;  %v406_v50 = vshll.u32 %v405_v1, 23  ;;  %v3524_v23 = vadd.s32 4294967294, %v1424_v33 }
 0x159   :  { %v1318_v42 = vsub.s32 0, %v5168_v60  ;;  %v283_v3 = vsel %vm281_vm5, %v282_v16, %v5159_v47  ;;  %v1117_v11 = vshll.u32 %v4986_v0, %v5116_v31  ;;  %v402_v20 = vshrl.u32 %v384_v52, %v400_v29 }
 0x15a   :  { %v284_v13 = vadd.s32 %v283_v3, %v279_v28  ;;  %v1118_v8 = vshrl.u32 %v1100_v51, %v1116_v53  ;;  %v1219_v48 = vsel %vm3517_vm6, 0, %v3516_v46  ;;  %v1122_v2 = vshll.u32 %v1121_v43, 23 }
 0x15b   :  { %v3519_v9 = vmin.u32 %v1318_v42, %v5168_v60  ;;  %v401_v21 = vshll.u32 %v5011_v59, %v5120_v57  ;;  %v407_v44 = vor.u32 4788187, %v406_v50  ;;  %vm3525_vm7 = vcmp.lt.s32.totalorder %v3524_v23, 0 }
 0x15c   :  { %v285_v39 = vadd.s32 536870912, %v284_v13  ;;  %v1224_v7 = vsub.s32 4294967266, %v1219_v48  ;;  %v1427_v38 = vsel %vm3525_vm7, 0, %v3524_v23  ;;  %v1119_v31 = vor.u32 %v1118_v8, %v1117_v11 }
 0x15d   :  { %v1320_v55 = vclz %v3519_v9  ;;  %v403_v24 = vor.u32 %v402_v20, %v401_v21  ;;  %v1123_v47 = vor.u32 4788187, %v1122_v2  ;;  %v408_v45 = vand.u32 2147483647, %v407_v44 }
 0x15e   :  { %v5187_v32 = vshrl.u32 %v285_v39, 30  ;;  %v1204_v15 = vadd.s32 %v4937_v17, %v4952_v36  ;;  %v1220_v46 = vsub.s32 32, %v1219_v48  ;;  %v1225_v59 = vadd.s32 127, %v1224_v7 }
 0x15f   :  { %v3520_v58 = vadd.s32 4294967294, %v1320_v55  ;;  %v410_v57 = vcvt.s32.f32 %v403_v24  ;;  %v1432_v33 = vsub.s32 4294967266, %v1427_v38  ;;  %v1124_v53 = vand.u32 2147483647, %v1123_v47 }
 0x160   :  { %v287_v0 = vshll.u32 %v5187_v32, 30  ;;  %v1126_v29 = vcvt.s32.f32 %v1119_v31  ;;  %v1221_v43 = vshll.u32 %v5080_v6, %v1219_v48  ;;  %v1222_v52 = vshrl.u32 %v1204_v15, %v1220_v46 }
 0x161   :  { %vm3521_vm8 = vcmp.lt.s32.totalorder %v3520_v58, 0  ;;  %v411_v16 = vmul.f32 %v410_v57, %v408_v45  ;;  %v1226_v50 = vshll.u32 %v1225_v59, 23  ;;  %v1412_v23 = vadd.s32 %v5018_v61, %v5027_v49 }
 0x162   :  { %v288_v1 = vsub.s32 %v284_v13, %v287_v0  ;;  %v1323_v35 = vsel %vm3521_vm8, 0, %v3520_v58  ;;  %v1428_v17 = vsub.s32 32, %v1427_v38  ;;  %v1433_v36 = vadd.s32 127, %v1432_v33 }
 0x163   :  { %v1328_v42 = vsub.s32 4294967266, %v1323_v35  ;;  %v1127_v9 = vmul.f32 %v1126_v29, %v1124_v53  ;;  %v412_v13 = vxor.u32 2147483648, %v411_v16  ;;  %v1223_v11 = vor.u32 %v1222_v52, %v1221_v43 }
 0x164   :  { %v290_v51 = vsub.s32 0, %v288_v1  ;;  %v1227_v55 = vor.u32 4788187, %v1226_v50  ;;  %v1429_v39 = vshll.u32 %v5095_v5, %v1427_v38  ;;  %v1430_v2 = vshrl.u32 %v1412_v23, %v1428_v17 }
 0x165   :  { %v1329_v20 = vadd.s32 127, %v1328_v42  ;;  %v1434_v6 = vshll.u32 %v1433_v36, 23  ;;  %vm5198_vm9 = vcmp.le.f32.partialorder %v328_v10, 0.7853982  ;;  %vm330_vm10 = vcmp.lt.s32.totalorder %v4779_v30, 0 }
 0x166   :  { %v3487_v28 = vmin.u32 %v290_v51, %v288_v1  ;;  %v1324_v61 = vsub.s32 32, %v1323_v35  ;;  %v1128_v49 = vxor.u32 2147483648, %v1127_v9  ;;  %v413_v21 = vsel %vm330_vm10, %v412_v13, %v411_v16 }
 0x167   :  { %v1308_v44 = vadd.s32 %v5085_v22, %v5099_v18  ;;  %v1330_v58 = vshll.u32 %v1329_v20, 23  ;;  %v280_v7 = vadd.s32 %v5158_v41, %v5156_v63  ;;  %v1228_v38 = vand.u32 2147483647, %v1227_v55 }
 0x168   :  { %v292_v3 = vclz %v3487_v28  ;;  %v1230_v0 = vcvt.s32.f32 %v1223_v11  ;;  %v1431_v31 = vor.u32 %v1430_v2, %v1429_v39  ;;  %v1435_v47 = vor.u32 4788187, %v1434_v6  ;;  %v175_v2 = vld [vmem:[%s5667_s6 + $0x38] sm:$0xff] }
 0x169   :  { %v1326_v45 = vshrl.u32 %v1308_v44, %v1324_v61  ;;  %vm1046_vm12 = vcmp.lt.s32.totalorder %v4768_v14, 0  ;;  %v416_v22 = vsel %vm5198_vm9, %v4779_v30, %v413_v21  ;;  %v1325_v18 = vshll.u32 %v5168_v60, %v1323_v35 }
 0x16a   :  { %v3488_v8 = vadd.s32 4294967294, %v292_v3  ;;  %v1331_v57 = vor.u32 4788187, %v1330_v58  ;;  %v1129_v33 = vsel %vm1046_vm12, %v1128_v49, %v1127_v9  ;;  %v1231_v51 = vmul.f32 %v1230_v0, %v1228_v38 }
 0x16b   :  { %v1436_v53 = vand.u32 2147483647, %v1435_v47  ;;  %v1438_v29 = vcvt.s32.f32 %v1431_v31  ;;  %4304 = vsinq.f32 %v416_v22  ;;  %v414_v43 = vsub.s32 4, %v4991_v12  ;;  %v144_v31 = vld [vmem:[#allocation2 + $0x10] sm:$0xff]  ;;  %v145_v47 = vld [vmem:[#allocation2 + $0x18] sm:$0xff] }
 0x16c   :  { %vm3489_vm11 = vcmp.lt.s32.totalorder %v3488_v8, 0  ;;  %4306 = vcosq.f32 %v416_v22  ;;  %vm5219_vm13 = vcmp.le.f32.partialorder %v1044_v26, 0.7853982  ;;  %v1332_v60 = vand.u32 2147483647, %v1331_v57 }
 0x16d   :  { %v295_v5 = vsel %vm3489_vm11, 0, %v3488_v8  ;;  %v1132_v28 = vsel %vm5219_vm13, %v4768_v14, %v1129_v33  ;;  %v1232_v50 = vxor.u32 2147483648, %v1231_v51  ;;  %v1439_v23 = vmul.f32 %v1438_v29, %v1436_v53 }
 0x16e   :  { %v296_v10 = vsub.s32 32, %v295_v5  ;;  %v300_v24 = vsub.s32 4294967266, %v295_v5  ;;  %v297_v15 = vshll.u32 %v288_v1, %v295_v5  ;;  %v1327_v1 = vor.u32 %v1326_v45, %v1325_v18 }
 0x16f   :  { %v310_v3 = vsub.s32 4, %v5187_v32  ;;  %v415_v26 = vsel %vm330_vm10, %v414_v43, %v4991_v12  ;;  %vm226_vm14 = vcmp.lt.s32.totalorder %v4817_v4, 0  ;;  %4308 = vsinq.f32 %v1132_v28 }
 0x170   :  { %v298_v46 = vshrl.u32 %v280_v7, %v296_v10  ;;  %v301_v59 = vadd.s32 127, %v300_v24  ;;  %v1334_v17 = vcvt.s32.f32 %v1327_v1  ;;  %vm1150_vm15 = vcmp.lt.s32.totalorder %v4772_v19, 0 }
 0x171   :  { %4310 = vcosq.f32 %v1132_v28  ;;  %v1233_v11 = vsel %vm1150_vm15, %v1232_v50, %v1231_v51  ;;  %v1440_v20 = vxor.u32 2147483648, %v1439_v23  ;;  %v417_v8 = vsel %vm5198_vm9, 0, %v415_v26 }
 0x172   :  { %v299_v63 = vor.u32 %v298_v46, %v297_v15  ;;  %v302_v41 = vshll.u32 %v301_v59, 23  ;;  %v1335_v9 = vmul.f32 %v1334_v17, %v1332_v60  ;;  %vm225_vm0 = vcmp.le.f32.partialorder %v224_v34, 0.7853982 }
 0x173   :  { %v311_v12 = vsel %vm226_vm14, %v310_v3, %v5187_v32  ;;  %v5695_v39 = vand.u32 2147483647, %v4772_v19  ;;  %v1234_v6 = vsub.s32 4, %v5038_v25  ;;  %vm1358_vm2 = vcmp.lt.s32.totalorder %v4869_v54, 0 }
 0x174   :  { %v303_v16 = vor.u32 4788187, %v302_v41  ;;  %v306_v42 = vcvt.s32.f32 %v299_v63  ;;  %v1336_v49 = vxor.u32 2147483648, %v1335_v9  ;;  %v421_v32 = vadd.s32 3, %v417_v8 }
 0x175   :  { %vm5241_vm1 = vcmp.le.f32.partialorder %v5695_v39, 0.7853982  ;;  %v5248_v48 = vpop.eup %4304  ;;  %v1441_v44 = vsel %vm1358_vm2, %v1440_v20, %v1439_v23  ;;  %v313_v5 = vsel %vm225_vm0, 0, %v311_v12  ;;  %v1130_v58 = vsub.s32 4, %v4955_v40 }
 0x176   :  { %v304_v35 = vand.u32 2147483647, %v303_v16  ;;  %v1236_v34 = vsel %vm5241_vm1, %v4772_v19, %v1233_v11  ;;  %v5253_v21 = vpop.eup %4306  ;;  %v5698_v7 = vand.u32 2147483647, %v4869_v54  ;;  %v628_v24 = vand.u32 3, %v417_v8 }
 0x177   :  { %v5267_v38 = vsel %vm1150_vm15, %v1234_v6, %v5038_v25  ;;  %vm1254_vm4 = vcmp.lt.s32.totalorder %v4977_v56, 0  ;;  %v425_v0 = vxor.u32 2147483648, %v5248_v48  ;;  %v317_v46 = vadd.s32 3, %v313_v5 }
 0x178   :  { %v307_v36 = vmul.f32 %v306_v42, %v304_v35  ;;  %vm5260_vm3 = vcmp.le.f32.partialorder %v5698_v7, 0.7853982  ;;  %v1337_v15 = vsel %vm1254_vm4, %v1336_v49, %v1335_v9  ;;  %v428_v59 = vxor.u32 2147483648, %v5253_v21  ;;  %v172_v49 = vld [vmem:[%s5667_s6 + $0x20] sm:$0xff] }
 0x179   :  { %v1444_v45 = vsel %vm5260_vm3, %v4869_v54, %v1441_v44  ;;  %v5701_v25 = vand.u32 2147483647, %v4977_v56  ;;  %v5283_v18 = vand.u32 3, %v421_v32  ;;  %v1131_v57 = vsel %vm1046_vm12, %v1130_v58, %v4955_v40  ;;  %v5288_v63 = vpop.eup %4308 }
 0x17a   :  { %v308_v13 = vxor.u32 2147483648, %v307_v36  ;;  %vm638_vm6 = vcmask 261120   ;;  %vm420_vm7 = vweird.f32 %v4779_v30  ;;  %vm630_vm8 = vcmp.eq.s32.totalorder %v628_v24, 0 }
 0x17b   :  { %vm5279_vm5 = vcmp.le.f32.partialorder %v5701_v25, 0.7853982  ;;  %v5291_v41 = vpack.c.bf16 %v145_v47, %v144_v31  ;;  %v5293_v33 = vpop.eup %4310  ;;  %vm316_vm9 = vweird.f32 %v4817_v4  ;;  %v632_v53 = vsel %vm630_vm8, %v5253_v21, %v425_v0  ;;  %v174_v31 = vld [vmem:[%s5667_s6 + $0x30] sm:$0xff] }
 0x17c   :  { %v309_v55 = vsel %vm226_vm14, %v308_v13, %v307_v36  ;;  %v1340_v51 = vsel %vm5279_vm5, %v4977_v56, %v1337_v15  ;;  %vm633_vm10 = vcmp.eq.s32.totalorder %v628_v24, 2  ;;  %v318_v40 = vand.u32 3, %v317_v46  ;;  %v168_v46 = vld [vmem:[%s5667_s6] sm:$0xff] }
 0x17d   :  { %v312_v61 = vsel %vm225_vm0, %v4817_v4, %v309_v55  ;;  %v525_v29 = vand.u32 3, %v313_v5  ;;  %v635_v1 = vsel %vm633_vm10, %v428_v59, %v5248_v48  ;;  %v5303_v16 = vsel %vm5219_vm13, 0, %v1131_v57 }
 0x17e   :  { %4312 = vcosq.f32 %v312_v61  ;;  %vm424_vm11 = vcmp.eq.s32.totalorder %v5283_v18, 0  ;;  %vm629_vm12 = vcmp.lt.s32.totalorder %v628_v24, 2  ;;  %v1141_v43 = vxor.u32 2147483648, %v5288_v63 }
 0x17f   :  { %4314 = vsinq.f32 %v312_v61  ;;  %v426_v35 = vsel %vm424_vm11, %v5253_v21, %v425_v0  ;;  %vm427_vm14 = vcmp.eq.s32.totalorder %v5283_v18, 2  ;;  %v1144_v42 = vxor.u32 2147483648, %v5293_v33 }
 0x180   :  { %4316 = vcosq.f32 %v1236_v34  ;;  %v636_v52 = vsel %vm629_vm12, %v632_v53, %v635_v1  ;;  %v1553_v23 = vand.u32 3, %v5303_v16  ;;  %vm323_vm13 = vcmp.eq.s32.totalorder %v318_v40, 2 }
 0x181   :  { %4318 = vsinq.f32 %v1236_v34  ;;  %vm527_vm15 = vcmp.eq.s32.totalorder %v525_v29, 0  ;;  %vm530_vm0 = vcmp.eq.s32.totalorder %v525_v29, 2  ;;  %vm320_vm8 = vcmp.eq.s32.totalorder %v318_v40, 0 }
 0x182   :  { %4320 = vcosq.f32 %v1444_v45  ;;  %v1338_v9 = vsub.s32 4, %v5151_v62  ;;  %vm319_vm10 = vcmp.lt.s32.totalorder %v318_v40, 2  ;;  %vm526_vm11 = vcmp.lt.s32.totalorder %v525_v29, 2 }
 0x183   :  { %4322 = vsinq.f32 %v1444_v45  ;;  %v429_v12 = vsel %vm427_vm14, %v428_v59, %v5248_v48  ;;  %v637_v39 = vsel %vm420_vm7, nan, %v636_v52  ;;  %vm1555_vm12 = vcmp.eq.s32.totalorder %v1553_v23, 0  ;;  %v173_v48 = vld [vmem:[%s5667_s6 + $0x28] sm:$0xff] }
 0x184   :  { %4324 = vcosq.f32 %v1340_v51  ;;  %v1442_v61 = vsub.s32 4, %v5069_v27  ;;  %v1557_v32 = vsel %vm1555_vm12, %v5293_v33, %v1141_v43  ;;  %v1339_v44 = vsel %vm1254_vm4, %v1338_v9, %v5151_v62  ;;  %v169_v59 = vld [vmem:[%s5667_s6 + $0x8] sm:$0xff]  ;;  %v171_v9 = vld [vmem:[%s5667_s6 + $0x18] sm:$0xff] }
 0x185   :  { %4326 = vsinq.f32 %v1340_v51  ;;  %vm423_vm14 = vcmp.lt.s32.totalorder %v5283_v18, 2  ;;  %v1237_v58 = vsel %vm5241_vm1, 0, %v5267_v38  ;;  %v3878_v4 = vpack.c.bf16 %v173_v48, %v172_v49 }
 0x186   :  { %v430_v24 = vsel %vm423_vm14, %v426_v35, %v429_v12  ;;  %v1443_v38 = vsel %vm1358_vm2, %v1442_v61, %v5069_v27  ;;  %vm1136_vm1 = vweird.f32 %v4768_v14  ;;  %v1241_v45 = vadd.s32 3, %v1237_v58 }
 0x187   :  { %v1656_v15 = vand.u32 3, %v1237_v58  ;;  %v431_v25 = vsel %vm420_vm7, nan, %v430_v24  ;;  %v1137_v18 = vadd.s32 3, %v5303_v16  ;;  %v3882_v51 = vpack.c.bf16 %v175_v2, %v174_v31  ;;  %v152_v2 = vld [vmem:[#allocation5 + $0x8] sm:$0xff] }
 0x188   :  { %v4313_v60 = vpop.eup %4312  ;;  %v1445_v40 = vsel %vm5260_vm3, 0, %v1443_v38  ;;  %vm1240_vm2 = vweird.f32 %v4772_v19  ;;  %v3886_v30 = vpack.c.bf16 %v169_v59, %v168_v46  ;;  %v154_v38 = vld [vmem:[#allocation5 + $0x18] sm:$0xff]  ;;  %v156_v46 = vld [vmem:[#allocation5 + $0x28] sm:$0xff] }
 0x189   :  { %v4315_v28 = vpop.eup %4314  ;;  %v324_v50 = vxor.u32 2147483648, %v4313_v60  ;;  %vm1658_vm4 = vcmp.eq.s32.totalorder %v1656_v15, 0  ;;  %v1862_v10 = vand.u32 3, %v1445_v40 }
 0x18a   :  { %v321_v17 = vxor.u32 2147483648, %v4315_v28  ;;  %v5311_v36 = vpop.eup %4316 }
 0x18b   :  { %v325_v3 = vsel %vm323_vm13, %v324_v50, %v4315_v28  ;;  %v532_v26 = vsel %vm530_vm0, %v324_v50, %v4315_v28  ;;  %v5314_v20 = vpop.eup %4318  ;;  %vm1558_vm13 = vcmp.eq.s32.totalorder %v1553_v23, 2  ;;  %v1248_v27 = vxor.u32 2147483648, %v5311_v36 }
 0x18c   :  { %v322_v13 = vsel %vm320_vm8, %v4313_v60, %v321_v17  ;;  %v529_v11 = vsel %vm527_vm15, %v4313_v60, %v321_v17  ;;  %v5324_v34 = vpop.eup %4320  ;;  %v1560_v21 = vsel %vm1558_vm13, %v1144_v42, %v5288_v63  ;;  %vm1554_vm15 = vcmp.lt.s32.totalorder %v1553_v23, 2 }
 0x18d   :  { %v326_v8 = vsel %vm319_vm10, %v322_v13, %v325_v3  ;;  %v533_v55 = vsel %vm526_vm11, %v529_v11, %v532_v26  ;;  %v5349_v7 = vpop.eup %4322  ;;  %v1561_v0 = vsel %vm1554_vm15, %v1557_v32, %v1560_v21  ;;  %v1245_v22 = vxor.u32 2147483648, %v5314_v20  ;;  %v170_v26 = vld [vmem:[%s5667_s6 + $0x10] sm:$0xff] }
 0x18e   :  { %v534_v6 = vsel %vm316_vm9, nan, %v533_v55  ;;  %v327_v5 = vsel %vm316_vm9, nan, %v326_v8  ;;  %v5353_v62 = vpop.eup %4324  ;;  %v1562_v57 = vsel %vm1136_vm1, nan, %v1561_v0  ;;  %v1242_v60 = vand.u32 3, %v1241_v45  ;;  %v155_v45 = vld [vmem:[#allocation5 + $0x20] sm:$0xff] }
 0x18f   :  { %3682 = vmatprep.mubr.msk.f32.mxu0 %vm638_vm6, %v534_v6  ;;  %v5367_v47 = vpop.eup %4326  ;;  %v1352_v1 = vxor.u32 2147483648, %v5353_v62  ;;  %v1660_v16 = vsel %vm1658_vm4, %v5311_v36, %v1245_v22  ;;  %v1138_v28 = vand.u32 3, %v1137_v18  ;;  %v1453_v50 = vxor.u32 2147483648, %v5349_v7 }
 0x190   :  { %3683 = vmatmul.mubr.msk.f32.vlgmr.msra.gmra.mrb[0].mxu0 %vm638_vm6, %v637_v39  ;;  %v1349_v29 = vxor.u32 2147483648, %v5367_v47  ;;  %v1456_v52 = vxor.u32 2147483648, %v5324_v34  ;;  %vm1657_vm9 = vcmp.lt.s32.totalorder %v1656_v15, 2  ;;  %vm1344_vm0 = vweird.f32 %v4977_v56  ;;  %v185_v56 = vld [vmem:[#allocation7 + $0x40] sm:$0xff] }
 0x191   :  { %3849 = vmatpush3.bf16.msra.mxu0 %v5164_v37  ;;  %3693 = vmatprep.mubr.msk.f32.mxu0 %vm638_vm6, %v327_v5  ;;  %v1341_v37 = vsel %vm5279_vm5, 0, %v1339_v44  ;;  %vm1661_vm5 = vcmp.eq.s32.totalorder %v1656_v15, 2  ;;  %vm1244_vm8 = vcmp.eq.s32.totalorder %v1242_v60, 0  ;;  %vm1864_vm11 = vcmp.eq.s32.totalorder %v1862_v10, 0  ;;  %v186_v15 = vld [vmem:[#allocation7 + $0x48] sm:$0xff] }
 0x192   :  { %3851 = vmatprep.subr.bf16.mxu0 %v5291_v41  ;;  %v1759_v53 = vand.u32 3, %v1341_v37  ;;  %v1663_v35 = vsel %vm1661_vm5, %v1248_v27, %v5314_v20  ;;  %vm1867_vm12 = vcmp.eq.s32.totalorder %v1862_v10, 2  ;;  %vm1140_vm13 = vcmp.eq.s32.totalorder %v1138_v28, 0 }
 0x193   :  { %v1664_v3 = vsel %vm1657_vm9, %v1660_v16, %v1663_v35  ;;  %v1449_v11 = vadd.s32 3, %v1445_v40  ;;  %v1866_v55 = vsel %vm1864_vm11, %v5324_v34, %v1453_v50  ;;  %v1869_v12 = vsel %vm1867_vm12, %v1456_v52, %v5349_v7  ;;  %v158_v40 = vld [vmem:[#allocation5 + $0x38] sm:$0xff] }
 0x194   :  { %vm1761_vm3 = vcmp.eq.s32.totalorder %v1759_v53, 0  ;;  %vm1764_vm7 = vcmp.eq.s32.totalorder %v1759_v53, 2  ;;  %vm1760_vm10 = vcmp.lt.s32.totalorder %v1759_v53, 2  ;;  %vm1143_vm14 = vcmp.eq.s32.totalorder %v1138_v28, 2  ;;  %v157_v53 = vld [vmem:[#allocation5 + $0x30] sm:$0xff] }
 0x195   :  { %3853 = vmatpush3.bf16.msra.mxu0 %v5291_v41  ;;  %v1345_v41 = vadd.s32 3, %v1341_v37  ;;  %v1763_v23 = vsel %vm1761_vm3, %v5353_v62, %v1349_v29  ;;  %v1766_v17 = vsel %vm1764_vm7, %v1352_v1, %v5367_v47  ;;  %vm1247_vm15 = vcmp.eq.s32.totalorder %v1242_v60, 2  ;;  %v3506_v16 = vld [vmem:[%s5664_s3] ss:$0 sm:$0xff] }
 0x196   :  { %3879 = vmatprep.subr.bf16.mxu0 %v3878_v4  ;;  %v1767_v8 = vsel %vm1760_vm10, %v1763_v23, %v1766_v17  ;;  %v3890_v39 = vpack.c.bf16 %v171_v9, %v170_v26  ;;  %v1142_v6 = vsel %vm1140_vm13, %v5293_v33, %v1141_v43  ;;  %v1145_v61 = vsel %vm1143_vm14, %v1144_v42, %v5288_v63 }
 0x197   :  { %v1346_v13 = vand.u32 3, %v1345_v41  ;;  %v1246_v49 = vsel %vm1244_vm8, %v5311_v36, %v1245_v22  ;;  %v1249_v48 = vsel %vm1247_vm15, %v1248_v27, %v5314_v20  ;;  %v1665_v32 = vsel %vm1240_vm2, nan, %v1664_v3  ;;  %v188_v22 = vld [vmem:[#allocation7 + $0x58] sm:$0xff] }
 0x198   :  { %3694 = vmatmul.mubr.msk.f32.vlgmr.msra.gmra.mrb[0].mxu0 %vm638_vm6, %v431_v25  ;;  %vm1863_vm4 = vcmp.lt.s32.totalorder %v1862_v10, 2  ;;  %v1768_v21 = vsel %vm1344_vm0, nan, %v1767_v8  ;;  %vm1139_vm5 = vcmp.lt.s32.totalorder %v1138_v28, 2  ;;  %v1450_v43 = vand.u32 3, %v1449_v11  ;;  %v187_v25 = vld [vmem:[#allocation7 + $0x50] sm:$0xff] }
 0x199   :  { %3881 = vmatpush3.bf16.msra.mxu0 %v3878_v4  ;;  %3742 = vmatprep.mubr.msk.f32.mxu0 %vm638_vm6, %v1562_v57  ;;  %v1870_v44 = vsel %vm1863_vm4, %v1866_v55, %v1869_v12  ;;  %v1146_v63 = vsel %vm1139_vm5, %v1142_v6, %v1145_v61  ;;  %vm1348_vm3 = vcmp.eq.s32.totalorder %v1346_v13, 0  ;;  %vm1351_vm7 = vcmp.eq.s32.totalorder %v1346_v13, 2  ;;  %v189_v57 = vld [vmem:[#allocation7 + $0x60] sm:$0xff]  ;;  %v3550_v8 = vld [vmem:[%s5668_s7] ss:$0 sm:$0xff] }
 0x19a   :  { %3883 = vmatprep.subr.bf16.mxu0 %v3882_v51  ;;  %vm1243_vm9 = vcmp.lt.s32.totalorder %v1242_v60, 2  ;;  %vm1448_vm8 = vweird.f32 %v4869_v54  ;;  %v1350_v33 = vsel %vm1348_vm3, %v5353_v62, %v1349_v29  ;;  %v1353_v42 = vsel %vm1351_vm7, %v1352_v1, %v5367_v47  ;;  %v191_v1 = vld [vmem:[#allocation7 + $0x70] sm:$0xff]  ;;  %v192_v60 = vld [vmem:[#allocation7 + $0x78] sm:$0xff] }
 0x19b   :  { %v1250_v36 = vsel %vm1243_vm9, %v1246_v49, %v1249_v48  ;;  %v1871_v20 = vsel %vm1448_vm8, nan, %v1870_v44  ;;  %v1147_v5 = vsel %vm1136_vm1, nan, %v1146_v63  ;;  %vm1347_vm10 = vcmp.lt.s32.totalorder %v1346_v13, 2 }
 0x19c   :  { %vm1452_vm11 = vcmp.eq.s32.totalorder %v1450_v43, 0  ;;  %vm1455_vm12 = vcmp.eq.s32.totalorder %v1450_v43, 2  ;;  %v1354_v58 = vsel %vm1347_vm10, %v1350_v33, %v1353_v42  ;;  %v1251_v4 = vsel %vm1240_vm2, nan, %v1250_v36 }
 0x19d   :  { %3885 = vmatpush3.bf16.msra.mxu0 %v3882_v51  ;;  %v1454_v24 = vsel %vm1452_vm11, %v5324_v34, %v1453_v50  ;;  %v1457_v62 = vsel %vm1455_vm12, %v1456_v52, %v5349_v7  ;;  %vm1451_vm13 = vcmp.lt.s32.totalorder %v1450_v43, 2  ;;  %v1355_v14 = vsel %vm1344_vm0, nan, %v1354_v58  ;;  %v151_v34 = vld [vmem:[#allocation5] sm:$0xff]  ;;  %v153_v7 = vld [vmem:[#allocation5 + $0x10] sm:$0xff]  ;;  %v190_v51 = vld [vmem:[#allocation7 + $0x68] sm:$0xff] }
 0x19e   :  { %3887 = vmatprep.subr.bf16.mxu0 %v3886_v30  ;;  %v1458_v0 = vsel %vm1451_vm13, %v1454_v24, %v1457_v62  ;;  %v4559_v37 = vmov 0.0|0.0   ;;  %v3855_v19 = vpack.c.bf16 %v152_v2, %v151_v34  ;;  %vm4560_vm1 = vmmov 0  }
 0x19f   :  { %v1459_v31 = vsel %vm1448_vm8, nan, %v1458_v0  ;;  %3854 = vmatprep.subr.bf16.mxu1 %v4559_v37  ;;  %v4561_v47 = vmov 0.0   ;;  %v3858_v54 = vpack.c.bf16 %v154_v38, %v153_v7  ;;  %v3907_v59 = vpack.c.bf16 %v186_v15, %v185_v56 }
 0x1a0   :  { %3743 = vmatmul.mubr.msk.f32.vlgmr.msra.gmra.mrb[2].mxu0 %vm638_vm6, %v1665_v32  ;;  %3712 = vmatprep.mubr.msk.f32.mxu1 %vm4560_vm1, %v4561_v47  ;;  %v3910_v27 = vpack.c.bf16 %v188_v22, %v187_v25  ;;  %v3861_v18 = vpack.c.bf16 %v156_v46, %v155_v45  ;;  %v3864_v29 = vpack.c.bf16 %v158_v40, %v157_v53  ;;  %vm861_vm2 = vcmask 523264  }
 0x1a1   :  { %3745 = vmatprep.mubr.msk.f32.mxu0 %vm638_vm6, %v1768_v21  ;;  %3889 = vmatpush3.bf16.msra.mxu0 %v3886_v30  ;;  %v3913_v30 = vpack.c.bf16 %v190_v51, %v189_v57  ;;  %v3916_v41 = vpack.c.bf16 %v192_v60, %v191_v1 }
 0x1a2   :  { %3891 = vmatprep.subr.bf16.mxu0 %v3890_v39  ;;  %3856 = vmatpush3.bf16.msra.mxu1 %v3855_v19 }
 0x1a3   :  { %3857 = vmatprep.subr.bf16.mxu1 %v4559_v37 }
 0x1a4   :  { %3746 = vmatmul.mubr.msk.f32.gmra.mrb[4].mxu0 %vm638_vm6, %v1871_v20 }
 0x1a5   :  { %3893 = vmatpush3.bf16.msra.mxu0 %v3890_v39  ;;  %3756 = vmatprep.mubr.msk.f32.mxu0 %vm638_vm6, %v1147_v5 }
 0x1a6   :  { %3906 = vmatprep.subr.bf16.mxu0 %v4559_v37  ;;  %3859 = vmatpush3.bf16.msra.mxu1 %v3858_v54 }
 0x1a7   :  { %3860 = vmatprep.subr.bf16.mxu1 %v4559_v37 }
 0x1a8   :  { %3757 = vmatmul.mubr.msk.f32.vlgmr.msra.gmra.mrb[2].mxu0 %vm638_vm6, %v1251_v4 }
 0x1a9   :  { %3759 = vmatprep.mubr.msk.f32.mxu0 %vm638_vm6, %v1355_v14  ;;  %3908 = vmatpush3.bf16.msra.mxu0 %v3907_v59 }
 0x1aa   :  { %3909 = vmatprep.subr.bf16.mxu0 %v4559_v37  ;;  %3862 = vmatpush3.bf16.msra.mxu1 %v3861_v18 }
 0x1ab   :  { %3863 = vmatprep.subr.bf16.mxu1 %v4559_v37 }
 0x1ac   :  { %3760 = vmatmul.mubr.msk.f32.gmra.mrb[4].mxu0 %vm638_vm6, %v1459_v31 }
 0x1ad   :  { %3797 = vmatprep.mubr.msk.f32.mxu0 %vm4560_vm1, %v4561_v47  ;;  %3911 = vmatpush3.bf16.msra.mxu0 %v3910_v27 }
 0x1ae   :  { %3912 = vmatprep.subr.bf16.mxu0 %v4559_v37  ;;  %3865 = vmatpush3.bf16.msra.mxu1 %v3864_v29 }
 0x1af   :  { %3866 = vmatprep.subr.bf16.mxu1 %v4559_v37 }
 0x1b1   :  { %3914 = vmatpush3.bf16.msra.mxu0 %v3913_v30 }
 0x1b2   :  { %3915 = vmatprep.subr.bf16.mxu0 %v4559_v37 }
 0x1b5   :  { %3917 = vmatpush3.bf16.msra.mxu0 %v3916_v41 }
 0x1b6   :  { %3918 = vmatprep.subr.bf16.mxu0 %v4559_v37 }
 0x26b   :  { %v3695_v35 = vpop.f32.mrb[0].mxu0 }
 0x26c   :  { %v5458_v10 = vadd.f32 %v3695_v35, %v3506_v16  ;;  %v792_v28 = vpop.f32.mrb[1].mxu0 }
 0x26d   :  { %v5460_v50 = vadd.f32 %v3506_v16, %v792_v28 }
 0x26e   :  { %v5463_v52 = vmul.f32 0.70710677, %v5458_v10 }
 0x26f   :  { %v5466_v23 = vmul.f32 0.70710677, %v5460_v50 }
 0x270   :  { %v814_v17 = vand.u32 2147483647, %v5463_v52  ;;  %vm852_vm0 = vcmp.lt.f32.partialorder %v5463_v52, 0.0 }
 0x271   :  { %v813_v3 = vand.u32 2147483647, %v5466_v23  ;;  %vm851_vm6 = vcmp.lt.f32.partialorder %v5466_v23, 0.0 }
 0x272   :  { %v816_v26 = vmul.f32 0.3275911, %v814_v17  ;;  %v840_v58 = vsub.f32 0.0, %v814_v17 }
 0x273   :  { %v815_v9 = vmul.f32 0.3275911, %v813_v3  ;;  %v839_v6 = vsub.f32 0.0, %v813_v3 }
 0x274   :  { %v818_v13 = vadd.f32 1.0, %v816_v26  ;;  %v842_v56 = vmul.f32 %v840_v58, %v814_v17 }
 0x275   :  { %v817_v11 = vadd.f32 1.0, %v815_v9  ;;  %v841_v36 = vmul.f32 %v839_v6, %v813_v3 }
 0x276   :  { %4328 = vrcp.f32 %v818_v13  ;;  %v845_v27 = vmul.f32 1.442695, %v842_v56  ;;  %v159_v56 = vld [vmem:[#allocation5 + $0x40] sm:$0xff] }
 0x277   :  { %4330 = vrcp.f32 %v817_v11  ;;  %v843_v7 = vmul.f32 1.442695, %v841_v36 }
 0x27b   :  { %v3758_v55 = vpop.f32.mrb[2].mxu0 }
 0x27c   :  { %v5473_v12 = vadd.f32 %v3758_v55, %v3550_v8  ;;  %v2047_v39 = vpop.f32.mrb[3].mxu0 }
 0x27d   :  { %v5475_v61 = vadd.f32 %v3550_v8, %v2047_v39 }
 0x27e   :  { %v5478_v49 = vmul.f32 0.70710677, %v5473_v12 }
 0x27f   :  { %v5481_v48 = vmul.f32 0.70710677, %v5475_v61  ;;  %v3761_v32 = vpop.f32.mrb[4].mxu0 }
 0x280   :  { %v4329_v21 = vpop.eup %4328  ;;  %v2085_v44 = vand.u32 2147483647, %v5478_v49  ;;  %v5484_v43 = vadd.f32 %v3761_v32, %v3550_v8  ;;  %v2057_v63 = vpop.f32.mrb[5].mxu0  ;;  %vm2161_vm14 = vcmp.lt.f32.partialorder %v5478_v49, 0.0 }
 0x281   :  { %v4331_v33 = vpop.eup %4330  ;;  %v822_v42 = vmul.f32 1.0614054, %v4329_v21  ;;  %v2084_v20 = vand.u32 2147483647, %v5481_v48  ;;  %v5487_v5 = vadd.f32 %v3550_v8, %v2057_v63  ;;  %vm2160_vm4 = vcmp.lt.f32.partialorder %v5481_v48, 0.0  ;;  %v202_v48 = vld [vmem:[#allocation7 + $0xc8] sm:$0xff] }
 0x282   :  { %v821_v24 = vmul.f32 1.0614054, %v4331_v33  ;;  %v2089_v62 = vmul.f32 0.3275911, %v2085_v44  ;;  %v5490_v34 = vmul.f32 0.70710677, %v5484_v43 }
 0x283   :  { %v824_v4 = vadd.f32 -1.4531521, %v822_v42  ;;  %v2088_v14 = vmul.f32 0.3275911, %v2084_v20  ;;  %v5493_v38 = vmul.f32 0.70710677, %v5487_v5 }
 0x284   :  { %v823_v0 = vadd.f32 -1.4531521, %v821_v24  ;;  %v2093_v31 = vadd.f32 1.0, %v2089_v62  ;;  %v5496_v45 = vand.u32 2147483647, %v5490_v34  ;;  %v2137_v30 = vsub.f32 0.0, %v2085_v44 }
 0x285   :  { %v826_v2 = vmul.f32 %v4329_v21, %v824_v4  ;;  %v2092_v19 = vadd.f32 1.0, %v2088_v14  ;;  %v2086_v22 = vand.u32 2147483647, %v5493_v38  ;;  %v2136_v8 = vsub.f32 0.0, %v2084_v20 }
 0x286   :  { %v825_v54 = vmul.f32 %v4331_v33, %v823_v0  ;;  %4332 = vrcp.f32 %v2093_v31  ;;  %v2091_v59 = vmul.f32 0.3275911, %v5496_v45  ;;  %v2141_v35 = vmul.f32 %v2137_v30, %v2085_v44 }
 0x287   :  { %v828_v15 = vadd.f32 1.4214138, %v826_v2  ;;  %4334 = vrcp.f32 %v2092_v19  ;;  %v2090_v53 = vmul.f32 0.3275911, %v2086_v22  ;;  %v2138_v63 = vsub.f32 0.0, %v2086_v22 }
 0x288   :  { %v827_v46 = vadd.f32 1.4214138, %v825_v54  ;;  %4336 = vpow2.f32 %v843_v7  ;;  %v2095_v57 = vadd.f32 1.0, %v2091_v59  ;;  %v2146_v39 = vmul.f32 1.442695, %v2141_v35 }
 0x289   :  { %v830_v25 = vmul.f32 %v4329_v21, %v828_v15  ;;  %v2094_v29 = vadd.f32 1.0, %v2090_v53  ;;  %v2140_v62 = vmul.f32 %v2136_v8, %v2084_v20  ;;  %v2142_v19 = vmul.f32 %v2138_v63, %v2086_v22 }
 0x28a   :  { %v829_v18 = vmul.f32 %v4331_v33, %v827_v46  ;;  %4338 = vrcp.f32 %v2095_v57  ;;  %v809_v59 = vmul.f32 0.5, %v5460_v50  ;;  %vm2162_vm15 = vcmp.lt.f32.partialorder %v5493_v38, 0.0 }
 0x28b   :  { %v832_v51 = vadd.f32 -0.28449672, %v830_v25  ;;  %4340 = vpow2.f32 %v845_v27  ;;  %v2148_v30 = vmul.f32 1.442695, %v2142_v19  ;;  %v193_v19 = vld [vmem:[#allocation7 + $0x80] sm:$0xff]  ;;  %vm2163_vm5 = vcmp.lt.f32.partialorder %v5490_v34, 0.0 }
 0x28c   :  { %v831_v40 = vadd.f32 -0.28449672, %v829_v18  ;;  %4342 = vrcp.f32 %v2094_v29  ;;  %v2144_v18 = vmul.f32 1.442695, %v2140_v62  ;;  %v161_v29 = vld [vmem:[#allocation5 + $0x50] sm:$0xff]  ;;  %v166_v62 = vld [vmem:[#allocation5 + $0x78] sm:$0xff] }
 0x28d   :  { %v834_v1 = vmul.f32 %v4329_v21, %v832_v51  ;;  %4344 = vpow2.f32 %v2146_v39 }
 0x28e   :  { %v833_v60 = vmul.f32 %v4331_v33, %v831_v40  ;;  %4346 = vpow2.f32 %v2144_v18 }
 0x28f   :  { %v836_v3 = vadd.f32 0.2548296, %v834_v1  ;;  %v162_v1 = vld [vmem:[#allocation5 + $0x58] sm:$0xff]  ;;  %4348 = vpow2.f32 %v2148_v30 }
 0x290   :  { %v4333_v41 = vpop.eup %4332  ;;  %v835_v16 = vadd.f32 0.2548296, %v833_v60 }
 0x291   :  { %v5500_v28 = vpop.eup %4334  ;;  %v2101_v17 = vmul.f32 1.0614054, %v4333_v41  ;;  %v838_v36 = vmul.f32 %v4329_v21, %v836_v3  ;;  %v160_v21 = vld [vmem:[#allocation5 + $0x48] sm:$0xff]  ;;  %v3870_v3 = vpack.c.bf16 %v162_v1, %v161_v29  ;;  %v179_v1 = vld [vmem:[#allocation7 + $0x10] sm:$0xff] }
 0x292   :  { %v837_v26 = vmul.f32 %v4331_v33, %v835_v16  ;;  %v2100_v9 = vmul.f32 1.0614054, %v5500_v28  ;;  %v4337_v13 = vpop.eup %4336  ;;  %v3867_v23 = vpack.c.bf16 %v160_v21, %v159_v56  ;;  %v194_v56 = vld [vmem:[#allocation7 + $0x88] sm:$0xff] }
 0x293   :  { %v2105_v11 = vadd.f32 -1.4531521, %v2101_v17 }
 0x294   :  { %v847_v55 = vmul.f32 %v4337_v13, %v837_v26  ;;  %v2104_v6 = vadd.f32 -1.4531521, %v2100_v9  ;;  %v5503_v42 = vpop.eup %4338  ;;  %v163_v13 = vld [vmem:[#allocation5 + $0x60] sm:$0xff] }
 0x295   :  { %v2109_v32 = vmul.f32 %v4333_v41, %v2105_v11  ;;  %v2103_v33 = vmul.f32 1.0614054, %v5503_v42  ;;  %v4341_v4 = vpop.eup %4340  ;;  %v164_v11 = vld [vmem:[#allocation5 + $0x68] sm:$0xff] }
 0x296   :  { %v849_v58 = vsub.f32 1.0, %v847_v55  ;;  %v2108_v44 = vmul.f32 %v5500_v28, %v2104_v6  ;;  %v5507_v31 = vpop.eup %4342  ;;  %v848_v54 = vmul.f32 %v4341_v4, %v838_v36  ;;  %v2139_v6 = vsub.f32 0.0, %v5496_v45 }
 0x297   :  { %v2113_v24 = vadd.f32 1.4214138, %v2109_v32  ;;  %v2107_v7 = vadd.f32 -1.4531521, %v2103_v33  ;;  %v2102_v20 = vmul.f32 1.0614054, %v5507_v31  ;;  %v4345_v8 = vpop.eup %4344 }
 0x298   :  { %v853_v14 = vsub.f32 0.0, %v849_v58  ;;  %v2112_v0 = vadd.f32 1.4214138, %v2108_v44  ;;  %v850_v60 = vsub.f32 1.0, %v848_v54  ;;  %v4347_v21 = vpop.eup %4346 }
 0x299   :  { %v2117_v2 = vmul.f32 %v4333_v41, %v2113_v24  ;;  %v2106_v51 = vadd.f32 -1.4531521, %v2102_v20  ;;  %v2111_v22 = vmul.f32 %v5503_v42, %v2107_v7  ;;  %v165_v24 = vld [vmem:[#allocation5 + $0x70] sm:$0xff]  ;;  %v4349_v18 = vpop.eup %4348 }
 0x29a   :  { %v855_v15 = vsel %vm851_vm6, %v853_v14, %v849_v58  ;;  %v2116_v46 = vmul.f32 %v5500_v28, %v2112_v0  ;;  %v854_v55 = vsub.f32 0.0, %v850_v60  ;;  %v3873_v58 = vpack.c.bf16 %v164_v11, %v163_v13  ;;  %v182_v13 = vld [vmem:[#allocation7 + $0x28] sm:$0xff] }
 0x29b   :  { %v857_v25 = vadd.f32 1.0, %v855_v15  ;;  %v2121_v27 = vadd.f32 -0.28449672, %v2117_v2  ;;  %v2110_v35 = vmul.f32 %v5507_v31, %v2106_v51  ;;  %v2115_v9 = vadd.f32 1.4214138, %v2111_v22  ;;  %v196_v22 = vld [vmem:[#allocation7 + $0x98] sm:$0xff] }
 0x29c   :  { %v2120_v57 = vadd.f32 -0.28449672, %v2116_v46  ;;  %v856_v33 = vsel %vm852_vm0, %v854_v55, %v850_v60  ;;  %v2143_v14 = vmul.f32 %v2139_v6, %v5496_v45  ;;  %v3876_v52 = vpack.c.bf16 %v166_v62, %v165_v24  ;;  %v178_v45 = vld [vmem:[#allocation7 + $0x8] sm:$0xff]  ;;  %v180_v60 = vld [vmem:[#allocation7 + $0x18] sm:$0xff] }
 0x29d   :  { %v859_v53 = vmul.f32 %v857_v25, %v809_v59  ;;  %v2125_v40 = vmul.f32 %v4333_v41, %v2121_v27  ;;  %v2114_v17 = vadd.f32 1.4214138, %v2110_v35  ;;  %v2119_v44 = vmul.f32 %v5503_v42, %v2115_v9  ;;  %v181_v9 = vld [vmem:[#allocation7 + $0x20] sm:$0xff]  ;;  %v200_v6 = vld [vmem:[#allocation7 + $0xb8] sm:$0xff]  ;;  %v2551_v24 = vld [vmem:[#allocation8 + $0x228] sm:$0xff] }
 0x29e   :  { %v2124_v16 = vmul.f32 %v5500_v28, %v2120_v57  ;;  %v858_v54 = vadd.f32 1.0, %v856_v33  ;;  %v2077_v15 = vmul.f32 0.5, %v5473_v12  ;;  %v2150_v27 = vmul.f32 1.442695, %v2143_v14  ;;  %v195_v12 = vld [vmem:[#allocation7 + $0x90] sm:$0xff]  ;;  %v201_v14 = vld [vmem:[#allocation7 + $0xc0] sm:$0xff] }
 0x29f   :  { %v2129_v50 = vadd.f32 0.2548296, %v2125_v40  ;;  %3713 = vmatmul.mubr.msk.f32.vlgmr.msra.gmra.mrb[0].mxu1 %vm861_vm2, %v859_v53  ;;  %v2118_v32 = vmul.f32 %v5507_v31, %v2114_v17  ;;  %v2123_v20 = vadd.f32 -0.28449672, %v2119_v44  ;;  %v810_v57 = vmul.f32 0.5, %v5458_v10  ;;  %v198_v17 = vld [vmem:[#allocation7 + $0xa8] sm:$0xff] }
 0x2a0   :  { %3868 = vmatpush3.bf16.msra.mxu1 %v3867_v23  ;;  %3731 = vmatprep.mubr.msk.f32.mxu1 %vm4560_vm1, %v4561_v47  ;;  %v2128_v39 = vadd.f32 0.2548296, %v2124_v16  ;;  %v3919_v51 = vpack.c.bf16 %v194_v56, %v193_v19  ;;  %4350 = vpow2.f32 %v2150_v27  ;;  %v3922_v10 = vpack.c.bf16 %v196_v22, %v195_v12  ;;  %v2547_v44 = vld [vmem:[#allocation8 + $0x208] sm:$0xff]  ;;  %v2550_v19 = vld [vmem:[#allocation8 + $0x220] sm:$0xff] }
 0x2a1   :  { %v2133_v26 = vmul.f32 %v4333_v41, %v2129_v50  ;;  %3869 = vmatprep.subr.bf16.mxu1 %v4559_v37  ;;  %v2122_v36 = vadd.f32 -0.28449672, %v2118_v32  ;;  %v860_v30 = vmul.f32 %v858_v54, %v810_v57  ;;  %v2127_v29 = vmul.f32 %v5503_v42, %v2123_v20  ;;  %v197_v50 = vld [vmem:[#allocation7 + $0xa0] sm:$0xff]  ;;  %v2555_v54 = vld [vmem:[#allocation8 + $0x248] sm:$0xff]  ;;  %v203_v20 = vld [vmem:[#allocation7 + $0xd0] sm:$0xff] }
 0x2a2   :  { %v2132_v4 = vmul.f32 %v5500_v28, %v2128_v39  ;;  %v177_v28 = vld [vmem:[#allocation7] sm:$0xff]  ;;  %v3898_v35 = vpack.c.bf16 %v180_v60, %v179_v1  ;;  %v3901_v55 = vpack.c.bf16 %v182_v13, %v181_v9  ;;  %v199_v39 = vld [vmem:[#allocation7 + $0xb0] sm:$0xff]  ;;  %v2076_v56 = vmul.f32 0.5, %v5475_v61  ;;  %v2567_v57 = vld [vmem:[#allocation8 + $0x2a8] sm:$0xff] }
 0x2a3   :  { %v2153_v63 = vmul.f32 %v4345_v8, %v2133_v26  ;;  %v2126_v0 = vmul.f32 %v5507_v31, %v2122_v36  ;;  %v3895_v40 = vpack.c.bf16 %v178_v45, %v177_v28  ;;  %v3925_v8 = vpack.c.bf16 %v198_v17, %v197_v50  ;;  %v183_v36 = vld [vmem:[#allocation7 + $0x30] sm:$0xff]  ;;  %v204_v28 = vld [vmem:[#allocation7 + $0xd8] sm:$0xff]  ;;  %v2554_v27 = vld [vmem:[#allocation8 + $0x240] sm:$0xff] }
 0x2a4   :  { %3871 = vmatpush3.bf16.msra.mxu1 %v3870_v3  ;;  %v2152_v25 = vmul.f32 %v4347_v21, %v2132_v4  ;;  %v2131_v3 = vadd.f32 0.2548296, %v2127_v29  ;;  %v3928_v38 = vpack.c.bf16 %v200_v6, %v199_v39  ;;  %v3931_v21 = vpack.c.bf16 %v202_v48, %v201_v14  ;;  %v2562_v22 = vld [vmem:[#allocation8 + $0x280] sm:$0xff]  ;;  %v2571_v1 = vld [vmem:[#allocation8 + $0x2c8] sm:$0xff] }
 0x2a5   :  { %v2157_v41 = vsub.f32 1.0, %v2153_v63  ;;  %3872 = vmatprep.subr.bf16.mxu1 %v4559_v37  ;;  %v2130_v7 = vadd.f32 0.2548296, %v2126_v0  ;;  %v3934_v61 = vpack.c.bf16 %v204_v28, %v203_v20  ;;  %v2575_v60 = vld [vmem:[#allocation8 + $0x2e8] sm:$0xff]  ;;  %v2570_v17 = vld [vmem:[#allocation8 + $0x2c0] sm:$0xff]  ;;  %v3026_v28 = vld [vmem:[#allocation10 + $0x10] sm:$0xff] }
 0x2a6   :  { %v2156_v16 = vsub.f32 1.0, %v2152_v25  ;;  %v2135_v32 = vmul.f32 %v5503_v42, %v2131_v3  ;;  %v3954_v50 = vpack.c.bf16 %v2575_v60, %v2571_v1  ;;  %v2574_v3 = vld [vmem:[#allocation8 + $0x2e0] sm:$0xff]  ;;  %v2579_v9 = vld [vmem:[#allocation8 + $0x308] sm:$0xff]  ;;  %v2561_v1 = vld [vmem:[#allocation8 + $0x278] sm:$0xff] }
 0x2a7   :  { %v2165_v2 = vsub.f32 0.0, %v2157_v41  ;;  %v2134_v49 = vmul.f32 %v5507_v31, %v2130_v7  ;;  %v2078_v7 = vmul.f32 0.5, %v5487_v5  ;;  %v2583_v13 = vld [vmem:[#allocation8 + $0x328] sm:$0xff]  ;;  %v3956_v34 = vpack.c.bf16 %v2574_v3, %v2570_v17  ;;  %v2578_v39 = vld [vmem:[#allocation8 + $0x300] sm:$0xff]  ;;  %v2560_v17 = vld [vmem:[#allocation8 + $0x270] sm:$0xff] }
 0x2a8   :  { %3874 = vmatpush3.bf16.msra.mxu1 %v3873_v58  ;;  %v2164_v11 = vsub.f32 0.0, %v2156_v16  ;;  %v184_v58 = vld [vmem:[#allocation7 + $0x38] sm:$0xff]  ;;  %v2582_v6 = vld [vmem:[#allocation8 + $0x320] sm:$0xff]  ;;  %v2603_v14 = vld [vmem:[#allocation8 + $0x3c8] sm:$0xff] }
 0x2a9   :  { %v2169_v46 = vsel %vm2161_vm14, %v2165_v2, %v2157_v41  ;;  %3875 = vmatprep.subr.bf16.mxu1 %v4559_v37  ;;  %v2154_v53 = vmul.f32 %v4349_v18, %v2134_v49  ;;  %v3904_v4 = vpack.c.bf16 %v184_v58, %v183_v36  ;;  %v3942_v2 = vpack.c.bf16 %v2551_v24, %v2547_v44  ;;  %v2558_v49 = vld [vmem:[#allocation8 + $0x260] sm:$0xff]  ;;  %v2563_v18 = vld [vmem:[#allocation8 + $0x288] sm:$0xff]  ;;  %v2565_v3 = vld [vmem:[#allocation8 + $0x298] sm:$0xff] }
 0x2aa   :  { %v2173_v59 = vadd.f32 1.0, %v2169_v46  ;;  %v2168_v41 = vsel %vm2160_vm4, %v2164_v11, %v2156_v16  ;;  %v4351_v62 = vpop.eup %4350  ;;  %v3950_v12 = vpack.c.bf16 %v2567_v57, %v2563_v18  ;;  %v207_v16 = vld [vmem:[#allocation7 + $0xf0] sm:$0xff]  ;;  %v3960_v58 = vpack.c.bf16 %v2582_v6, %v2578_v39  ;;  %v2586_v44 = vld [vmem:[#allocation8 + $0x340] sm:$0xff]  ;;  %v2595_v24 = vld [vmem:[#allocation8 + $0x388] sm:$0xff] }
 0x2ab   :  { %v2158_v31 = vsub.f32 1.0, %v2154_v53  ;;  %v2172_v0 = vadd.f32 1.0, %v2168_v41  ;;  %v2155_v42 = vmul.f32 %v4351_v62, %v2135_v32  ;;  %v2587_v32 = vld [vmem:[#allocation8 + $0x348] sm:$0xff]  ;;  %v3035_v18 = vld [vmem:[#allocation10 + $0x58] sm:$0xff] }
 0x2ac   :  { %v2177_v23 = vmul.f32 %v2173_v59, %v2077_v15  ;;  %3877 = vmatpush3.bf16.msra.mxu1 %v3876_v52  ;;  %v2546_v52 = vld [vmem:[#allocation8 + $0x200] sm:$0xff]  ;;  %v2559_v15 = vld [vmem:[#allocation8 + $0x268] sm:$0xff] }
 0x2ad   :  { %3894 = vmatprep.subr.bf16.mxu1 %v4559_v37  ;;  %v2166_v26 = vsub.f32 0.0, %v2158_v31  ;;  %v2176_v45 = vmul.f32 %v2172_v0, %v2076_v56  ;;  %v2159_v59 = vsub.f32 1.0, %v2155_v42  ;;  %v3944_v25 = vpack.c.bf16 %v2550_v19, %v2546_v52  ;;  %v2607_v48 = vld [vmem:[#allocation8 + $0x3e8] sm:$0xff]  ;;  %v2549_v19 = vld [vmem:[#allocation8 + $0x218] sm:$0xff] }
 0x2ae   :  { %3798 = vmatmul.mubr.msk.f32.vlgmr.msra.gmra.mrb[6].mxu0 %vm861_vm2, %v2177_v23  ;;  %v3946_v5 = vpack.c.bf16 %v2559_v15, %v2555_v54  ;;  %v206_v23 = vld [vmem:[#allocation7 + $0xe8] sm:$0xff]  ;;  %v3970_v42 = vpack.c.bf16 %v2607_v48, %v2603_v14  ;;  %v2553_v56 = vld [vmem:[#allocation8 + $0x238] sm:$0xff]  ;;  %v2588_v48 = vld [vmem:[#allocation8 + $0x350] sm:$0xff] }
 0x2af   :  { %3920 = vmatpush3.bf16.msra.mxu0 %v3919_v51  ;;  %3732 = vmatmul.mubr.msk.f32.vlgmr.msra.gmra.mrb[0].mxu1 %vm861_vm2, %v860_v30  ;;  %v2170_v63 = vsel %vm2162_vm15, %v2166_v26, %v2158_v31  ;;  %v205_v51 = vld [vmem:[#allocation7 + $0xe0] sm:$0xff]  ;;  %v2167_v53 = vsub.f32 0.0, %v2159_v59  ;;  %v208_v31 = vld [vmem:[#allocation7 + $0xf8] sm:$0xff]  ;;  %v3025_v54 = vld [vmem:[#allocation10 + $0x8] sm:$0xff] }
 0x2b0   :  { %3896 = vmatpush3.bf16.msra.mxu1 %v3895_v40  ;;  %3921 = vmatprep.subr.bf16.mxu0 %v4559_v37  ;;  %v2174_v33 = vadd.f32 1.0, %v2170_v63  ;;  %v3948_v40 = vpack.c.bf16 %v2558_v49, %v2554_v27  ;;  %v2566_v30 = vld [vmem:[#allocation8 + $0x2a0] sm:$0xff]  ;;  %v3937_v29 = vpack.c.bf16 %v206_v23, %v205_v51  ;;  %v3940_v26 = vpack.c.bf16 %v208_v31, %v207_v16  ;;  %v2591_v63 = vld [vmem:[#allocation8 + $0x368] sm:$0xff]  ;;  %v3027_v15 = vld [vmem:[#allocation10 + $0x18] sm:$0xff] }
 0x2b1   :  { %3897 = vmatprep.subr.bf16.mxu1 %v4559_v37  ;;  %3816 = vmatprep.mubr.msk.f32.mxu0 %vm4560_vm1, %v4561_v47  ;;  %v3962_v41 = vpack.c.bf16 %v2591_v63, %v2587_v32  ;;  %v4070_v20 = vpack.c.bf16 %v3027_v15, %v3025_v54  ;;  %v3028_v27 = vld [vmem:[#allocation10 + $0x20] sm:$0xff]  ;;  %v3030_v49 = vld [vmem:[#allocation10 + $0x30] sm:$0xff]  ;;  %v2609_v54 = vld [vmem:[#allocation8 + $0x3f8] sm:$0xff] }
 0x2b2   :  { %3778 = vmatprep.mubr.msk.f32.mxu1 %vm4560_vm1, %v4561_v47  ;;  %v2178_v46 = vmul.f32 %v2174_v33, %v2078_v7  ;;  %v2594_v33 = vld [vmem:[#allocation8 + $0x380] sm:$0xff]  ;;  %v4076_v57 = vpack.c.bf16 %v3030_v49, %v3028_v27  ;;  %v2572_v32 = vld [vmem:[#allocation8 + $0x2d0] sm:$0xff] }
 0x2b3   :  { %3923 = vmatpush3.bf16.msra.mxu0 %v3922_v10  ;;  %v2171_v10 = vsel %vm2163_vm5, %v2167_v53, %v2159_v59  ;;  %v2606_v7 = vld [vmem:[#allocation8 + $0x3e0] sm:$0xff]  ;;  %v3031_v59 = vld [vmem:[#allocation10 + $0x38] sm:$0xff]  ;;  %v3034_v53 = vld [vmem:[#allocation10 + $0x50] sm:$0xff] }
 0x2b4   :  { %3899 = vmatpush3.bf16.msra.mxu1 %v3898_v35  ;;  %3924 = vmatprep.subr.bf16.mxu0 %v4559_v37  ;;  %v3952_v35 = vpack.c.bf16 %v2566_v30, %v2562_v22  ;;  %v2175_v11 = vadd.f32 1.0, %v2171_v10  ;;  %v3032_v23 = vld [vmem:[#allocation10 + $0x40] sm:$0xff]  ;;  %v2552_v22 = vld [vmem:[#allocation8 + $0x230] sm:$0xff]  ;;  %v3508_v30 = vld [vmem:[%s5666_s5] ss:$0 sm:$0xff] }
 0x2b5   :  { %3900 = vmatprep.subr.bf16.mxu1 %v4559_v37  ;;  %v2576_v63 = vld [vmem:[#allocation8 + $0x2f0] sm:$0xff]  ;;  %v2482_v49 = vld [vmem:[#allocation8] sm:$0xff] }
 0x2b7   :  { %3926 = vmatpush3.bf16.msra.mxu0 %v3925_v8  ;;  %v2079_v8 = vmul.f32 0.5, %v5484_v43 }
 0x2b8   :  { %3902 = vmatpush3.bf16.msra.mxu1 %v3901_v55  ;;  %3927 = vmatprep.subr.bf16.mxu0 %v4559_v37  ;;  %v3958_v55 = vpack.c.bf16 %v2583_v13, %v2579_v9 }
 0x2b9   :  { %3903 = vmatprep.subr.bf16.mxu1 %v4559_v37  ;;  %v2179_v36 = vmul.f32 %v2175_v11, %v2079_v8  ;;  %v2564_v11 = vld [vmem:[#allocation8 + $0x290] sm:$0xff]  ;;  %v2573_v8 = vld [vmem:[#allocation8 + $0x2d8] sm:$0xff] }
 0x2bb   :  { %3929 = vmatpush3.bf16.msra.mxu0 %v3928_v38  ;;  %v2599_v38 = vld [vmem:[#allocation8 + $0x3a8] sm:$0xff] }
 0x2bc   :  { %3905 = vmatpush3.bf16.msra.mxu1 %v3904_v4  ;;  %3930 = vmatprep.subr.bf16.mxu0 %v4559_v37  ;;  %v3966_v62 = vpack.c.bf16 %v2599_v38, %v2595_v24  ;;  %v2598_v4 = vld [vmem:[#allocation8 + $0x3a0] sm:$0xff]  ;;  %v2584_v24 = vld [vmem:[#allocation8 + $0x330] sm:$0xff]  ;;  %v2589_v38 = vld [vmem:[#allocation8 + $0x358] sm:$0xff] }
 0x2bd   :  { %3943 = vmatprep.subr.bf16.mxu1 %v3942_v2  ;;  %v3968_v0 = vpack.c.bf16 %v2598_v4, %v2594_v33  ;;  %v2602_v2 = vld [vmem:[#allocation8 + $0x3c0] sm:$0xff] }
 0x2be   :  { %3817 = vmatmul.mubr.msk.f32.vlgmr.msra.gmra.mrb[6].mxu0 %vm861_vm2, %v2178_v46  ;;  %v3972_v52 = vpack.c.bf16 %v2606_v7, %v2602_v2  ;;  %v3024_v46 = vld [vmem:[#allocation10] sm:$0xff]  ;;  %v2601_v2 = vld [vmem:[#allocation8 + $0x3b8] sm:$0xff] }
 0x2bf   :  { %3932 = vmatpush3.bf16.msra.mxu0 %v3931_v21  ;;  %3779 = vmatmul.mubr.msk.f32.vlgmr.msra.gmra.mrb[2].mxu1 %vm861_vm2, %v2176_v45  ;;  %v3974_v21 = vpack.c.bf16 %v2553_v56, %v2549_v19  ;;  %v3029_v45 = vld [vmem:[#allocation10 + $0x28] sm:$0xff]  ;;  %v2596_v19 = vld [vmem:[#allocation8 + $0x390] sm:$0xff] }
 0x2c0   :  { %3933 = vmatprep.subr.bf16.mxu0 %v4559_v37  ;;  %3835 = vmatprep.mubr.msk.f32.mxu0 %vm4560_vm1, %v4561_v47  ;;  %v2600_v56 = vld [vmem:[#allocation8 + $0x3b0] sm:$0xff] }
 0x2c1   :  { %3945 = vmatpush1.bf16.msra.mxu1 %v3944_v25  ;;  %2674 = vmatprep.mubr.f32.mxu1 %v4561_v47  ;;  %v4072_v25 = vpack.c.bf16 %v3026_v28, %v3024_v46  ;;  %v4000_v15 = vpack.c.bf16 %v2600_v56, %v2596_v19  ;;  %v2608_v28 = vld [vmem:[#allocation8 + $0x3f0] sm:$0xff] }
 0x2c2   :  { %3947 = vmatprep.subr.bf16.mxu1 %v3946_v5  ;;  %v4074_v5 = vpack.c.bf16 %v3031_v59, %v3029_v45  ;;  %v2483_v45 = vld [vmem:[#allocation8 + $0x8] sm:$0xff] }
 0x2c3   :  { %3935 = vmatpush3.bf16.msra.mxu0 %v3934_v61  ;;  %v3033_v61 = vld [vmem:[#allocation10 + $0x48] sm:$0xff] }
 0x2c4   :  { %3936 = vmatprep.subr.bf16.mxu0 %v4559_v37  ;;  %v4078_v51 = vpack.c.bf16 %v3035_v18, %v3033_v61  ;;  %v2487_v59 = vld [vmem:[#allocation8 + $0x28] sm:$0xff]  ;;  %v2486_v61 = vld [vmem:[#allocation8 + $0x20] sm:$0xff] }
 0x2c5   :  { %3949 = vmatpush1.bf16.msra.mxu1 %v3948_v40  ;;  %v4080_v40 = vpack.c.bf16 %v3034_v53, %v3032_v23  ;;  %v4006_v27 = vpack.c.bf16 %v2487_v59, %v2483_v45  ;;  %v2492_v45 = vld [vmem:[#allocation8 + $0x50] sm:$0xff] }
 0x2c6   :  { %3951 = vmatprep.subr.bf16.mxu1 %v3950_v12  ;;  %v2548_v12 = vld [vmem:[#allocation8 + $0x210] sm:$0xff] }
 0x2c7   :  { %3938 = vmatpush3.bf16.msra.mxu0 %v3937_v29  ;;  %v2557_v29 = vld [vmem:[#allocation8 + $0x258] sm:$0xff]  ;;  %v3976_v16 = vpack.c.bf16 %v2552_v22, %v2548_v12  ;;  %v4008_v12 = vpack.c.bf16 %v2486_v61, %v2482_v49  ;;  %v2496_v59 = vld [vmem:[#allocation8 + $0x70] sm:$0xff] }
 0x2c8   :  { %3939 = vmatprep.subr.bf16.mxu0 %v4559_v37  ;;  %v2590_v37 = vld [vmem:[#allocation8 + $0x360] sm:$0xff]  ;;  %v2500_v61 = vld [vmem:[#allocation8 + $0x90] sm:$0xff] }
 0x2c9   :  { %3953 = vmatpush1.bf16.msra.mxu1 %v3952_v35  ;;  %v3964_v43 = vpack.c.bf16 %v2590_v37, %v2586_v44  ;;  %v3978_v35 = vpack.c.bf16 %v2561_v1, %v2557_v29  ;;  %v2580_v37 = vld [vmem:[#allocation8 + $0x310] sm:$0xff]  ;;  %v2494_v29 = vld [vmem:[#allocation8 + $0x60] sm:$0xff]  ;;  %v2499_v1 = vld [vmem:[#allocation8 + $0x88] sm:$0xff] }
 0x2ca   :  { %3955 = vmatprep.subr.bf16.mxu1 %v3954_v50  ;;  %v2556_v50 = vld [vmem:[#allocation8 + $0x250] sm:$0xff]  ;;  %v3992_v33 = vpack.c.bf16 %v2584_v24, %v2580_v37  ;;  %v2531_v37 = vld [vmem:[#allocation8 + $0x188] sm:$0xff] }
 0x2cb   :  { %3941 = vmatpush3.bf16.msra.mxu0 %v3940_v26  ;;  %v2569_v26 = vld [vmem:[#allocation8 + $0x2b8] sm:$0xff]  ;;  %v3980_v9 = vpack.c.bf16 %v2560_v17, %v2556_v50  ;;  %v2502_v50 = vld [vmem:[#allocation8 + $0xa0] sm:$0xff]  ;;  %v2507_v17 = vld [vmem:[#allocation8 + $0xc8] sm:$0xff] }
 0x2cc   :  { %4071 = vmatprep.subr.bf16.mxu0 %v4070_v20  ;;  %v3982_v13 = vpack.c.bf16 %v2569_v26, %v2565_v3  ;;  %v2604_v20 = vld [vmem:[#allocation8 + $0x3d0] sm:$0xff]  ;;  %v2511_v3 = vld [vmem:[#allocation8 + $0xe8] sm:$0xff] }
 0x2cd   :  { %3957 = vmatpush1.bf16.msra.mxu1 %v3956_v34  ;;  %v2568_v34 = vld [vmem:[#allocation8 + $0x2b0] sm:$0xff]  ;;  %v2535_v24 = vld [vmem:[#allocation8 + $0x1a8] sm:$0xff] }
 0x2ce   :  { %3836 = vmatmul.mubr.msk.f32.vlgmr.msra.gmra.mrb[6].mxu0 %vm861_vm2, %v2179_v36  ;;  %3959 = vmatprep.subr.bf16.mxu1 %v3958_v55  ;;  %v2577_v55 = vld [vmem:[#allocation8 + $0x2f8] sm:$0xff]  ;;  %v3984_v39 = vpack.c.bf16 %v2568_v34, %v2564_v11  ;;  %v2510_v11 = vld [vmem:[#allocation8 + $0xe0] sm:$0xff]  ;;  %v2515_v34 = vld [vmem:[#allocation8 + $0x108] sm:$0xff] }
 0x2cf   :  { %4073 = vmatpush1.bf16.msra.mxu0 %v4072_v25  ;;  %v3986_v6 = vpack.c.bf16 %v2577_v55, %v2573_v8  ;;  %v2581_v36 = vld [vmem:[#allocation8 + $0x318] sm:$0xff]  ;;  %v2519_v8 = vld [vmem:[#allocation8 + $0x128] sm:$0xff] }
 0x2d0   :  { %4075 = vmatprep.subr.bf16.mxu0 %v4074_v5  ;;  %v3552_v25 = vld [vmem:[%s5670_s9] ss:$0 sm:$0xff]  ;;  %v4004_v5 = vpack.c.bf16 %v2608_v28, %v2604_v20  ;;  %v4022_v55 = vpack.c.bf16 %v2519_v8, %v2515_v34  ;;  %v2532_v8 = vld [vmem:[#allocation8 + $0x190] sm:$0xff] }
 0x2d1   :  { %3961 = vmatpush1.bf16.msra.mxu1 %v3960_v58  ;;  %v2585_v58 = vld [vmem:[#allocation8 + $0x338] sm:$0xff] }
 0x2d2   :  { %3963 = vmatprep.subr.bf16.mxu1 %v3962_v41  ;;  %v3988_v41 = vpack.c.bf16 %v2576_v63, %v2572_v32  ;;  %v3990_v44 = vpack.c.bf16 %v2585_v58, %v2581_v36  ;;  %v2523_v32 = vld [vmem:[#allocation8 + $0x148] sm:$0xff] }
 0x2d3   :  { %4077 = vmatpush1.bf16.msra.mxu0 %v4076_v57  ;;  %v2491_v57 = vld [vmem:[#allocation8 + $0x48] sm:$0xff] }
 0x2d4   :  { %4079 = vmatprep.subr.bf16.mxu0 %v4078_v51  ;;  %v2495_v51 = vld [vmem:[#allocation8 + $0x68] sm:$0xff] }
 0x2d5   :  { %3965 = vmatpush1.bf16.msra.mxu1 %v3964_v43  ;;  %v2593_v43 = vld [vmem:[#allocation8 + $0x378] sm:$0xff]  ;;  %v4010_v22 = vpack.c.bf16 %v2495_v51, %v2491_v57  ;;  %v2527_v63 = vld [vmem:[#allocation8 + $0x168] sm:$0xff] }
 0x2d6   :  { %3967 = vmatprep.subr.bf16.mxu1 %v3966_v62  ;;  %v3994_v14 = vpack.c.bf16 %v2593_v43, %v2589_v38  ;;  %v4026_v58 = vpack.c.bf16 %v2527_v63, %v2523_v32  ;;  %v4030_v43 = vpack.c.bf16 %v2535_v24, %v2531_v37  ;;  %v2509_v57 = vld [vmem:[#allocation8 + $0xd8] sm:$0xff]  ;;  %v2540_v63 = vld [vmem:[#allocation8 + $0x1d0] sm:$0xff]  ;;  %v3036_v24 = vld [vmem:[#allocation10 + $0x60] sm:$0xff] }
 0x2d7   :  { %4081 = vmatpush1.bf16.msra.mxu0 %v4080_v40  ;;  %v2513_v51 = vld [vmem:[#allocation8 + $0xf8] sm:$0xff] }
 0x2d9   :  { %3969 = vmatpush1.bf16.msra.mxu1 %v3968_v0  ;;  %v2592_v0 = vld [vmem:[#allocation8 + $0x370] sm:$0xff] }
 0x2da   :  { %3971 = vmatprep.subr.bf16.mxu1 %v3970_v42  ;;  %v2597_v42 = vld [vmem:[#allocation8 + $0x398] sm:$0xff]  ;;  %v3996_v7 = vpack.c.bf16 %v2592_v0, %v2588_v48 }
 0x2dd   :  { %3973 = vmatpush1.bf16.msra.mxu1 %v3972_v52  ;;  %v3998_v52 = vpack.c.bf16 %v2601_v2, %v2597_v42  ;;  %v2538_v42 = vld [vmem:[#allocation8 + $0x1c0] sm:$0xff] }
 0x2de   :  { %3975 = vmatprep.subr.bf16.mxu1 %v3974_v21  ;;  %v2605_v21 = vld [vmem:[#allocation8 + $0x3d8] sm:$0xff]  ;;  %v2542_v2 = vld [vmem:[#allocation8 + $0x1e0] sm:$0xff] }
 0x2df   :  { %v4002_v46 = vpack.c.bf16 %v2609_v54, %v2605_v21  ;;  %v4036_v19 = vpack.c.bf16 %v2542_v2, %v2538_v42  ;;  %v2484_v21 = vld [vmem:[#allocation8 + $0x10] sm:$0xff]  ;;  %v3045_v42 = vld [vmem:[#allocation10 + $0xa8] sm:$0xff]  ;;  %v3047_v2 = vld [vmem:[#allocation10 + $0xb8] sm:$0xff] }
 0x2e0   :  { %v2488_v54 = vld [vmem:[#allocation8 + $0x30] sm:$0xff] }
 0x2e1   :  { %v4040_v20 = vpack.c.bf16 %v2488_v54, %v2484_v21  ;;  %v3051_v21 = vld [vmem:[#allocation10 + $0xd8] sm:$0xff] }
 0x382   :  { %v1011_v60 = vpop.f32.mrb[0].mxu1 }
 0x383   :  { %v5567_v31 = vadd.f32 %v3508_v30, %v1011_v60  ;;  %v3733_v10 = vpop.f32.mrb[1].mxu1  ;;  %v2490_v30 = vld [vmem:[#allocation8 + $0x40] sm:$0xff]  ;;  %v2503_v60 = vld [vmem:[#allocation8 + $0xa8] sm:$0xff] }
 0x384   :  { %v4014_v10 = vpack.c.bf16 %v2503_v60, %v2499_v1 }
 0x385   :  { %2675 = vmatmul.mubr.f32.vlgmr.msra.gmra.mrb[4].mxu1 %v5567_v31 }
 0x386   :  { %3977 = vmatpush1.bf16.msra.mxu1 %v3976_v16  ;;  %2745 = vmatprep.mubr.f32.mxu1 %v4561_v47  ;;  %v4012_v16 = vpack.c.bf16 %v2494_v29, %v2490_v30  ;;  %v2517_v30 = vld [vmem:[#allocation8 + $0x118] sm:$0xff] }
 0x387   :  { %3979 = vmatprep.subr.bf16.mxu1 %v3978_v35  ;;  %v2498_v35 = vld [vmem:[#allocation8 + $0x80] sm:$0xff]  ;;  %v2521_v29 = vld [vmem:[#allocation8 + $0x138] sm:$0xff] }
 0x388   :  { %v4016_v26 = vpack.c.bf16 %v2502_v50, %v2498_v35  ;;  %v4054_v60 = vpack.c.bf16 %v2521_v29, %v2517_v30  ;;  %v2529_v35 = vld [vmem:[#allocation8 + $0x178] sm:$0xff]  ;;  %v3060_v30 = vld [vmem:[#allocation10 + $0x120] sm:$0xff]  ;;  %v3062_v29 = vld [vmem:[#allocation10 + $0x130] sm:$0xff] }
 0x38a   :  { %3981 = vmatpush1.bf16.msra.mxu1 %v3980_v9  ;;  %v4018_v9 = vpack.c.bf16 %v2511_v3, %v2507_v17  ;;  %v2524_v3 = vld [vmem:[#allocation8 + $0x150] sm:$0xff] }
 0x38b   :  { %3983 = vmatprep.subr.bf16.mxu1 %v3982_v13  ;;  %v2506_v13 = vld [vmem:[#allocation8 + $0xc0] sm:$0xff] }
 0x38e   :  { %3985 = vmatpush1.bf16.msra.mxu1 %v3984_v39  ;;  %v2514_v39 = vld [vmem:[#allocation8 + $0x100] sm:$0xff] }
 0x38f   :  { %3987 = vmatprep.subr.bf16.mxu1 %v3986_v6  ;;  %v2518_v6 = vld [vmem:[#allocation8 + $0x120] sm:$0xff] }
 0x390   :  { %v4024_v36 = vpack.c.bf16 %v2518_v6, %v2514_v39  ;;  %v2545_v39 = vld [vmem:[#allocation8 + $0x1f8] sm:$0xff] }
 0x392   :  { %3989 = vmatpush1.bf16.msra.mxu1 %v3988_v41  ;;  %v2249_v62 = vpop.f32.mrb[2].mxu1  ;;  %v2522_v41 = vld [vmem:[#allocation8 + $0x140] sm:$0xff] }
 0x393   :  { %v3780_v4 = vpop.f32.mrb[3].mxu1  ;;  %3991 = vmatprep.subr.bf16.mxu1 %v3990_v44  ;;  %v2259_v18 = vadd.f32 %v3552_v25, %v2249_v62  ;;  %v2526_v44 = vld [vmem:[#allocation8 + $0x160] sm:$0xff]  ;;  %v2501_v25 = vld [vmem:[#allocation8 + $0x98] sm:$0xff] }
 0x394   :  { %v4028_v38 = vpack.c.bf16 %v2526_v44, %v2522_v41  ;;  %v2530_v62 = vld [vmem:[#allocation8 + $0x180] sm:$0xff]  ;;  %v2539_v4 = vld [vmem:[#allocation8 + $0x1c8] sm:$0xff]  ;;  %v3039_v44 = vld [vmem:[#allocation10 + $0x78] sm:$0xff] }
 0x395   :  { %v3037_v41 = vld [vmem:[#allocation10 + $0x68] sm:$0xff] }
 0x396   :  { %3993 = vmatpush1.bf16.msra.mxu1 %v3992_v33  ;;  %v2534_v33 = vld [vmem:[#allocation8 + $0x1a0] sm:$0xff]  ;;  %v4082_v37 = vpack.c.bf16 %v3039_v44, %v3037_v41  ;;  %v3078_v41 = vld [vmem:[#allocation10 + $0x1b0] sm:$0xff] }
 0x397   :  { %3995 = vmatprep.subr.bf16.mxu1 %v3994_v14  ;;  %v2543_v14 = vld [vmem:[#allocation8 + $0x1e8] sm:$0xff]  ;;  %v4032_v48 = vpack.c.bf16 %v2534_v33, %v2530_v62  ;;  %v3043_v33 = vld [vmem:[#allocation10 + $0x98] sm:$0xff] }
 0x398   :  { %v4034_v0 = vpack.c.bf16 %v2543_v14, %v2539_v4  ;;  %4083 = vmatprep.subr.bf16.mxu0 %v4082_v37  ;;  %v3041_v62 = vld [vmem:[#allocation10 + $0x88] sm:$0xff]  ;;  %v3040_v14 = vld [vmem:[#allocation10 + $0x80] sm:$0xff] }
 0x399   :  { %v4086_v4 = vpack.c.bf16 %v3043_v33, %v3041_v62  ;;  %v3081_v37 = vld [vmem:[#allocation10 + $0x1c8] sm:$0xff]  ;;  %v3082_v62 = vld [vmem:[#allocation10 + $0x1d0] sm:$0xff] }
 0x39a   :  { %3997 = vmatpush1.bf16.msra.mxu1 %v3996_v7  ;;  %v2485_v7 = vld [vmem:[#allocation8 + $0x18] sm:$0xff]  ;;  %v3085_v33 = vld [vmem:[#allocation10 + $0x1e8] sm:$0xff] }
 0x39b   :  { %3999 = vmatprep.subr.bf16.mxu1 %v3998_v52  ;;  %v2489_v52 = vld [vmem:[#allocation8 + $0x38] sm:$0xff] }
 0x39c   :  { %v4038_v56 = vpack.c.bf16 %v2489_v52, %v2485_v7  ;;  %v4090_v7 = vpack.c.bf16 %v3047_v2, %v3045_v42  ;;  %v3046_v52 = vld [vmem:[#allocation10 + $0xb0] sm:$0xff]  ;;  %v3089_v2 = vld [vmem:[#allocation10 + $0x208] sm:$0xff] }
 0x39e   :  { %4001 = vmatpush1.bf16.msra.mxu1 %v4000_v15  ;;  %v2493_v15 = vld [vmem:[#allocation8 + $0x58] sm:$0xff] }
 0x39f   :  { %4003 = vmatprep.subr.bf16.mxu1 %v4002_v46  ;;  %v2497_v46 = vld [vmem:[#allocation8 + $0x78] sm:$0xff] }
 0x3a0   :  { %v4042_v28 = vpack.c.bf16 %v2497_v46, %v2493_v15  ;;  %v3048_v15 = vld [vmem:[#allocation10 + $0xc0] sm:$0xff]  ;;  %v3050_v46 = vld [vmem:[#allocation10 + $0xd0] sm:$0xff] }
 0x3a1   :  { %v2477_v23 = vpop.f32.mrb[6].mxu0 }
 0x3a2   :  { %v5574_v53 = vadd.f32 %v2477_v23, %v2259_v18  ;;  %v3837_v40 = vpop.f32.mrb[7].mxu0  ;;  %4005 = vmatpush1.bf16.msra.mxu1 %v4004_v5  ;;  %v2505_v5 = vld [vmem:[#allocation8 + $0xb8] sm:$0xff]  ;;  %v2504_v18 = vld [vmem:[#allocation8 + $0xb0] sm:$0xff] }
 0x3a3   :  { %4007 = vmatprep.subr.bf16.mxu1 %v4006_v27  ;;  %v4044_v27 = vpack.c.bf16 %v2496_v59, %v2492_v45  ;;  %v4046_v49 = vpack.c.bf16 %v2505_v5, %v2501_v25  ;;  %v4048_v23 = vpack.c.bf16 %v2504_v18, %v2500_v61  ;;  %v4050_v40 = vpack.c.bf16 %v2513_v51, %v2509_v57  ;;  %v3055_v45 = vld [vmem:[#allocation10 + $0xf8] sm:$0xff]  ;;  %v3052_v59 = vld [vmem:[#allocation10 + $0xe0] sm:$0xff]  ;;  %v3054_v25 = vld [vmem:[#allocation10 + $0xf0] sm:$0xff] }
 0x3a4   :  { %v4100_v61 = vpack.c.bf16 %v3054_v25, %v3052_v59  ;;  %v3056_v57 = vld [vmem:[#allocation10 + $0x100] sm:$0xff]  ;;  %v3058_v51 = vld [vmem:[#allocation10 + $0x110] sm:$0xff] }
 0x3a5   :  { %2746 = vmatmul.mubr.f32.vlgmr.msra.gmra.mrb[6].mxu1 %v5567_v31  ;;  %v4020_v31 = vpack.c.bf16 %v2510_v11, %v2506_v13  ;;  %v2537_v13 = vld [vmem:[#allocation8 + $0x1b8] sm:$0xff] }
 0x3a6   :  { %4009 = vmatpush1.bf16.msra.mxu1 %v4008_v12  ;;  %2816 = vmatprep.mubr.f32.mxu1 %v4561_v47  ;;  %v2508_v12 = vld [vmem:[#allocation8 + $0xd0] sm:$0xff] }
 0x3a7   :  { %4011 = vmatprep.subr.bf16.mxu1 %v4010_v22  ;;  %v2512_v22 = vld [vmem:[#allocation8 + $0xf0] sm:$0xff] }
 0x3a8   :  { %v4052_v1 = vpack.c.bf16 %v2512_v22, %v2508_v12  ;;  %v4104_v12 = vpack.c.bf16 %v3058_v51, %v3056_v57 }
 0x3aa   :  { %4013 = vmatpush1.bf16.msra.mxu1 %v4012_v16  ;;  %v2516_v16 = vld [vmem:[#allocation8 + $0x110] sm:$0xff] }
 0x3ab   :  { %4015 = vmatprep.subr.bf16.mxu1 %v4014_v10  ;;  %v2525_v10 = vld [vmem:[#allocation8 + $0x158] sm:$0xff] }
 0x3ac   :  { %v4058_v17 = vpack.c.bf16 %v2529_v35, %v2525_v10  ;;  %v3064_v10 = vld [vmem:[#allocation10 + $0x140] sm:$0xff]  ;;  %v3066_v35 = vld [vmem:[#allocation10 + $0x150] sm:$0xff] }
 0x3ae   :  { %4017 = vmatpush1.bf16.msra.mxu1 %v4016_v26  ;;  %v2528_v26 = vld [vmem:[#allocation8 + $0x170] sm:$0xff] }
 0x3af   :  { %4019 = vmatprep.subr.bf16.mxu1 %v4018_v9  ;;  %v2533_v9 = vld [vmem:[#allocation8 + $0x198] sm:$0xff]  ;;  %v4060_v11 = vpack.c.bf16 %v2528_v26, %v2524_v3 }
 0x3b0   :  { %v4062_v34 = vpack.c.bf16 %v2537_v13, %v2533_v9  ;;  %v3071_v3 = vld [vmem:[#allocation10 + $0x178] sm:$0xff]  ;;  %v3068_v9 = vld [vmem:[#allocation10 + $0x160] sm:$0xff]  ;;  %v3070_v13 = vld [vmem:[#allocation10 + $0x170] sm:$0xff] }
 0x3b2   :  { %4021 = vmatpush1.bf16.msra.mxu1 %v4020_v31  ;;  %v2536_v31 = vld [vmem:[#allocation8 + $0x1b0] sm:$0xff] }
 0x3b3   :  { %4023 = vmatprep.subr.bf16.mxu1 %v4022_v55  ;;  %v2541_v55 = vld [vmem:[#allocation8 + $0x1d8] sm:$0xff]  ;;  %v4064_v6 = vpack.c.bf16 %v2536_v31, %v2532_v8 }
 0x3b4   :  { %v4066_v32 = vpack.c.bf16 %v2545_v39, %v2541_v55  ;;  %v3075_v8 = vld [vmem:[#allocation10 + $0x198] sm:$0xff]  ;;  %v3072_v55 = vld [vmem:[#allocation10 + $0x180] sm:$0xff]  ;;  %v3074_v39 = vld [vmem:[#allocation10 + $0x190] sm:$0xff] }
 0x3b6   :  { %4025 = vmatpush1.bf16.msra.mxu1 %v4024_v36  ;;  %v2544_v36 = vld [vmem:[#allocation8 + $0x1f0] sm:$0xff] }
 0x3b7   :  { %4027 = vmatprep.subr.bf16.mxu1 %v4026_v58  ;;  %v4068_v58 = vpack.c.bf16 %v2544_v36, %v2540_v63  ;;  %v3079_v63 = vld [vmem:[#allocation10 + $0x1b8] sm:$0xff] }
 0x3ba   :  { %4029 = vmatpush1.bf16.msra.mxu1 %v4028_v38  ;;  %v3038_v38 = vld [vmem:[#allocation10 + $0x70] sm:$0xff] }
 0x3bb   :  { %4031 = vmatprep.subr.bf16.mxu1 %v4030_v43  ;;  %v4084_v43 = vpack.c.bf16 %v3038_v38, %v3036_v24  ;;  %v3083_v24 = vld [vmem:[#allocation10 + $0x1d8] sm:$0xff] }
 0x3bc   :  { %v4126_v38 = vpack.c.bf16 %v3083_v24, %v3081_v37 }
 0x3bd   :  { %4085 = vmatpush1.bf16.msra.mxu0 %v4084_v43  ;;  %v3080_v43 = vld [vmem:[#allocation10 + $0x1c0] sm:$0xff] }
 0x3be   :  { %4033 = vmatpush1.bf16.msra.mxu1 %v4032_v48  ;;  %v3042_v48 = vld [vmem:[#allocation10 + $0x90] sm:$0xff]  ;;  %4087 = vmatprep.subr.bf16.mxu0 %v4086_v4  ;;  %v4128_v4 = vpack.c.bf16 %v3082_v62, %v3080_v43 }
 0x3bf   :  { %4035 = vmatprep.subr.bf16.mxu1 %v4034_v0  ;;  %v4088_v0 = vpack.c.bf16 %v3042_v48, %v3040_v14  ;;  %v3087_v14 = vld [vmem:[#allocation10 + $0x1f8] sm:$0xff]  ;;  %v3084_v48 = vld [vmem:[#allocation10 + $0x1e0] sm:$0xff] }
 0x3c0   :  { %v4130_v42 = vpack.c.bf16 %v3087_v14, %v3085_v33 }
 0x3c1   :  { %4089 = vmatpush1.bf16.msra.mxu0 %v4088_v0  ;;  %v3086_v0 = vld [vmem:[#allocation10 + $0x1f0] sm:$0xff] }
 0x3c2   :  { %4037 = vmatpush1.bf16.msra.mxu1 %v4036_v19  ;;  %4091 = vmatprep.subr.bf16.mxu0 %v4090_v7  ;;  %v3091_v7 = vld [vmem:[#allocation10 + $0x218] sm:$0xff] }
 0x3c3   :  { %4039 = vmatprep.subr.bf16.mxu1 %v4038_v56  ;;  %v3049_v56 = vld [vmem:[#allocation10 + $0xc8] sm:$0xff] }
 0x3c4   :  { %v4094_v54 = vpack.c.bf16 %v3051_v21, %v3049_v56 }
 0x3c5   :  { %2817 = vmatmul.mubr.f32.vlgmr.msra.gmra.mrb[4].mxu1 %v5574_v53 }
 0x3c6   :  { %4041 = vmatpush1.bf16.msra.mxu1 %v4040_v20  ;;  %2887 = vmatprep.mubr.f32.mxu1 %v4561_v47  ;;  %v2520_v47 = vld [vmem:[#allocation8 + $0x130] sm:$0xff]  ;;  %v3053_v20 = vld [vmem:[#allocation10 + $0xe8] sm:$0xff] }
 0x3c7   :  { %4043 = vmatprep.subr.bf16.mxu1 %v4042_v28  ;;  %v4056_v50 = vpack.c.bf16 %v2520_v47, %v2516_v16  ;;  %v4096_v28 = vpack.c.bf16 %v3050_v46, %v3048_v15  ;;  %v4098_v5 = vpack.c.bf16 %v3055_v45, %v3053_v20  ;;  %v4108_v16 = vpack.c.bf16 %v3062_v29, %v3060_v30 }
 0x3ca   :  { %4045 = vmatpush1.bf16.msra.mxu1 %v4044_v27  ;;  %v3057_v27 = vld [vmem:[#allocation10 + $0x108] sm:$0xff] }
 0x3cb   :  { %4047 = vmatprep.subr.bf16.mxu1 %v4046_v49  ;;  %v3059_v49 = vld [vmem:[#allocation10 + $0x118] sm:$0xff] }
 0x3cc   :  { %v4102_v18 = vpack.c.bf16 %v3059_v49, %v3057_v27 }
 0x3ce   :  { %4049 = vmatpush1.bf16.msra.mxu1 %v4048_v23  ;;  %v3061_v23 = vld [vmem:[#allocation10 + $0x128] sm:$0xff] }
 0x3cf   :  { %4051 = vmatprep.subr.bf16.mxu1 %v4050_v40  ;;  %v3063_v40 = vld [vmem:[#allocation10 + $0x138] sm:$0xff] }
 0x3d0   :  { %v4106_v22 = vpack.c.bf16 %v3063_v40, %v3061_v23 }
 0x3d2   :  { %4053 = vmatpush1.bf16.msra.mxu1 %v4052_v1  ;;  %v3065_v1 = vld [vmem:[#allocation10 + $0x148] sm:$0xff] }
 0x3d3   :  { %4055 = vmatprep.subr.bf16.mxu1 %v4054_v60  ;;  %v3067_v60 = vld [vmem:[#allocation10 + $0x158] sm:$0xff] }
 0x3d4   :  { %v4110_v47 = vpack.c.bf16 %v3067_v60, %v3065_v1 }
 0x3d6   :  { %4057 = vmatpush1.bf16.msra.mxu1 %v4056_v50  ;;  %v4112_v50 = vpack.c.bf16 %v3066_v35, %v3064_v10 }
 0x3d7   :  { %4059 = vmatprep.subr.bf16.mxu1 %v4058_v17  ;;  %v3069_v17 = vld [vmem:[#allocation10 + $0x168] sm:$0xff] }
 0x3d8   :  { %v4114_v26 = vpack.c.bf16 %v3071_v3, %v3069_v17 }
 0x3da   :  { %4061 = vmatpush1.bf16.msra.mxu1 %v4060_v11  ;;  %v4116_v11 = vpack.c.bf16 %v3070_v13, %v3068_v9 }
 0x3db   :  { %4063 = vmatprep.subr.bf16.mxu1 %v4062_v34  ;;  %v3073_v34 = vld [vmem:[#allocation10 + $0x188] sm:$0xff] }
 0x3dc   :  { %v4118_v31 = vpack.c.bf16 %v3075_v8, %v3073_v34 }
 0x3de   :  { %4065 = vmatpush1.bf16.msra.mxu1 %v4064_v6  ;;  %v4120_v6 = vpack.c.bf16 %v3074_v39, %v3072_v55 }
 0x3df   :  { %4067 = vmatprep.subr.bf16.mxu1 %v4066_v32  ;;  %v3077_v32 = vld [vmem:[#allocation10 + $0x1a8] sm:$0xff] }
 0x3e0   :  { %v4122_v36 = vpack.c.bf16 %v3079_v63, %v3077_v32 }
 0x3e2   :  { %4069 = vmatpush1.bf16.msra.mxu1 %v4068_v58  ;;  %v3076_v58 = vld [vmem:[#allocation10 + $0x1a0] sm:$0xff] }
 0x3e3   :  { %v4124_v44 = vpack.c.bf16 %v3078_v41, %v3076_v58 }
 0x3e5   :  { %2888 = vmatmul.mubr.f32.vlgmr.msra.gmra.mrb[6].mxu1 %v5574_v53  ;;  %v3044_v53 = vld [vmem:[#allocation10 + $0xa0] sm:$0xff] }
 0x3e6   :  { %v4092_v19 = vpack.c.bf16 %v3046_v52, %v3044_v53  ;;  %v4132_v53 = vpack.c.bf16 %v3086_v0, %v3084_v48  ;;  %v4134_v52 = vpack.c.bf16 %v3091_v7, %v3089_v2 }
 0x3e8   :  { %4093 = vmatpush1.bf16.msra.mxu0 %v4092_v19  ;;  %v5704_v19 = vlaneseq }
 0x3e9   :  { %4095 = vmatprep.subr.bf16.mxu0 %v4094_v54  ;;  %v2894_v54 = vld [vmem:[%s5672_s11] sm:$0xf] }
 0x3ea   :  { %v5582_v56 = vshrl.u32 %v5704_v19, 7 }
 0x3ec   :  { %4097 = vmatpush1.bf16.msra.mxu0 %v4096_v28  ;;  %v2898_v21 = vsub.s32 0, %v5582_v56  ;;  %v2902_v15 = vsub.s32 1, %v5582_v56  ;;  %v2906_v35 = vsub.s32 2, %v5582_v56 }
 0x3ed   :  { %4099 = vmatprep.subr.bf16.mxu0 %v4098_v5 }
 0x3ee   :  { %v2899_v46 = vrot.slane %v2894_v54, %v2898_v21  ;;  %v2903_v20 = vrot.slane %v2894_v54, %v2902_v15 }
 0x3f0   :  { %4101 = vmatpush1.bf16.msra.mxu0 %v4100_v61 }
 0x3f1   :  { %4103 = vmatprep.subr.bf16.mxu0 %v4102_v18 }
 0x3f4   :  { %4105 = vmatpush1.bf16.msra.mxu0 %v4104_v12 }
 0x3f5   :  { %4107 = vmatprep.subr.bf16.mxu0 %v4106_v22 }
 0x3f8   :  { %4109 = vmatpush1.bf16.msra.mxu0 %v4108_v16 }
 0x3f9   :  { %4111 = vmatprep.subr.bf16.mxu0 %v4110_v47 }
 0x3fc   :  { %4113 = vmatpush1.bf16.msra.mxu0 %v4112_v50 }
 0x3fd   :  { %4115 = vmatprep.subr.bf16.mxu0 %v4114_v26  ;;  %v2910_v26 = vsub.s32 3, %v5582_v56 }
 0x400   :  { %4117 = vmatpush1.bf16.msra.mxu0 %v4116_v11  ;;  %v2907_v11 = vrot.slane %v2894_v54, %v2906_v35 }
 0x401   :  { %4119 = vmatprep.subr.bf16.mxu0 %v4118_v31  ;;  %v2911_v31 = vrot.slane %v2894_v54, %v2910_v26  ;;  %v3098_v26 = vld [vmem:[#allocation10 + $0x250] sm:$0xff] }
 0x404   :  { %4121 = vmatpush1.bf16.msra.mxu0 %v4120_v6 }
 0x405   :  { %4123 = vmatprep.subr.bf16.mxu0 %v4122_v36 }
 0x408   :  { %4125 = vmatpush1.bf16.msra.mxu0 %v4124_v44 }
 0x409   :  { %4127 = vmatprep.subr.bf16.mxu0 %v4126_v38 }
 0x40c   :  { %4129 = vmatpush1.bf16.msra.mxu0 %v4128_v4 }
 0x40d   :  { %4131 = vmatprep.subr.bf16.mxu0 %v4130_v42 }
 0x410   :  { %4133 = vmatpush1.bf16.msra.mxu0 %v4132_v53 }
 0x411   :  { %4135 = vmatprep.subr.bf16.mxu0 %v4134_v52 }
 0x498   :  { %v2818_v28 = vpop.f32.mrb[4].mxu1 }
 0x499   :  { %v5593_v45 = vadd.f32 %v2899_v46, %v2818_v28  ;;  %v2820_v59 = vpop.f32.mrb[5].mxu1 }
 0x49a   :  { %v5595_v25 = vadd.f32 %v2903_v20, %v2820_v59 }
 0x49b   :  { %v5598_v5 = vmul.f32 0.70710677, %v5593_v45 }
 0x49c   :  { %v5601_v27 = vmul.f32 0.70710677, %v5595_v25 }
 0x49d   :  { %v2928_v49 = vand.u32 2147483647, %v5598_v5  ;;  %vm3004_vm3 = vcmp.lt.f32.partialorder %v5598_v5, 0.0 }
 0x49e   :  { %v2929_v61 = vand.u32 2147483647, %v5601_v27  ;;  %vm3005_vm7 = vcmp.lt.f32.partialorder %v5601_v27, 0.0  ;;  %v3097_v27 = vld [vmem:[#allocation10 + $0x248] sm:$0xff] }
 0x49f   :  { %v2932_v18 = vmul.f32 0.3275911, %v2928_v49  ;;  %v2980_v40 = vsub.f32 0.0, %v2928_v49 }
 0x4a0   :  { %v2933_v57 = vmul.f32 0.3275911, %v2929_v61  ;;  %v2981_v12 = vsub.f32 0.0, %v2929_v61 }
 0x4a1   :  { %v2936_v51 = vadd.f32 1.0, %v2932_v18  ;;  %v2984_v30 = vmul.f32 %v2980_v40, %v2928_v49  ;;  %v3088_v18 = vld [vmem:[#allocation10 + $0x200] sm:$0xff]  ;;  %v3093_v40 = vld [vmem:[#allocation10 + $0x228] sm:$0xff] }
 0x4a2   :  { %v2937_v23 = vadd.f32 1.0, %v2933_v57  ;;  %v2985_v60 = vmul.f32 %v2981_v12, %v2929_v61  ;;  %v3090_v57 = vld [vmem:[#allocation10 + $0x210] sm:$0xff]  ;;  %v3095_v12 = vld [vmem:[#allocation10 + $0x238] sm:$0xff] }
 0x4a3   :  { %4352 = vrcp.f32 %v2936_v51  ;;  %v2988_v10 = vmul.f32 1.442695, %v2984_v30  ;;  %v2921_v51 = vmul.f32 0.5, %v5595_v25 }
 0x4a4   :  { %4354 = vrcp.f32 %v2937_v23  ;;  %v2990_v3 = vmul.f32 1.442695, %v2985_v60  ;;  %v4138_v60 = vpack.c.bf16 %v3095_v12, %v3093_v40 }
 0x4a5   :  { %4356 = vpow2.f32 %v2988_v10  ;;  %v3099_v10 = vld [vmem:[#allocation10 + $0x258] sm:$0xff] }
 0x4a6   :  { %4358 = vpow2.f32 %v2990_v3  ;;  %v3096_v3 = vld [vmem:[#allocation10 + $0x240] sm:$0xff] }
 0x4ad   :  { %v4353_v22 = vpop.eup %4352 }
 0x4ae   :  { %v4355_v29 = vpop.eup %4354  ;;  %v2944_v1 = vmul.f32 1.0614054, %v4353_v22 }
 0x4af   :  { %v2945_v16 = vmul.f32 1.0614054, %v4355_v29  ;;  %v4357_v14 = vpop.eup %4356 }
 0x4b0   :  { %v2948_v47 = vadd.f32 -1.4531521, %v2944_v1  ;;  %v4359_v42 = vpop.eup %4358  ;;  %v4136_v1 = vpack.c.bf16 %v3090_v57, %v3088_v18  ;;  %v3112_v57 = vld [vmem:[#allocation10 + $0x2c0] sm:$0xff] }
 0x4b1   :  { %v2949_v50 = vadd.f32 -1.4531521, %v2945_v16  ;;  %v3092_v16 = vld [vmem:[#allocation10 + $0x220] sm:$0xff] }
 0x4b2   :  { %v2952_v17 = vmul.f32 %v4353_v22, %v2948_v47  ;;  %v3094_v47 = vld [vmem:[#allocation10 + $0x230] sm:$0xff] }
 0x4b3   :  { %v2953_v9 = vmul.f32 %v4355_v29, %v2949_v50  ;;  %v4140_v25 = vpack.c.bf16 %v3094_v47, %v3092_v16  ;;  %v3116_v16 = vld [vmem:[#allocation10 + $0x2e0] sm:$0xff]  ;;  %v3118_v47 = vld [vmem:[#allocation10 + $0x2f0] sm:$0xff] }
 0x4b4   :  { %v2956_v13 = vadd.f32 1.4214138, %v2952_v17  ;;  %v4142_v17 = vpack.c.bf16 %v3099_v10, %v3097_v27 }
 0x4b5   :  { %v2957_v34 = vadd.f32 1.4214138, %v2953_v9  ;;  %v3101_v9 = vld [vmem:[#allocation10 + $0x268] sm:$0xff] }
 0x4b6   :  { %v2960_v8 = vmul.f32 %v4353_v22, %v2956_v13  ;;  %v3103_v13 = vld [vmem:[#allocation10 + $0x278] sm:$0xff] }
 0x4b7   :  { %v2961_v55 = vmul.f32 %v4355_v29, %v2957_v34 }
 0x4b8   :  { %v2964_v39 = vadd.f32 -0.28449672, %v2960_v8  ;;  %v2889_v6 = vpop.f32.mrb[6].mxu1 }
 0x4b9   :  { %v5607_v32 = vadd.f32 %v2907_v11, %v2889_v6  ;;  %v2891_v63 = vpop.f32.mrb[7].mxu1  ;;  %v2965_v36 = vadd.f32 -0.28449672, %v2961_v55  ;;  %v4146_v55 = vpack.c.bf16 %v3103_v13, %v3101_v9  ;;  %v3102_v6 = vld [vmem:[#allocation10 + $0x270] sm:$0xff]  ;;  %v3120_v9 = vld [vmem:[#allocation10 + $0x300] sm:$0xff] }
 0x4ba   :  { %v2968_v58 = vmul.f32 %v4353_v22, %v2964_v39  ;;  %v5609_v41 = vadd.f32 %v2911_v31, %v2891_v63  ;;  %v4144_v31 = vpack.c.bf16 %v3098_v26, %v3096_v3  ;;  %v3100_v39 = vld [vmem:[#allocation10 + $0x260] sm:$0xff]  ;;  %v4164_v3 = vpack.c.bf16 %v3118_v47, %v3116_v16  ;;  %v3122_v13 = vld [vmem:[#allocation10 + $0x310] sm:$0xff] }
 0x4bb   :  { %v5612_v44 = vmul.f32 0.70710677, %v5607_v32  ;;  %v2969_v37 = vmul.f32 %v4355_v29, %v2965_v36  ;;  %v3146_v16 = vld [vmem:[#allocation10 + $0x3d0] sm:$0xff] }
 0x4bc   :  { %v2972_v24 = vadd.f32 0.2548296, %v2968_v58  ;;  %v5615_v38 = vmul.f32 0.70710677, %v5609_v41  ;;  %v3105_v58 = vld [vmem:[#allocation10 + $0x288] sm:$0xff] }
 0x4bd   :  { %v5618_v43 = vand.u32 2147483647, %v5612_v44  ;;  %v2973_v62 = vadd.f32 0.2548296, %v2969_v37  ;;  %v3107_v37 = vld [vmem:[#allocation10 + $0x298] sm:$0xff]  ;;  %vm3006_vm8 = vcmp.lt.f32.partialorder %v5612_v44, 0.0 }
 0x4be   :  { %v2976_v33 = vmul.f32 %v4353_v22, %v2972_v24  ;;  %v2931_v4 = vand.u32 2147483647, %v5615_v38  ;;  %v2920_v22 = vmul.f32 0.5, %v5593_v45  ;;  %vm3007_vm9 = vcmp.lt.f32.partialorder %v5615_v38, 0.0  ;;  %v3124_v38 = vld [vmem:[#allocation10 + $0x320] sm:$0xff]  ;;  %v3376_v44 = vld [vmem:[#allocation11 + $0x90] sm:$0xff] }
 0x4bf   :  { %v2934_v48 = vmul.f32 0.3275911, %v5618_v43  ;;  %v2977_v0 = vmul.f32 %v4355_v29, %v2973_v62  ;;  %v4148_v62 = vpack.c.bf16 %v3102_v6, %v3100_v39  ;;  %v3127_v39 = vld [vmem:[#allocation10 + $0x338] sm:$0xff] }
 0x4c0   :  { %v2996_v2 = vmul.f32 %v4357_v14, %v2976_v33  ;;  %v2935_v7 = vmul.f32 0.3275911, %v2931_v4  ;;  %v2983_v30 = vsub.f32 0.0, %v2931_v4  ;;  %v4150_v33 = vpack.c.bf16 %v3107_v37, %v3105_v58  ;;  %v3106_v14 = vld [vmem:[#allocation10 + $0x290] sm:$0xff] }
 0x4c1   :  { %v2997_v53 = vmul.f32 %v4359_v42, %v2977_v0  ;;  %v2938_v54 = vadd.f32 1.0, %v2934_v48  ;;  %v3109_v42 = vld [vmem:[#allocation10 + $0x2a8] sm:$0xff]  ;;  %v3126_v58 = vld [vmem:[#allocation10 + $0x330] sm:$0xff] }
 0x4c2   :  { %v3000_v52 = vsub.f32 1.0, %v2996_v2  ;;  %v2939_v19 = vadd.f32 1.0, %v2935_v7  ;;  %v2987_v50 = vmul.f32 %v2983_v30, %v2931_v4  ;;  %v3104_v4 = vld [vmem:[#allocation10 + $0x280] sm:$0xff]  ;;  %v3111_v2 = vld [vmem:[#allocation10 + $0x2b8] sm:$0xff] }
 0x4c3   :  { %v3001_v46 = vsub.f32 1.0, %v2997_v53  ;;  %v4152_v53 = vpack.c.bf16 %v3106_v14, %v3104_v4  ;;  %v3119_v30 = vld [vmem:[#allocation10 + $0x2f8] sm:$0xff]  ;;  %v3128_v4 = vld [vmem:[#allocation10 + $0x340] sm:$0xff]  ;;  %v3130_v14 = vld [vmem:[#allocation10 + $0x350] sm:$0xff] }
 0x4c4   :  { %v3008_v20 = vsub.f32 0.0, %v3000_v52  ;;  %4360 = vrcp.f32 %v2939_v19  ;;  %v2994_v8 = vmul.f32 1.442695, %v2987_v50  ;;  %v3108_v19 = vld [vmem:[#allocation10 + $0x2a0] sm:$0xff]  ;;  %v3121_v50 = vld [vmem:[#allocation10 + $0x308] sm:$0xff] }
 0x4c5   :  { %v3009_v28 = vsub.f32 0.0, %v3001_v46  ;;  %4362 = vrcp.f32 %v2938_v54  ;;  %v3110_v54 = vld [vmem:[#allocation10 + $0x2b0] sm:$0xff] }
 0x4c6   :  { %v3012_v59 = vsel %vm3004_vm3, %v3008_v20, %v3000_v52  ;;  %4364 = vpow2.f32 %v2994_v8  ;;  %v4154_v52 = vpack.c.bf16 %v3111_v2, %v3109_v42  ;;  %v2923_v8 = vmul.f32 0.5, %v5609_v41  ;;  %v3135_v42 = vld [vmem:[#allocation10 + $0x378] sm:$0xff] }
 0x4c7   :  { %v3016_v49 = vadd.f32 1.0, %v3012_v59  ;;  %v3013_v61 = vsel %vm3005_vm7, %v3009_v28, %v3001_v46  ;;  %v3113_v28 = vld [vmem:[#allocation10 + $0x2c8] sm:$0xff]  ;;  %v3115_v59 = vld [vmem:[#allocation10 + $0x2d8] sm:$0xff]  ;;  %v4176_v2 = vpack.c.bf16 %v3130_v14, %v3128_v4 }
 0x4c8   :  { %v3017_v23 = vadd.f32 1.0, %v3013_v61  ;;  %v4156_v61 = vpack.c.bf16 %v3110_v54, %v3108_v19  ;;  %v4158_v18 = vpack.c.bf16 %v3115_v59, %v3113_v28  ;;  %v3137_v54 = vld [vmem:[#allocation10 + $0x388] sm:$0xff]  ;;  %v3381_v4 = vld [vmem:[#allocation11 + $0xb8] sm:$0xff] }
 0x4c9   :  { %v3020_v5 = vmul.f32 %v3016_v49, %v2920_v22  ;;  %v3117_v22 = vld [vmem:[#allocation10 + $0x2e8] sm:$0xff] }
 0x4ca   :  { %v3021_v29 = vmul.f32 %v3017_v23, %v2921_v51  ;;  %v3114_v51 = vld [vmem:[#allocation10 + $0x2d0] sm:$0xff] }
 0x4cc   :  { %3228 = vmatprep.mubr.f32.mxu0 %v3021_v29  ;;  %v2982_v29 = vsub.f32 0.0, %v5618_v43 }
 0x4cd   :  { %3229 = vmatmul.mubr.f32.vlgmr.msra.gmra.mrb[8].mxu0 %v3020_v5  ;;  %v4160_v5 = vpack.c.bf16 %v3114_v51, %v3112_v57  ;;  %v3141_v57 = vld [vmem:[#allocation10 + $0x3a8] sm:$0xff]  ;;  %v3143_v51 = vld [vmem:[#allocation10 + $0x3b8] sm:$0xff] }
 0x4ce   :  { %v4361_v35 = vpop.eup %4360  ;;  %4137 = vmatpush1.bf16.msra.mxu0 %v4136_v1 }
 0x4cf   :  { %4139 = vmatprep.subr.bf16.mxu0 %v4138_v60  ;;  %v2947_v45 = vmul.f32 1.0614054, %v4361_v35  ;;  %v5626_v11 = vpop.eup %4362  ;;  %v4162_v60 = vpack.c.bf16 %v3119_v30, %v3117_v22  ;;  %v3142_v22 = vld [vmem:[#allocation10 + $0x3b0] sm:$0xff] }
 0x4d0   :  { %v2946_v36 = vmul.f32 1.0614054, %v5626_v11  ;;  %v4365_v40 = vpop.eup %4364 }
 0x4d1   :  { %v2951_v34 = vadd.f32 -1.4531521, %v2947_v45 }
 0x4d2   :  { %4141 = vmatpush1.bf16.msra.mxu0 %v4140_v25  ;;  %v2950_v0 = vadd.f32 -1.4531521, %v2946_v36  ;;  %v3123_v25 = vld [vmem:[#allocation10 + $0x318] sm:$0xff] }
 0x4d3   :  { %4143 = vmatprep.subr.bf16.mxu0 %v4142_v17  ;;  %v2955_v63 = vmul.f32 %v4361_v35, %v2951_v34  ;;  %v4166_v26 = vpack.c.bf16 %v3123_v25, %v3121_v50 }
 0x4d4   :  { %v2954_v20 = vmul.f32 %v5626_v11, %v2950_v0  ;;  %v3133_v0 = vld [vmem:[#allocation10 + $0x368] sm:$0xff] }
 0x4d5   :  { %v2959_v24 = vadd.f32 1.4214138, %v2955_v63 }
 0x4d6   :  { %4145 = vmatpush1.bf16.msra.mxu0 %v4144_v31  ;;  %v2958_v12 = vadd.f32 1.4214138, %v2954_v20 }
 0x4d7   :  { %4147 = vmatprep.subr.bf16.mxu0 %v4146_v55  ;;  %v2963_v48 = vmul.f32 %v4361_v35, %v2959_v24  ;;  %v3125_v55 = vld [vmem:[#allocation10 + $0x328] sm:$0xff] }
 0x4d8   :  { %v2962_v10 = vmul.f32 %v5626_v11, %v2958_v12  ;;  %v4170_v36 = vpack.c.bf16 %v3127_v39, %v3125_v55  ;;  %v3129_v24 = vld [vmem:[#allocation10 + $0x348] sm:$0xff]  ;;  %v3140_v12 = vld [vmem:[#allocation10 + $0x3a0] sm:$0xff] }
 0x4d9   :  { %v2967_v7 = vadd.f32 -0.28449672, %v2963_v48  ;;  %v3359_v39 = vld [vmem:[#allocation11 + $0x8] sm:$0xff] }
 0x4da   :  { %4149 = vmatpush1.bf16.msra.mxu0 %v4148_v62  ;;  %v2966_v34 = vadd.f32 -0.28449672, %v2962_v10  ;;  %v3131_v62 = vld [vmem:[#allocation10 + $0x358] sm:$0xff] }
 0x4db   :  { %4151 = vmatprep.subr.bf16.mxu0 %v4150_v33  ;;  %v2971_v46 = vmul.f32 %v4361_v35, %v2967_v7  ;;  %v4172_v33 = vpack.c.bf16 %v3126_v58, %v3124_v38  ;;  %v4174_v41 = vpack.c.bf16 %v3131_v62, %v3129_v24  ;;  %v4178_v7 = vpack.c.bf16 %v3135_v42, %v3133_v0  ;;  %v3151_v10 = vld [vmem:[#allocation10 + $0x3f8] sm:$0xff]  ;;  %v3378_v58 = vld [vmem:[#allocation11 + $0xa0] sm:$0xff]  ;;  %v3364_v0 = vld [vmem:[#allocation11 + $0x30] sm:$0xff] }
 0x4dc   :  { %v2970_v37 = vmul.f32 %v5626_v11, %v2966_v34  ;;  %v3374_v34 = vld [vmem:[#allocation11 + $0x80] sm:$0xff]  ;;  %v3361_v38 = vld [vmem:[#allocation11 + $0x18] sm:$0xff] }
 0x4dd   :  { %v2975_v49 = vadd.f32 0.2548296, %v2971_v46  ;;  %v3139_v46 = vld [vmem:[#allocation10 + $0x398] sm:$0xff]  ;;  %v3362_v62 = vld [vmem:[#allocation11 + $0x20] sm:$0xff] }
 0x4de   :  { %4153 = vmatpush1.bf16.msra.mxu0 %v4152_v53  ;;  %v2974_v48 = vadd.f32 0.2548296, %v2970_v37  ;;  %v3132_v53 = vld [vmem:[#allocation10 + $0x360] sm:$0xff]  ;;  %v4182_v59 = vpack.c.bf16 %v3139_v46, %v3137_v54  ;;  %v3379_v37 = vld [vmem:[#allocation11 + $0xa8] sm:$0xff]  ;;  %v3365_v42 = vld [vmem:[#allocation11 + $0x38] sm:$0xff] }
 0x4df   :  { %4155 = vmatprep.subr.bf16.mxu0 %v4154_v52  ;;  %v2979_v23 = vmul.f32 %v4361_v35, %v2975_v49  ;;  %v2986_v35 = vmul.f32 %v2982_v29, %v5618_v43  ;;  %v4168_v43 = vpack.c.bf16 %v3122_v13, %v3120_v9  ;;  %v3134_v52 = vld [vmem:[#allocation10 + $0x370] sm:$0xff]  ;;  %v3136_v49 = vld [vmem:[#allocation10 + $0x380] sm:$0xff]  ;;  %v3147_v29 = vld [vmem:[#allocation10 + $0x3d8] sm:$0xff]  ;;  %v2922_v9 = vmul.f32 0.5, %v5607_v32 }
 0x4e0   :  { %v2978_v19 = vmul.f32 %v5626_v11, %v2974_v48  ;;  %v4180_v20 = vpack.c.bf16 %v3134_v52, %v3132_v53  ;;  %v3145_v11 = vld [vmem:[#allocation10 + $0x3c8] sm:$0xff]  ;;  %v4206_v32 = vpack.c.bf16 %v3379_v37, %v3378_v58  ;;  %v4212_v53 = vpack.c.bf16 %v3365_v42, %v3364_v0  ;;  %v3384_v46 = vld [vmem:[#allocation11 + $0xd0] sm:$0xff] }
 0x4e1   :  { %v2999_v1 = vmul.f32 %v4365_v40, %v2979_v23  ;;  %v2992_v6 = vmul.f32 1.442695, %v2986_v35  ;;  %v4186_v40 = vpack.c.bf16 %v3143_v51, %v3141_v57  ;;  %v3148_v35 = vld [vmem:[#allocation10 + $0x3e0] sm:$0xff]  ;;  %v3367_v54 = vld [vmem:[#allocation11 + $0x48] sm:$0xff] }
 0x4e2   :  { %4157 = vmatpush1.bf16.msra.mxu0 %v4156_v61  ;;  %v3138_v61 = vld [vmem:[#allocation10 + $0x390] sm:$0xff]  ;;  %v3387_v57 = vld [vmem:[#allocation11 + $0xe8] sm:$0xff] }
 0x4e3   :  { %4159 = vmatprep.subr.bf16.mxu0 %v4158_v18  ;;  %v3003_v27 = vsub.f32 1.0, %v2999_v1  ;;  %4366 = vpow2.f32 %v2992_v6  ;;  %v4184_v23 = vpack.c.bf16 %v3138_v61, %v3136_v49  ;;  %v4188_v1 = vpack.c.bf16 %v3142_v22, %v3140_v12  ;;  %v3377_v6 = vld [vmem:[#allocation11 + $0x98] sm:$0xff]  ;;  %v3368_v49 = vld [vmem:[#allocation11 + $0x50] sm:$0xff]  ;;  %v3371_v12 = vld [vmem:[#allocation11 + $0x68] sm:$0xff] }
 0x4e4   :  { %v3369_v61 = vld [vmem:[#allocation11 + $0x58] sm:$0xff]  ;;  %v3388_v22 = vld [vmem:[#allocation11 + $0xf0] sm:$0xff] }
 0x4e5   :  { %v3011_v17 = vsub.f32 0.0, %v3003_v27  ;;  %v4220_v51 = vpack.c.bf16 %v3369_v61, %v3368_v49 }
 0x4e6   :  { %4161 = vmatpush1.bf16.msra.mxu0 %v4160_v5  ;;  %v4190_v5 = vpack.c.bf16 %v3147_v29, %v3145_v11 }
 0x4e7   :  { %4163 = vmatprep.subr.bf16.mxu0 %v4162_v60  ;;  %v3015_v45 = vsel %vm3007_vm9, %v3011_v17, %v3003_v27  ;;  %v3144_v60 = vld [vmem:[#allocation10 + $0x3c0] sm:$0xff]  ;;  %v3149_v27 = vld [vmem:[#allocation10 + $0x3e8] sm:$0xff]  ;;  %v3150_v17 = vld [vmem:[#allocation10 + $0x3f0] sm:$0xff] }
 0x4e8   :  { %v3019_v31 = vadd.f32 1.0, %v3015_v45  ;;  %v4192_v50 = vpack.c.bf16 %v3146_v16, %v3144_v60  ;;  %v4194_v25 = vpack.c.bf16 %v3151_v10, %v3149_v27  ;;  %v3152_v16 = vld [vmem:[%s5674_s13] sm:$0x3] }
 0x4e9   :  { %v3161_v27 = vrot.slane %v3152_v16, %v2902_v15 }
 0x4ea   :  { %4165 = vmatpush1.bf16.msra.mxu0 %v4164_v3  ;;  %v3023_v63 = vmul.f32 %v3019_v31, %v2923_v8  ;;  %v3375_v8 = vld [vmem:[#allocation11 + $0x88] sm:$0xff]  ;;  %v3358_v31 = vld [vmem:[#allocation11] sm:$0xff] }
 0x4eb   :  { %4167 = vmatprep.subr.bf16.mxu0 %v4166_v26  ;;  %v4196_v26 = vpack.c.bf16 %v3150_v17, %v3148_v35  ;;  %v4198_v55 = vpack.c.bf16 %v3375_v8, %v3374_v34 }
 0x4ec   :  { %3299 = vmatprep.mubr.f32.mxu0 %v3023_v63  ;;  %v4200_v63 = vpack.c.bf16 %v3359_v39, %v3358_v31 }
 0x4ed   :  { %v4367_v28 = vpop.eup %4366  ;;  %4199 = vmatprep.subr.bf16.mxu1 %v4198_v55 }
 0x4ee   :  { %4169 = vmatpush1.bf16.msra.mxu0 %v4168_v43  ;;  %v2998_v18 = vmul.f32 %v4367_v28, %v2978_v19  ;;  %v4202_v43 = vpack.c.bf16 %v3377_v6, %v3376_v44  ;;  %4201 = vmatpush3.bf16.msra.mxu1 %v4200_v63  ;;  %v3366_v19 = vld [vmem:[#allocation11 + $0x40] sm:$0xff] }
 0x4ef   :  { %4171 = vmatprep.subr.bf16.mxu0 %v4170_v36  ;;  %v3360_v36 = vld [vmem:[#allocation11 + $0x10] sm:$0xff]  ;;  %v4216_v28 = vpack.c.bf16 %v3367_v54, %v3366_v19 }
 0x4f0   :  { %v3002_v30 = vsub.f32 1.0, %v2998_v18  ;;  %v4204_v24 = vpack.c.bf16 %v3361_v38, %v3360_v36  ;;  %4203 = vmatprep.subr.bf16.mxu1 %v4202_v43  ;;  %v3386_v18 = vld [vmem:[#allocation11 + $0xe0] sm:$0xff] }
 0x4f2   :  { %4173 = vmatpush1.bf16.msra.mxu0 %v4172_v33  ;;  %v3010_v47 = vsub.f32 0.0, %v3002_v30  ;;  %v3363_v33 = vld [vmem:[#allocation11 + $0x28] sm:$0xff]  ;;  %4205 = vmatpush3.bf16.msra.mxu1 %v4204_v24 }
 0x4f3   :  { %4175 = vmatprep.subr.bf16.mxu0 %v4174_v41  ;;  %v3380_v41 = vld [vmem:[#allocation11 + $0xb0] sm:$0xff]  ;;  %v4208_v14 = vpack.c.bf16 %v3363_v33, %v3362_v62  ;;  %4207 = vmatprep.subr.bf16.mxu1 %v4206_v32 }
 0x4f4   :  { %v3014_v3 = vsel %vm3006_vm8, %v3010_v47, %v3002_v30  ;;  %v4210_v48 = vpack.c.bf16 %v3381_v4, %v3380_v41  ;;  %v3389_v30 = vld [vmem:[#allocation11 + $0xf8] sm:$0xff]  ;;  %v3157_v47 = vrot.slane %v3152_v16, %v2898_v21 }
 0x4f5   :  { %v3018_v45 = vadd.f32 1.0, %v3014_v3  ;;  %v4226_v29 = vpack.c.bf16 %v3389_v30, %v3388_v22  ;;  %v3556_v30 = vld [vmem:[%s5676_s15] ss:$0 sm:$0xff] }
 0x4f6   :  { %4177 = vmatpush1.bf16.msra.mxu0 %v4176_v2  ;;  %v3382_v2 = vld [vmem:[#allocation11 + $0xc0] sm:$0xff]  ;;  %4209 = vmatpush3.bf16.msra.mxu1 %v4208_v14 }
 0x4f7   :  { %4179 = vmatprep.subr.bf16.mxu0 %v4178_v7  ;;  %v3022_v13 = vmul.f32 %v3018_v45, %v2922_v9  ;;  %v3383_v7 = vld [vmem:[#allocation11 + $0xc8] sm:$0xff]  ;;  %4211 = vmatprep.subr.bf16.mxu1 %v4210_v48 }
 0x4f8   :  { %v4214_v52 = vpack.c.bf16 %v3383_v7, %v3382_v2 }
 0x4fa   :  { %4181 = vmatpush1.bf16.msra.mxu0 %v4180_v20  ;;  %v3385_v20 = vld [vmem:[#allocation11 + $0xd8] sm:$0xff]  ;;  %4213 = vmatpush3.bf16.msra.mxu1 %v4212_v53 }
 0x4fb   :  { %4183 = vmatprep.subr.bf16.mxu0 %v4182_v59  ;;  %4215 = vmatprep.subr.bf16.mxu1 %v4214_v52  ;;  %v4218_v59 = vpack.c.bf16 %v3385_v20, %v3384_v46 }
 0x4fe   :  { %4185 = vmatpush1.bf16.msra.mxu0 %v4184_v23  ;;  %4217 = vmatpush3.bf16.msra.mxu1 %v4216_v28  ;;  %v4222_v23 = vpack.c.bf16 %v3387_v57, %v3386_v18 }
 0x4ff   :  { %4187 = vmatprep.subr.bf16.mxu0 %v4186_v40  ;;  %4219 = vmatprep.subr.bf16.mxu1 %v4218_v59  ;;  %v3370_v40 = vld [vmem:[#allocation11 + $0x60] sm:$0xff] }
 0x500   :  { %v4224_v11 = vpack.c.bf16 %v3371_v12, %v3370_v40 }
 0x502   :  { %4189 = vmatpush1.bf16.msra.mxu0 %v4188_v1  ;;  %4221 = vmatpush3.bf16.msra.mxu1 %v4220_v51  ;;  %v3372_v1 = vld [vmem:[#allocation11 + $0x70] sm:$0xff] }
 0x503   :  { %4191 = vmatprep.subr.bf16.mxu0 %v4190_v5  ;;  %4223 = vmatprep.subr.bf16.mxu1 %v4222_v23  ;;  %v3373_v5 = vld [vmem:[#allocation11 + $0x78] sm:$0xff] }
 0x504   :  { %v4228_v60 = vpack.c.bf16 %v3373_v5, %v3372_v1 }
 0x506   :  { %4193 = vmatpush1.bf16.msra.mxu0 %v4192_v50  ;;  %4225 = vmatpush3.bf16.msra.mxu1 %v4224_v11 }
 0x507   :  { %4195 = vmatprep.subr.bf16.mxu0 %v4194_v25  ;;  %4227 = vmatprep.subr.bf16.mxu1 %v4226_v29 }
 0x50a   :  { %4197 = vmatpush1.bf16.msra.mxu0 %v4196_v26  ;;  %4229 = vmatpush3.bf16.msra.mxu1 %v4228_v60 }
 0x50d   :  { %3300 = vmatmul.mubr.f32.vlgmr.msra.gmra.mrb[8].mxu0 %v3022_v13 }
 0x5e0   :  { %v3301_v10 = vpop.f32.mrb[8].mxu0 }
 0x5e1   :  { %v4233_v50 = vadd.f32 %v3301_v10, %v3157_v47  ;;  %v3303_v25 = vpop.f32.mrb[9].mxu0 }
 0x5e2   :  { %v4234_v35 = vadd.f32 %v3303_v25, %v3161_v27 }
 0x5e3   :  { %v3308_v17 = vmul.f32 0.70710677, %v4233_v50  ;;  %v3306_v23 = vmul.f32 0.5, %v4233_v50 }
 0x5e4   :  { %v3309_v3 = vmul.f32 0.70710677, %v4234_v35  ;;  %v3307_v57 = vmul.f32 0.5, %v4234_v35 }
 0x5e5   :  { %v3310_v26 = vand.u32 2147483647, %v3308_v17  ;;  %vm3348_vm10 = vcmp.lt.f32.partialorder %v3308_v17, 0.0 }
 0x5e6   :  { %v3311_v45 = vand.u32 2147483647, %v3309_v3  ;;  %vm3349_vm11 = vcmp.lt.f32.partialorder %v3309_v3, 0.0 }
 0x5e7   :  { %v3312_v9 = vmul.f32 0.3275911, %v3310_v26  ;;  %v3336_v31 = vsub.f32 0.0, %v3310_v26 }
 0x5e8   :  { %v3313_v13 = vmul.f32 0.3275911, %v3311_v45  ;;  %v3337_v55 = vsub.f32 0.0, %v3311_v45 }
 0x5e9   :  { %v3314_v34 = vadd.f32 1.0, %v3312_v9  ;;  %v3338_v39 = vmul.f32 %v3336_v31, %v3310_v26 }
 0x5ea   :  { %v3315_v8 = vadd.f32 1.0, %v3313_v13  ;;  %v3339_v44 = vmul.f32 %v3337_v55, %v3311_v45 }
 0x5eb   :  { %4368 = vrcp.f32 %v3314_v34  ;;  %v3340_v43 = vmul.f32 1.442695, %v3338_v39 }
 0x5ec   :  { %4370 = vrcp.f32 %v3315_v8  ;;  %v3342_v58 = vmul.f32 1.442695, %v3339_v44 }
 0x5ed   :  { %4372 = vpow2.f32 %v3340_v43 }
 0x5ee   :  { %4374 = vpow2.f32 %v3342_v58 }
 0x5f5   :  { %v4369_v21 = vpop.eup %4368 }
 0x5f6   :  { %v4371_v56 = vpop.eup %4370  ;;  %v3318_v15 = vmul.f32 1.0614054, %v4369_v21 }
 0x5f7   :  { %v3319_v6 = vmul.f32 1.0614054, %v4371_v56  ;;  %v4373_v7 = vpop.eup %4372 }
 0x5f8   :  { %v3320_v63 = vadd.f32 -1.4531521, %v3318_v15  ;;  %v4375_v52 = vpop.eup %4374 }
 0x5f9   :  { %v3321_v36 = vadd.f32 -1.4531521, %v3319_v6 }
 0x5fa   :  { %v3322_v38 = vmul.f32 %v4369_v21, %v3320_v63 }
 0x5fb   :  { %v3323_v37 = vmul.f32 %v4371_v56, %v3321_v36 }
 0x5fc   :  { %v3324_v24 = vadd.f32 1.4214138, %v3322_v38 }
 0x5fd   :  { %v3325_v32 = vadd.f32 1.4214138, %v3323_v37 }
 0x5fe   :  { %v3326_v62 = vmul.f32 %v4369_v21, %v3324_v24 }
 0x5ff   :  { %v3327_v33 = vmul.f32 %v4371_v56, %v3325_v32 }
 0x600   :  { %v3328_v41 = vadd.f32 -0.28449672, %v3326_v62 }
 0x601   :  { %v3329_v4 = vadd.f32 -0.28449672, %v3327_v33 }
 0x602   :  { %v3330_v14 = vmul.f32 %v4369_v21, %v3328_v41 }
 0x603   :  { %v3331_v48 = vmul.f32 %v4371_v56, %v3329_v4 }
 0x604   :  { %v3332_v0 = vadd.f32 0.2548296, %v3330_v14 }
 0x605   :  { %v3333_v42 = vadd.f32 0.2548296, %v3331_v48 }
 0x606   :  { %v3334_v2 = vmul.f32 %v4369_v21, %v3332_v0 }
 0x607   :  { %v3335_v53 = vmul.f32 %v4371_v56, %v3333_v42 }
 0x608   :  { %v3344_v19 = vmul.f32 %v4373_v7, %v3334_v2 }
 0x609   :  { %v3345_v54 = vmul.f32 %v4375_v52, %v3335_v53 }
 0x60a   :  { %v3346_v46 = vsub.f32 1.0, %v3344_v19 }
 0x60b   :  { %v3347_v20 = vsub.f32 1.0, %v3345_v54 }
 0x60c   :  { %v3350_v28 = vsub.f32 0.0, %v3346_v46 }
 0x60d   :  { %v3351_v59 = vsub.f32 0.0, %v3347_v20 }
 0x60e   :  { %v3352_v49 = vsel %vm3348_vm10, %v3350_v28, %v3346_v46 }
 0x60f   :  { %v3354_v61 = vadd.f32 1.0, %v3352_v49  ;;  %v3353_v18 = vsel %vm3349_vm11, %v3351_v59, %v3347_v20 }
 0x610   :  { %v3355_v51 = vadd.f32 1.0, %v3353_v18 }
 0x611   :  { %v3356_v12 = vmul.f32 %v3354_v61, %v3306_v23 }
 0x612   :  { %v3357_v40 = vmul.f32 %v3355_v51, %v3307_v57 }
 0x614   :  { %3461 = vmatprep.mubr.f32.mxu1 %v3357_v40 }
 0x615   :  { %3462 = vmatmul.mubr.f32.vlgmr.msra.gmra.mrb[8].mxu1 %v3356_v12 }
 0x6e8   :  { %v3671_v22 = vpop.f32.mrb[8].mxu1 }
 0x6e9   :  { %v3672_v11 = vpop.f32.mrb[9].mxu1 }
 0x6ea   :  { %v3673_v29 = vadd.f32 %v3672_v11, %v3671_v22 }
 0x6ec   :  { %v3464_v1 = vadd.f32 %v3673_v29, %v3556_v30 }
 0x6ee   :  { %3467 = vst [vmem:[#allocation13] sm:$0xff] %v3464_v1 }
 0x6ef   :  { %4519 = shalt.err (!%p4516_p10)
}
 0x6f0   :  { %s4520_s18 = scalar_lea.hbm %s5677_s16, 128 }
 0x6f1   :  { %p4521_p11 = scmp.ne.s32.totalorder %s5677_s16, %s4520_s18  ;;  %p4524_p12 = scmp.lt.u32.totalorder %s4520_s18, %s5677_s16 }
 0x6f3   :  { %p4526_p13 = pnand %p4524_p12, %p4521_p11 }
 0x6f5   :  { %4529 = shalt.err (!%p4526_p13)
}
 0x6f6   :  { %3477 = dma.vmem_to_hbm [thread:$0]  %s3475_s22, 128, %s5677_s16, [#allocation4]  }
 0x6f7   :  { %4538 = dma.done.wait [#allocation4], 128  }
 0x6f8   :  { %4539 = vsyncadd [#allocation4], 4294967168 }
 0x6f9   :  { %3481 = vsyncpa [#allocation3], 1 }
 0x6fa   :  { %3482 = vsyncpa [#allocation6], 1 }
 0x6fb   :  { %3483 = vsyncpa [#allocation9], 1 }
 0x6fc   :  { %3484 = vsyncpa [#allocation12], 1 }
 0x6fd   :  { %3485 = vsyncpa [#allocation4], 1 }

</bundles_post_ra>
